<compile_context>
chip_gen: v6e
topology: v6e:2x2x1
jax: 0.10.0
libtpu: 0.0.40
codegen_flags: <defaults>
</compile_context>

<pallas_src>
import numpy as np

import jax
import jax.numpy as jnp
from jax.experimental import pallas as pl
from jax.experimental.pallas import tpu as pltpu


# ----------------------------------------------------------------------------
# Fused Pallas kernel: the whole ConvReg forward in one invocation.
#
# Activation layout inside the kernel: (channels, N*H*W)  ("channels-major").
#   conv layer   : acc(Cout,Mout) = sum_tap W_tap(Cout,Cin) @ (X(Cin,Min) @ G_tap(Min,Mout))
#   deconv layer : acc(Cout,Mout) = sum_tap (W_tap(Cout,Cin) @ X(Cin,Min)) @ S_tap(Min,Mout)
# where G_tap / S_tap are 0/1 one-hot gather / scatter matrices (selection via
# matmul is exact and stays on the MXU).
# ----------------------------------------------------------------------------
def _convreg_kernel(x0_ref, w1_ref, g1_ref, b1_ref,
                    w2_ref, g2_ref, b2_ref,
                    tw1_ref, s1_ref, tb1_ref,
                    tw2_ref, s2_ref, tb2_ref,
                    o_ref):
    f32 = jnp.float32
    bf16 = jnp.bfloat16

    def conv(x, w_ref, g_ref, b_ref):
        taps, cout, _ = w_ref.shape
        mout = g_ref.shape[2]
        acc = jnp.zeros((cout, mout), f32)
        for t in range(taps):
            gath = jnp.dot(x, g_ref[t], preferred_element_type=f32)          # (Cin, Mout)
            acc = acc + jnp.dot(w_ref[t], gath.astype(bf16),
                                preferred_element_type=f32)                  # (Cout, Mout)
        return acc + b_ref[...]                                              # f32 epilogue

    def deconv(x, w_ref, s_ref, b_ref):
        taps, cout, _ = w_ref.shape
        mout = s_ref.shape[2]
        acc = jnp.zeros((cout, mout), f32)
        for t in range(taps):
            v = jnp.dot(w_ref[t], x, preferred_element_type=f32)             # (Cout, Min)
            acc = acc + jnp.dot(v.astype(bf16), s_ref[t],
                                preferred_element_type=f32)                  # (Cout, Mout)
        return acc + b_ref[...]

    x0 = x0_ref[...]                                                         # (3,   N*H*W)    bf16
    a1 = jnp.maximum(conv(x0, w1_ref, g1_ref, b1_ref), 0.0).astype(bf16)     # (64,  N*H*W/4)
    a2 = jnp.maximum(conv(a1, w2_ref, g2_ref, b2_ref), 0.0).astype(bf16)     # (128, N*H*W/16)
    a3 = jnp.maximum(deconv(a2, tw1_ref, s1_ref, tb1_ref), 0.0).astype(bf16) # (64,  N*H*W/4)
    a4 = jax.nn.sigmoid(deconv(a3, tw2_ref, s2_ref, tb2_ref))                # (3,   N*H*W) f32

    nb, _, hw = o_ref.shape                                                  # (N, 3, H*W)
    for b in range(nb):
        o_ref[b] = a4[:, b * hw:(b + 1) * hw]                                # lane-dense store


# ----------------------------------------------------------------------------
# One-time packing: weights -> per-tap matrices, gather/scatter one-hots.
# ----------------------------------------------------------------------------
def _conv_gather_mats(n, h, w, k, stride, pad):
    """G[t, m_in, m_out] = 1 iff output pos m_out reads input pos m_in at tap t."""
    ho = (h + 2 * pad - k) // stride + 1
    wo = (w + 2 * pad - k) // stride + 1
    g = np.zeros((k * k, n * h * w, n * ho * wo), np.float32)
    for di in range(k):
        for dj in range(k):
            t = di * k + dj
            for b in range(n):
                for i in range(ho):
                    hi = stride * i + di - pad
                    if hi < 0 or hi >= h:
                        continue
                    for j in range(wo):
                        wj = stride * j + dj - pad
                        if wj < 0 or wj >= w:
                            continue
                        g[t, b * h * w + hi * w + wj, b * ho * wo + i * wo + j] = 1.0
    return g, ho, wo


def _deconv_scatter_mats(n, h, w, k):
    """stride == kernel == k.  S[t, m_in, m_out] = 1 iff input pos m_in writes m_out at tap t."""
    ho, wo = h * k, w * k
    s = np.zeros((k * k, n * h * w, n * ho * wo), np.float32)
    for di in range(k):
        for dj in range(k):
            t = di * k + dj
            for b in range(n):
                for i in range(h):
                    for j in range(w):
                        s[t, b * h * w + i * w + j,
                          b * ho * wo + (k * i + di) * wo + (k * j + dj)] = 1.0
    return s, ho, wo


def pack_params(params, batch, height, width):
    """Repack PyTorch-layout weights + build selection matrices (outside jit)."""
    assert height % 4 == 0 and width % 4 == 0
    g1, h1, w1o = _conv_gather_mats(batch, height, width, 3, 2, 1)
    g2, h2, w2o = _conv_gather_mats(batch, h1, w1o, 3, 2, 1)
    s1, h3, w3o = _deconv_scatter_mats(batch, h2, w2o, 2)
    s2, _, _ = _deconv_scatter_mats(batch, h3, w3o, 2)
    bf = jnp.bfloat16
    f32 = jnp.float32
    return {
        # conv1: (64,3,3,3) -> per-tap (9, Cout=64, Cin=3)
        "w1": jnp.transpose(params["w1"], (2, 3, 0, 1)).reshape(9, 64, 3).astype(bf),
        "g1": jnp.asarray(g1, bf),
        "b1": params["b1"].reshape(-1, 1).astype(f32),
        # conv2: (128,64,3,3) -> (9, 128, 64)
        "w2": jnp.transpose(params["w2"], (2, 3, 0, 1)).reshape(9, 128, 64).astype(bf),
        "g2": jnp.asarray(g2, bf),
        "b2": params["b2"].reshape(-1, 1).astype(f32),
        # t_conv1: (Cin=128,Cout=64,2,2) -> per-tap (4, Cout=64, Cin=128)
        "tw1": jnp.transpose(params["tw1"], (2, 3, 1, 0)).reshape(4, 64, 128).astype(bf),
        "s1": jnp.asarray(s1, bf),
        "tb1": params["tb1"].reshape(-1, 1).astype(f32),
        # t_conv2: (64,3,2,2) -> (4, 3, 64)
        "tw2": jnp.transpose(params["tw2"], (2, 3, 1, 0)).reshape(4, 3, 64).astype(bf),
        "s2": jnp.asarray(s2, bf),
        "tb2": params["tb2"].reshape(-1, 1).astype(f32),
    }


# ----------------------------------------------------------------------------
# Forward: one pallas_call, minimal boundary glue (input transpose ~6 KB,
# output reshape is free).
# ----------------------------------------------------------------------------
def convreg_forward(x_nchw, packed):
    n, c, h, w = x_nchw.shape
    x0 = jnp.transpose(x_nchw, (1, 0, 2, 3)).reshape(c, n * h * w).astype(jnp.bfloat16)
    out = pl.pallas_call(
        _convreg_kernel,
        out_shape=jax.ShapeDtypeStruct((n, 3, h * w), jnp.float32),
        compiler_params=pltpu.CompilerParams(vmem_limit_bytes=32 * 1024 * 1024),
    )(x0,
      packed["w1"], packed["g1"], packed["b1"],
      packed["w2"], packed["g2"], packed["b2"],
      packed["tw1"], packed["s1"], packed["tb1"],
      packed["tw2"], packed["s2"], packed["tb2"])
    return out.reshape(n, 3, h, w)


# ----------------------------------------------------------------------------
# Plain-JAX reference (f32, XLA ops only) for a correctness sanity check.
# ----------------------------------------------------------------------------
def _ref_conv2d(x, w, b, stride, pad):
    n, h, wd, cin = x.shape
    cout, _, kh, kw = w.shape
    xp = jnp.pad(x, ((0, 0), (pad, pad), (pad, pad), (0, 0)))
    ho = (h + 2 * pad - kh) // stride + 1
    wo = (wd + 2 * pad - kw) // stride + 1
    patches = [xp[:, di:di + stride * ho:stride, dj:dj + stride * wo:stride, :]
               for di in range(kh) for dj in range(kw)]
    cols = jnp.concatenate(patches, axis=-1).reshape(n * ho * wo, kh * kw * cin)
    wm = jnp.transpose(w, (2, 3, 1, 0)).reshape(kh * kw * cin, cout)
    return (cols @ wm + b).reshape(n, ho, wo, cout)


def _ref_convT2d(x, w, b):
    n, h, wd, cin = x.shape
    _, cout, kh, kw = w.shape
    y = x.reshape(n * h * wd, cin) @ w.reshape(cin, cout * kh * kw)
    y = y.reshape(n, h, wd, cout, kh, kw)
    y = jnp.transpose(y, (0, 1, 4, 2, 5, 3)).reshape(n, h * kh, wd * kw, cout)
    return y + b


def _reference_forward(x_nchw, params):
    x = jnp.transpose(x_nchw, (0, 2, 3, 1))
    x = jax.nn.relu(_ref_conv2d(x, params["w1"], params["b1"], 2, 1))
    x = jax.nn.relu(_ref_conv2d(x, params["w2"], params["b2"], 2, 1))
    x = jax.nn.relu(_ref_convT2d(x, params["tw1"], params["tb1"]))
    x = jax.nn.sigmoid(_ref_convT2d(x, params["tw2"], params["tb2"]))
    return jnp.transpose(x, (0, 3, 1, 2))


# ----------------------------------------------------------------------------
# Params (PyTorch-style layouts / init)
# ----------------------------------------------------------------------------
def init_params(key):
    ks = jax.random.split(key, 8)

    def u(k, shape, fan_in):
        bound = 1.0 / float(np.sqrt(fan_in))
        return jax.random.uniform(k, shape, jnp.float32, -bound, bound)

    return {
        "w1": u(ks[0], (64, 3, 3, 3), 3 * 3 * 3),
        "b1": u(ks[1], (64,), 3 * 3 * 3),
        "w2": u(ks[2], (128, 64, 3, 3), 64 * 3 * 3),
        "b2": u(ks[3], (128,), 64 * 3 * 3),
        "tw1": u(ks[4], (128, 64, 2, 2), 128 * 2 * 2),
        "tb1": u(ks[5], (64,), 128 * 2 * 2),
        "tw2": u(ks[6], (64, 3, 2, 2), 64 * 2 * 2),
        "tb2": u(ks[7], (3,), 64 * 2 * 2),
    }


if __name__ == "__main__":
    key = jax.random.PRNGKey(0)
    k_x, k_p = jax.random.split(key)
    x = jax.random.normal(k_x, (2, 3, 16, 16), jnp.float32)     # NCHW like PyTorch
    params = init_params(k_p)
    packed = pack_params(params, batch=2, height=16, width=16)  # one-time packing

    fwd = jax.jit(convreg_forward)
    out = jax.block_until_ready(fwd(x, packed))

    assert out.shape == (2, 3, 16, 16), out.shape
    assert bool(jnp.all(jnp.isfinite(out)))
    assert bool(jnp.all(out >= 0.0)) and bool(jnp.all(out <= 1.0))   # sigmoid range

    ref = jax.block_until_ready(jax.jit(_reference_forward)(x, params))
    max_err = float(jnp.max(jnp.abs(out - ref)))
    assert max_err < 3e-2, max_err   # bf16 MXU operands vs f32 reference

    print("KERNEL_OK")
</pallas_src>

<mosaic_0001>
module attributes {stable_mosaic.version = 11 : i64} {
  func.func @_convreg_kernel(%arg0: memref<3x512xbf16, #tpu.memory_space<vmem>>, %arg1: memref<9x64x3xbf16, #tpu.memory_space<vmem>>, %arg2: memref<9x512x128xbf16, #tpu.memory_space<vmem>>, %arg3: memref<64x1xf32, #tpu.memory_space<vmem>>, %arg4: memref<9x128x64xbf16, #tpu.memory_space<vmem>>, %arg5: memref<9x128x32xbf16, #tpu.memory_space<vmem>>, %arg6: memref<128x1xf32, #tpu.memory_space<vmem>>, %arg7: memref<4x64x128xbf16, #tpu.memory_space<vmem>>, %arg8: memref<4x32x128xbf16, #tpu.memory_space<vmem>>, %arg9: memref<64x1xf32, #tpu.memory_space<vmem>>, %arg10: memref<4x3x64xbf16, #tpu.memory_space<vmem>>, %arg11: memref<4x128x512xbf16, #tpu.memory_space<vmem>>, %arg12: memref<3x1xf32, #tpu.memory_space<vmem>>, %arg13: memref<2x3x256xf32, #tpu.memory_space<vmem>>) attributes {dimension_semantics = [], scalar_prefetch = 0 : i64, scratch_operands = 0 : i64, tpu.core_type = #tpu.core_type<tc>} {
    %c0 = arith.constant 0 : index
    %c0_0 = arith.constant 0 : index
    %0 = vector.load %arg0[%c0, %c0_0] : memref<3x512xbf16, #tpu.memory_space<vmem>>, vector<3x512xbf16>
    %cst = arith.constant 0.000000e+00 : f32
    %1 = vector.broadcast %cst : f32 to vector<64x128xf32>
    %c0_1 = arith.constant 0 : index
    %c0_2 = arith.constant 0 : index
    %c0_3 = arith.constant 0 : index
    %2 = vector.load %arg2[%c0_1, %c0_2, %c0_3] : memref<9x512x128xbf16, #tpu.memory_space<vmem>>, vector<1x512x128xbf16>
    %3 = vector.shape_cast %2 : vector<1x512x128xbf16> to vector<512x128xbf16>
    %cst_4 = arith.constant dense<0.000000e+00> : vector<3x128xf32>
    %4 = tpu.matmul %0, %3, %cst_4 {dimension_numbers = #tpu.dot_dimension_numbers<[1], [0], [0], [1], [0, 0, 1, 1], [], []>} : vector<3x512xbf16>, vector<512x128xbf16>, vector<3x128xf32> -> vector<3x128xf32>
    %c0_5 = arith.constant 0 : index
    %c0_6 = arith.constant 0 : index
    %c0_7 = arith.constant 0 : index
    %5 = vector.load %arg1[%c0_5, %c0_6, %c0_7] : memref<9x64x3xbf16, #tpu.memory_space<vmem>>, vector<1x64x3xbf16>
    %6 = vector.shape_cast %5 : vector<1x64x3xbf16> to vector<64x3xbf16>
    %7 = arith.truncf %4 : vector<3x128xf32> to vector<3x128xbf16>
    %cst_8 = arith.constant dense<0.000000e+00> : vector<64x128xf32>
    %8 = tpu.matmul %6, %7, %cst_8 {dimension_numbers = #tpu.dot_dimension_numbers<[1], [0], [0], [1], [0, 0, 1, 1], [], []>} : vector<64x3xbf16>, vector<3x128xbf16>, vector<64x128xf32> -> vector<64x128xf32>
    %9 = arith.addf %1, %8 : vector<64x128xf32>
    %c1 = arith.constant 1 : index
    %c0_9 = arith.constant 0 : index
    %c0_10 = arith.constant 0 : index
    %10 = vector.load %arg2[%c1, %c0_9, %c0_10] : memref<9x512x128xbf16, #tpu.memory_space<vmem>>, vector<1x512x128xbf16>
    %11 = vector.shape_cast %10 : vector<1x512x128xbf16> to vector<512x128xbf16>
    %cst_11 = arith.constant dense<0.000000e+00> : vector<3x128xf32>
    %12 = tpu.matmul %0, %11, %cst_11 {dimension_numbers = #tpu.dot_dimension_numbers<[1], [0], [0], [1], [0, 0, 1, 1], [], []>} : vector<3x512xbf16>, vector<512x128xbf16>, vector<3x128xf32> -> vector<3x128xf32>
    %c1_12 = arith.constant 1 : index
    %c0_13 = arith.constant 0 : index
    %c0_14 = arith.constant 0 : index
    %13 = vector.load %arg1[%c1_12, %c0_13, %c0_14] : memref<9x64x3xbf16, #tpu.memory_space<vmem>>, vector<1x64x3xbf16>
    %14 = vector.shape_cast %13 : vector<1x64x3xbf16> to vector<64x3xbf16>
    %15 = arith.truncf %12 : vector<3x128xf32> to vector<3x128xbf16>
    %cst_15 = arith.constant dense<0.000000e+00> : vector<64x128xf32>
    %16 = tpu.matmul %14, %15, %cst_15 {dimension_numbers = #tpu.dot_dimension_numbers<[1], [0], [0], [1], [0, 0, 1, 1], [], []>} : vector<64x3xbf16>, vector<3x128xbf16>, vector<64x128xf32> -> vector<64x128xf32>
    %17 = arith.addf %9, %16 : vector<64x128xf32>
    %c2 = arith.constant 2 : index
    %c0_16 = arith.constant 0 : index
    %c0_17 = arith.constant 0 : index
    %18 = vector.load %arg2[%c2, %c0_16, %c0_17] : memref<9x512x128xbf16, #tpu.memory_space<vmem>>, vector<1x512x128xbf16>
    %19 = vector.shape_cast %18 : vector<1x512x128xbf16> to vector<512x128xbf16>
    %cst_18 = arith.constant dense<0.000000e+00> : vector<3x128xf32>
    %20 = tpu.matmul %0, %19, %cst_18 {dimension_numbers = #tpu.dot_dimension_numbers<[1], [0], [0], [1], [0, 0, 1, 1], [], []>} : vector<3x512xbf16>, vector<512x128xbf16>, vector<3x128xf32> -> vector<3x128xf32>
    %c2_19 = arith.constant 2 : index
    %c0_20 = arith.constant 0 : index
    %c0_21 = arith.constant 0 : index
    %21 = vector.load %arg1[%c2_19, %c0_20, %c0_21] : memref<9x64x3xbf16, #tpu.memory_space<vmem>>, vector<1x64x3xbf16>
    %22 = vector.shape_cast %21 : vector<1x64x3xbf16> to vector<64x3xbf16>
    %23 = arith.truncf %20 : vector<3x128xf32> to vector<3x128xbf16>
    %cst_22 = arith.constant dense<0.000000e+00> : vector<64x128xf32>
    %24 = tpu.matmul %22, %23, %cst_22 {dimension_numbers = #tpu.dot_dimension_numbers<[1], [0], [0], [1], [0, 0, 1, 1], [], []>} : vector<64x3xbf16>, vector<3x128xbf16>, vector<64x128xf32> -> vector<64x128xf32>
    %25 = arith.addf %17, %24 : vector<64x128xf32>
    %c3 = arith.constant 3 : index
    %c0_23 = arith.constant 0 : index
    %c0_24 = arith.constant 0 : index
    %26 = vector.load %arg2[%c3, %c0_23, %c0_24] : memref<9x512x128xbf16, #tpu.memory_space<vmem>>, vector<1x512x128xbf16>
    %27 = vector.shape_cast %26 : vector<1x512x128xbf16> to vector<512x128xbf16>
    %cst_25 = arith.constant dense<0.000000e+00> : vector<3x128xf32>
    %28 = tpu.matmul %0, %27, %cst_25 {dimension_numbers = #tpu.dot_dimension_numbers<[1], [0], [0], [1], [0, 0, 1, 1], [], []>} : vector<3x512xbf16>, vector<512x128xbf16>, vector<3x128xf32> -> vector<3x128xf32>
    %c3_26 = arith.constant 3 : index
    %c0_27 = arith.constant 0 : index
    %c0_28 = arith.constant 0 : index
    %29 = vector.load %arg1[%c3_26, %c0_27, %c0_28] : memref<9x64x3xbf16, #tpu.memory_space<vmem>>, vector<1x64x3xbf16>
    %30 = vector.shape_cast %29 : vector<1x64x3xbf16> to vector<64x3xbf16>
    %31 = arith.truncf %28 : vector<3x128xf32> to vector<3x128xbf16>
    %cst_29 = arith.constant dense<0.000000e+00> : vector<64x128xf32>
    %32 = tpu.matmul %30, %31, %cst_29 {dimension_numbers = #tpu.dot_dimension_numbers<[1], [0], [0], [1], [0, 0, 1, 1], [], []>} : vector<64x3xbf16>, vector<3x128xbf16>, vector<64x128xf32> -> vector<64x128xf32>
    %33 = arith.addf %25, %32 : vector<64x128xf32>
    %c4 = arith.constant 4 : index
    %c0_30 = arith.constant 0 : index
    %c0_31 = arith.constant 0 : index
    %34 = vector.load %arg2[%c4, %c0_30, %c0_31] : memref<9x512x128xbf16, #tpu.memory_space<vmem>>, vector<1x512x128xbf16>
    %35 = vector.shape_cast %34 : vector<1x512x128xbf16> to vector<512x128xbf16>
    %cst_32 = arith.constant dense<0.000000e+00> : vector<3x128xf32>
    %36 = tpu.matmul %0, %35, %cst_32 {dimension_numbers = #tpu.dot_dimension_numbers<[1], [0], [0], [1], [0, 0, 1, 1], [], []>} : vector<3x512xbf16>, vector<512x128xbf16>, vector<3x128xf32> -> vector<3x128xf32>
    %c4_33 = arith.constant 4 : index
    %c0_34 = arith.constant 0 : index
    %c0_35 = arith.constant 0 : index
    %37 = vector.load %arg1[%c4_33, %c0_34, %c0_35] : memref<9x64x3xbf16, #tpu.memory_space<vmem>>, vector<1x64x3xbf16>
    %38 = vector.shape_cast %37 : vector<1x64x3xbf16> to vector<64x3xbf16>
    %39 = arith.truncf %36 : vector<3x128xf32> to vector<3x128xbf16>
    %cst_36 = arith.constant dense<0.000000e+00> : vector<64x128xf32>
    %40 = tpu.matmul %38, %39, %cst_36 {dimension_numbers = #tpu.dot_dimension_numbers<[1], [0], [0], [1], [0, 0, 1, 1], [], []>} : vector<64x3xbf16>, vector<3x128xbf16>, vector<64x128xf32> -> vector<64x128xf32>
    %41 = arith.addf %33, %40 : vector<64x128xf32>
    %c5 = arith.constant 5 : index
    %c0_37 = arith.constant 0 : index
    %c0_38 = arith.constant 0 : index
    %42 = vector.load %arg2[%c5, %c0_37, %c0_38] : memref<9x512x128xbf16, #tpu.memory_space<vmem>>, vector<1x512x128xbf16>
    %43 = vector.shape_cast %42 : vector<1x512x128xbf16> to vector<512x128xbf16>
    %cst_39 = arith.constant dense<0.000000e+00> : vector<3x128xf32>
    %44 = tpu.matmul %0, %43, %cst_39 {dimension_numbers = #tpu.dot_dimension_numbers<[1], [0], [0], [1], [0, 0, 1, 1], [], []>} : vector<3x512xbf16>, vector<512x128xbf16>, vector<3x128xf32> -> vector<3x128xf32>
    %c5_40 = arith.constant 5 : index
    %c0_41 = arith.constant 0 : index
    %c0_42 = arith.constant 0 : index
    %45 = vector.load %arg1[%c5_40, %c0_41, %c0_42] : memref<9x64x3xbf16, #tpu.memory_space<vmem>>, vector<1x64x3xbf16>
    %46 = vector.shape_cast %45 : vector<1x64x3xbf16> to vector<64x3xbf16>
    %47 = arith.truncf %44 : vector<3x128xf32> to vector<3x128xbf16>
    %cst_43 = arith.constant dense<0.000000e+00> : vector<64x128xf32>
    %48 = tpu.matmul %46, %47, %cst_43 {dimension_numbers = #tpu.dot_dimension_numbers<[1], [0], [0], [1], [0, 0, 1, 1], [], []>} : vector<64x3xbf16>, vector<3x128xbf16>, vector<64x128xf32> -> vector<64x128xf32>
    %49 = arith.addf %41, %48 : vector<64x128xf32>
    %c6 = arith.constant 6 : index
    %c0_44 = arith.constant 0 : index
    %c0_45 = arith.constant 0 : index
    %50 = vector.load %arg2[%c6, %c0_44, %c0_45] : memref<9x512x128xbf16, #tpu.memory_space<vmem>>, vector<1x512x128xbf16>
    %51 = vector.shape_cast %50 : vector<1x512x128xbf16> to vector<512x128xbf16>
    %cst_46 = arith.constant dense<0.000000e+00> : vector<3x128xf32>
    %52 = tpu.matmul %0, %51, %cst_46 {dimension_numbers = #tpu.dot_dimension_numbers<[1], [0], [0], [1], [0, 0, 1, 1], [], []>} : vector<3x512xbf16>, vector<512x128xbf16>, vector<3x128xf32> -> vector<3x128xf32>
    %c6_47 = arith.constant 6 : index
    %c0_48 = arith.constant 0 : index
    %c0_49 = arith.constant 0 : index
    %53 = vector.load %arg1[%c6_47, %c0_48, %c0_49] : memref<9x64x3xbf16, #tpu.memory_space<vmem>>, vector<1x64x3xbf16>
    %54 = vector.shape_cast %53 : vector<1x64x3xbf16> to vector<64x3xbf16>
    %55 = arith.truncf %52 : vector<3x128xf32> to vector<3x128xbf16>
    %cst_50 = arith.constant dense<0.000000e+00> : vector<64x128xf32>
    %56 = tpu.matmul %54, %55, %cst_50 {dimension_numbers = #tpu.dot_dimension_numbers<[1], [0], [0], [1], [0, 0, 1, 1], [], []>} : vector<64x3xbf16>, vector<3x128xbf16>, vector<64x128xf32> -> vector<64x128xf32>
    %57 = arith.addf %49, %56 : vector<64x128xf32>
    %c7 = arith.constant 7 : index
    %c0_51 = arith.constant 0 : index
    %c0_52 = arith.constant 0 : index
    %58 = vector.load %arg2[%c7, %c0_51, %c0_52] : memref<9x512x128xbf16, #tpu.memory_space<vmem>>, vector<1x512x128xbf16>
    %59 = vector.shape_cast %58 : vector<1x512x128xbf16> to vector<512x128xbf16>
    %cst_53 = arith.constant dense<0.000000e+00> : vector<3x128xf32>
    %60 = tpu.matmul %0, %59, %cst_53 {dimension_numbers = #tpu.dot_dimension_numbers<[1], [0], [0], [1], [0, 0, 1, 1], [], []>} : vector<3x512xbf16>, vector<512x128xbf16>, vector<3x128xf32> -> vector<3x128xf32>
    %c7_54 = arith.constant 7 : index
    %c0_55 = arith.constant 0 : index
    %c0_56 = arith.constant 0 : index
    %61 = vector.load %arg1[%c7_54, %c0_55, %c0_56] : memref<9x64x3xbf16, #tpu.memory_space<vmem>>, vector<1x64x3xbf16>
    %62 = vector.shape_cast %61 : vector<1x64x3xbf16> to vector<64x3xbf16>
    %63 = arith.truncf %60 : vector<3x128xf32> to vector<3x128xbf16>
    %cst_57 = arith.constant dense<0.000000e+00> : vector<64x128xf32>
    %64 = tpu.matmul %62, %63, %cst_57 {dimension_numbers = #tpu.dot_dimension_numbers<[1], [0], [0], [1], [0, 0, 1, 1], [], []>} : vector<64x3xbf16>, vector<3x128xbf16>, vector<64x128xf32> -> vector<64x128xf32>
    %65 = arith.addf %57, %64 : vector<64x128xf32>
    %c8 = arith.constant 8 : index
    %c0_58 = arith.constant 0 : index
    %c0_59 = arith.constant 0 : index
    %66 = vector.load %arg2[%c8, %c0_58, %c0_59] : memref<9x512x128xbf16, #tpu.memory_space<vmem>>, vector<1x512x128xbf16>
    %67 = vector.shape_cast %66 : vector<1x512x128xbf16> to vector<512x128xbf16>
    %cst_60 = arith.constant dense<0.000000e+00> : vector<3x128xf32>
    %68 = tpu.matmul %0, %67, %cst_60 {dimension_numbers = #tpu.dot_dimension_numbers<[1], [0], [0], [1], [0, 0, 1, 1], [], []>} : vector<3x512xbf16>, vector<512x128xbf16>, vector<3x128xf32> -> vector<3x128xf32>
    %c8_61 = arith.constant 8 : index
    %c0_62 = arith.constant 0 : index
    %c0_63 = arith.constant 0 : index
    %69 = vector.load %arg1[%c8_61, %c0_62, %c0_63] : memref<9x64x3xbf16, #tpu.memory_space<vmem>>, vector<1x64x3xbf16>
    %70 = vector.shape_cast %69 : vector<1x64x3xbf16> to vector<64x3xbf16>
    %71 = arith.truncf %68 : vector<3x128xf32> to vector<3x128xbf16>
    %cst_64 = arith.constant dense<0.000000e+00> : vector<64x128xf32>
    %72 = tpu.matmul %70, %71, %cst_64 {dimension_numbers = #tpu.dot_dimension_numbers<[1], [0], [0], [1], [0, 0, 1, 1], [], []>} : vector<64x3xbf16>, vector<3x128xbf16>, vector<64x128xf32> -> vector<64x128xf32>
    %73 = arith.addf %65, %72 : vector<64x128xf32>
    %c0_65 = arith.constant 0 : index
    %c0_66 = arith.constant 0 : index
    %74 = vector.load %arg3[%c0_65, %c0_66] : memref<64x1xf32, #tpu.memory_space<vmem>>, vector<64x1xf32>
    %75 = vector.broadcast %74 : vector<64x1xf32> to vector<64x128xf32>
    %76 = arith.addf %73, %75 : vector<64x128xf32>
    %cst_67 = arith.constant 0.000000e+00 : f32
    %77 = vector.broadcast %cst_67 : f32 to vector<64x128xf32>
    %78 = arith.maximumf %76, %77 : vector<64x128xf32>
    %79 = arith.truncf %78 : vector<64x128xf32> to vector<64x128xbf16>
    %cst_68 = arith.constant 0.000000e+00 : f32
    %80 = vector.broadcast %cst_68 : f32 to vector<128x32xf32>
    %c0_69 = arith.constant 0 : index
    %c0_70 = arith.constant 0 : index
    %c0_71 = arith.constant 0 : index
    %81 = vector.load %arg5[%c0_69, %c0_70, %c0_71] : memref<9x128x32xbf16, #tpu.memory_space<vmem>>, vector<1x128x32xbf16>
    %82 = vector.shape_cast %81 : vector<1x128x32xbf16> to vector<128x32xbf16>
    %cst_72 = arith.constant dense<0.000000e+00> : vector<64x32xf32>
    %83 = tpu.matmul %79, %82, %cst_72 {dimension_numbers = #tpu.dot_dimension_numbers<[1], [0], [0], [1], [0, 0, 1, 1], [], []>} : vector<64x128xbf16>, vector<128x32xbf16>, vector<64x32xf32> -> vector<64x32xf32>
    %c0_73 = arith.constant 0 : index
    %c0_74 = arith.constant 0 : index
    %c0_75 = arith.constant 0 : index
    %84 = vector.load %arg4[%c0_73, %c0_74, %c0_75] : memref<9x128x64xbf16, #tpu.memory_space<vmem>>, vector<1x128x64xbf16>
    %85 = vector.shape_cast %84 : vector<1x128x64xbf16> to vector<128x64xbf16>
    %86 = arith.truncf %83 : vector<64x32xf32> to vector<64x32xbf16>
    %cst_76 = arith.constant dense<0.000000e+00> : vector<128x32xf32>
    %87 = tpu.matmul %85, %86, %cst_76 {dimension_numbers = #tpu.dot_dimension_numbers<[1], [0], [0], [1], [0, 0, 1, 1], [], []>} : vector<128x64xbf16>, vector<64x32xbf16>, vector<128x32xf32> -> vector<128x32xf32>
    %88 = arith.addf %80, %87 : vector<128x32xf32>
    %c1_77 = arith.constant 1 : index
    %c0_78 = arith.constant 0 : index
    %c0_79 = arith.constant 0 : index
    %89 = vector.load %arg5[%c1_77, %c0_78, %c0_79] : memref<9x128x32xbf16, #tpu.memory_space<vmem>>, vector<1x128x32xbf16>
    %90 = vector.shape_cast %89 : vector<1x128x32xbf16> to vector<128x32xbf16>
    %cst_80 = arith.constant dense<0.000000e+00> : vector<64x32xf32>
    %91 = tpu.matmul %79, %90, %cst_80 {dimension_numbers = #tpu.dot_dimension_numbers<[1], [0], [0], [1], [0, 0, 1, 1], [], []>} : vector<64x128xbf16>, vector<128x32xbf16>, vector<64x32xf32> -> vector<64x32xf32>
    %c1_81 = arith.constant 1 : index
    %c0_82 = arith.constant 0 : index
    %c0_83 = arith.constant 0 : index
    %92 = vector.load %arg4[%c1_81, %c0_82, %c0_83] : memref<9x128x64xbf16, #tpu.memory_space<vmem>>, vector<1x128x64xbf16>
    %93 = vector.shape_cast %92 : vector<1x128x64xbf16> to vector<128x64xbf16>
    %94 = arith.truncf %91 : vector<64x32xf32> to vector<64x32xbf16>
    %cst_84 = arith.constant dense<0.000000e+00> : vector<128x32xf32>
    %95 = tpu.matmul %93, %94, %cst_84 {dimension_numbers = #tpu.dot_dimension_numbers<[1], [0], [0], [1], [0, 0, 1, 1], [], []>} : vector<128x64xbf16>, vector<64x32xbf16>, vector<128x32xf32> -> vector<128x32xf32>
    %96 = arith.addf %88, %95 : vector<128x32xf32>
    %c2_85 = arith.constant 2 : index
    %c0_86 = arith.constant 0 : index
    %c0_87 = arith.constant 0 : index
    %97 = vector.load %arg5[%c2_85, %c0_86, %c0_87] : memref<9x128x32xbf16, #tpu.memory_space<vmem>>, vector<1x128x32xbf16>
    %98 = vector.shape_cast %97 : vector<1x128x32xbf16> to vector<128x32xbf16>
    %cst_88 = arith.constant dense<0.000000e+00> : vector<64x32xf32>
    %99 = tpu.matmul %79, %98, %cst_88 {dimension_numbers = #tpu.dot_dimension_numbers<[1], [0], [0], [1], [0, 0, 1, 1], [], []>} : vector<64x128xbf16>, vector<128x32xbf16>, vector<64x32xf32> -> vector<64x32xf32>
    %c2_89 = arith.constant 2 : index
    %c0_90 = arith.constant 0 : index
    %c0_91 = arith.constant 0 : index
    %100 = vector.load %arg4[%c2_89, %c0_90, %c0_91] : memref<9x128x64xbf16, #tpu.memory_space<vmem>>, vector<1x128x64xbf16>
    %101 = vector.shape_cast %100 : vector<1x128x64xbf16> to vector<128x64xbf16>
    %102 = arith.truncf %99 : vector<64x32xf32> to vector<64x32xbf16>
    %cst_92 = arith.constant dense<0.000000e+00> : vector<128x32xf32>
    %103 = tpu.matmul %101, %102, %cst_92 {dimension_numbers = #tpu.dot_dimension_numbers<[1], [0], [0], [1], [0, 0, 1, 1], [], []>} : vector<128x64xbf16>, vector<64x32xbf16>, vector<128x32xf32> -> vector<128x32xf32>
    %104 = arith.addf %96, %103 : vector<128x32xf32>
    %c3_93 = arith.constant 3 : index
    %c0_94 = arith.constant 0 : index
    %c0_95 = arith.constant 0 : index
    %105 = vector.load %arg5[%c3_93, %c0_94, %c0_95] : memref<9x128x32xbf16, #tpu.memory_space<vmem>>, vector<1x128x32xbf16>
    %106 = vector.shape_cast %105 : vector<1x128x32xbf16> to vector<128x32xbf16>
    %cst_96 = arith.constant dense<0.000000e+00> : vector<64x32xf32>
    %107 = tpu.matmul %79, %106, %cst_96 {dimension_numbers = #tpu.dot_dimension_numbers<[1], [0], [0], [1], [0, 0, 1, 1], [], []>} : vector<64x128xbf16>, vector<128x32xbf16>, vector<64x32xf32> -> vector<64x32xf32>
    %c3_97 = arith.constant 3 : index
    %c0_98 = arith.constant 0 : index
    %c0_99 = arith.constant 0 : index
    %108 = vector.load %arg4[%c3_97, %c0_98, %c0_99] : memref<9x128x64xbf16, #tpu.memory_space<vmem>>, vector<1x128x64xbf16>
    %109 = vector.shape_cast %108 : vector<1x128x64xbf16> to vector<128x64xbf16>
    %110 = arith.truncf %107 : vector<64x32xf32> to vector<64x32xbf16>
    %cst_100 = arith.constant dense<0.000000e+00> : vector<128x32xf32>
    %111 = tpu.matmul %109, %110, %cst_100 {dimension_numbers = #tpu.dot_dimension_numbers<[1], [0], [0], [1], [0, 0, 1, 1], [], []>} : vector<128x64xbf16>, vector<64x32xbf16>, vector<128x32xf32> -> vector<128x32xf32>
    %112 = arith.addf %104, %111 : vector<128x32xf32>
    %c4_101 = arith.constant 4 : index
    %c0_102 = arith.constant 0 : index
    %c0_103 = arith.constant 0 : index
    %113 = vector.load %arg5[%c4_101, %c0_102, %c0_103] : memref<9x128x32xbf16, #tpu.memory_space<vmem>>, vector<1x128x32xbf16>
    %114 = vector.shape_cast %113 : vector<1x128x32xbf16> to vector<128x32xbf16>
    %cst_104 = arith.constant dense<0.000000e+00> : vector<64x32xf32>
    %115 = tpu.matmul %79, %114, %cst_104 {dimension_numbers = #tpu.dot_dimension_numbers<[1], [0], [0], [1], [0, 0, 1, 1], [], []>} : vector<64x128xbf16>, vector<128x32xbf16>, vector<64x32xf32> -> vector<64x32xf32>
    %c4_105 = arith.constant 4 : index
    %c0_106 = arith.constant 0 : index
    %c0_107 = arith.constant 0 : index
    %116 = vector.load %arg4[%c4_105, %c0_106, %c0_107] : memref<9x128x64xbf16, #tpu.memory_space<vmem>>, vector<1x128x64xbf16>
    %117 = vector.shape_cast %116 : vector<1x128x64xbf16> to vector<128x64xbf16>
    %118 = arith.truncf %115 : vector<64x32xf32> to vector<64x32xbf16>
    %cst_108 = arith.constant dense<0.000000e+00> : vector<128x32xf32>
    %119 = tpu.matmul %117, %118, %cst_108 {dimension_numbers = #tpu.dot_dimension_numbers<[1], [0], [0], [1], [0, 0, 1, 1], [], []>} : vector<128x64xbf16>, vector<64x32xbf16>, vector<128x32xf32> -> vector<128x32xf32>
    %120 = arith.addf %112, %119 : vector<128x32xf32>
    %c5_109 = arith.constant 5 : index
    %c0_110 = arith.constant 0 : index
    %c0_111 = arith.constant 0 : index
    %121 = vector.load %arg5[%c5_109, %c0_110, %c0_111] : memref<9x128x32xbf16, #tpu.memory_space<vmem>>, vector<1x128x32xbf16>
    %122 = vector.shape_cast %121 : vector<1x128x32xbf16> to vector<128x32xbf16>
    %cst_112 = arith.constant dense<0.000000e+00> : vector<64x32xf32>
    %123 = tpu.matmul %79, %122, %cst_112 {dimension_numbers = #tpu.dot_dimension_numbers<[1], [0], [0], [1], [0, 0, 1, 1], [], []>} : vector<64x128xbf16>, vector<128x32xbf16>, vector<64x32xf32> -> vector<64x32xf32>
    %c5_113 = arith.constant 5 : index
    %c0_114 = arith.constant 0 : index
    %c0_115 = arith.constant 0 : index
    %124 = vector.load %arg4[%c5_113, %c0_114, %c0_115] : memref<9x128x64xbf16, #tpu.memory_space<vmem>>, vector<1x128x64xbf16>
    %125 = vector.shape_cast %124 : vector<1x128x64xbf16> to vector<128x64xbf16>
    %126 = arith.truncf %123 : vector<64x32xf32> to vector<64x32xbf16>
    %cst_116 = arith.constant dense<0.000000e+00> : vector<128x32xf32>
    %127 = tpu.matmul %125, %126, %cst_116 {dimension_numbers = #tpu.dot_dimension_numbers<[1], [0], [0], [1], [0, 0, 1, 1], [], []>} : vector<128x64xbf16>, vector<64x32xbf16>, vector<128x32xf32> -> vector<128x32xf32>
    %128 = arith.addf %120, %127 : vector<128x32xf32>
    %c6_117 = arith.constant 6 : index
    %c0_118 = arith.constant 0 : index
    %c0_119 = arith.constant 0 : index
    %129 = vector.load %arg5[%c6_117, %c0_118, %c0_119] : memref<9x128x32xbf16, #tpu.memory_space<vmem>>, vector<1x128x32xbf16>
    %130 = vector.shape_cast %129 : vector<1x128x32xbf16> to vector<128x32xbf16>
    %cst_120 = arith.constant dense<0.000000e+00> : vector<64x32xf32>
    %131 = tpu.matmul %79, %130, %cst_120 {dimension_numbers = #tpu.dot_dimension_numbers<[1], [0], [0], [1], [0, 0, 1, 1], [], []>} : vector<64x128xbf16>, vector<128x32xbf16>, vector<64x32xf32> -> vector<64x32xf32>
    %c6_121 = arith.constant 6 : index
    %c0_122 = arith.constant 0 : index
    %c0_123 = arith.constant 0 : index
    %132 = vector.load %arg4[%c6_121, %c0_122, %c0_123] : memref<9x128x64xbf16, #tpu.memory_space<vmem>>, vector<1x128x64xbf16>
    %133 = vector.shape_cast %132 : vector<1x128x64xbf16> to vector<128x64xbf16>
    %134 = arith.truncf %131 : vector<64x32xf32> to vector<64x32xbf16>
    %cst_124 = arith.constant dense<0.000000e+00> : vector<128x32xf32>
    %135 = tpu.matmul %133, %134, %cst_124 {dimension_numbers = #tpu.dot_dimension_numbers<[1], [0], [0], [1], [0, 0, 1, 1], [], []>} : vector<128x64xbf16>, vector<64x32xbf16>, vector<128x32xf32> -> vector<128x32xf32>
    %136 = arith.addf %128, %135 : vector<128x32xf32>
    %c7_125 = arith.constant 7 : index
    %c0_126 = arith.constant 0 : index
    %c0_127 = arith.constant 0 : index
    %137 = vector.load %arg5[%c7_125, %c0_126, %c0_127] : memref<9x128x32xbf16, #tpu.memory_space<vmem>>, vector<1x128x32xbf16>
    %138 = vector.shape_cast %137 : vector<1x128x32xbf16> to vector<128x32xbf16>
    %cst_128 = arith.constant dense<0.000000e+00> : vector<64x32xf32>
    %139 = tpu.matmul %79, %138, %cst_128 {dimension_numbers = #tpu.dot_dimension_numbers<[1], [0], [0], [1], [0, 0, 1, 1], [], []>} : vector<64x128xbf16>, vector<128x32xbf16>, vector<64x32xf32> -> vector<64x32xf32>
    %c7_129 = arith.constant 7 : index
    %c0_130 = arith.constant 0 : index
    %c0_131 = arith.constant 0 : index
    %140 = vector.load %arg4[%c7_129, %c0_130, %c0_131] : memref<9x128x64xbf16, #tpu.memory_space<vmem>>, vector<1x128x64xbf16>
    %141 = vector.shape_cast %140 : vector<1x128x64xbf16> to vector<128x64xbf16>
    %142 = arith.truncf %139 : vector<64x32xf32> to vector<64x32xbf16>
    %cst_132 = arith.constant dense<0.000000e+00> : vector<128x32xf32>
    %143 = tpu.matmul %141, %142, %cst_132 {dimension_numbers = #tpu.dot_dimension_numbers<[1], [0], [0], [1], [0, 0, 1, 1], [], []>} : vector<128x64xbf16>, vector<64x32xbf16>, vector<128x32xf32> -> vector<128x32xf32>
    %144 = arith.addf %136, %143 : vector<128x32xf32>
    %c8_133 = arith.constant 8 : index
    %c0_134 = arith.constant 0 : index
    %c0_135 = arith.constant 0 : index
    %145 = vector.load %arg5[%c8_133, %c0_134, %c0_135] : memref<9x128x32xbf16, #tpu.memory_space<vmem>>, vector<1x128x32xbf16>
    %146 = vector.shape_cast %145 : vector<1x128x32xbf16> to vector<128x32xbf16>
    %cst_136 = arith.constant dense<0.000000e+00> : vector<64x32xf32>
    %147 = tpu.matmul %79, %146, %cst_136 {dimension_numbers = #tpu.dot_dimension_numbers<[1], [0], [0], [1], [0, 0, 1, 1], [], []>} : vector<64x128xbf16>, vector<128x32xbf16>, vector<64x32xf32> -> vector<64x32xf32>
    %c8_137 = arith.constant 8 : index
    %c0_138 = arith.constant 0 : index
    %c0_139 = arith.constant 0 : index
    %148 = vector.load %arg4[%c8_137, %c0_138, %c0_139] : memref<9x128x64xbf16, #tpu.memory_space<vmem>>, vector<1x128x64xbf16>
    %149 = vector.shape_cast %148 : vector<1x128x64xbf16> to vector<128x64xbf16>
    %150 = arith.truncf %147 : vector<64x32xf32> to vector<64x32xbf16>
    %cst_140 = arith.constant dense<0.000000e+00> : vector<128x32xf32>
    %151 = tpu.matmul %149, %150, %cst_140 {dimension_numbers = #tpu.dot_dimension_numbers<[1], [0], [0], [1], [0, 0, 1, 1], [], []>} : vector<128x64xbf16>, vector<64x32xbf16>, vector<128x32xf32> -> vector<128x32xf32>
    %152 = arith.addf %144, %151 : vector<128x32xf32>
    %c0_141 = arith.constant 0 : index
    %c0_142 = arith.constant 0 : index
    %153 = vector.load %arg6[%c0_141, %c0_142] : memref<128x1xf32, #tpu.memory_space<vmem>>, vector<128x1xf32>
    %154 = vector.broadcast %153 : vector<128x1xf32> to vector<128x32xf32>
    %155 = arith.addf %152, %154 : vector<128x32xf32>
    %cst_143 = arith.constant 0.000000e+00 : f32
    %156 = vector.broadcast %cst_143 : f32 to vector<128x32xf32>
    %157 = arith.maximumf %155, %156 : vector<128x32xf32>
    %158 = arith.truncf %157 : vector<128x32xf32> to vector<128x32xbf16>
    %cst_144 = arith.constant 0.000000e+00 : f32
    %159 = vector.broadcast %cst_144 : f32 to vector<64x128xf32>
    %c0_145 = arith.constant 0 : index
    %c0_146 = arith.constant 0 : index
    %c0_147 = arith.constant 0 : index
    %160 = vector.load %arg7[%c0_145, %c0_146, %c0_147] : memref<4x64x128xbf16, #tpu.memory_space<vmem>>, vector<1x64x128xbf16>
    %161 = vector.shape_cast %160 : vector<1x64x128xbf16> to vector<64x128xbf16>
    %cst_148 = arith.constant dense<0.000000e+00> : vector<64x32xf32>
    %162 = tpu.matmul %161, %158, %cst_148 {dimension_numbers = #tpu.dot_dimension_numbers<[1], [0], [0], [1], [0, 0, 1, 1], [], []>} : vector<64x128xbf16>, vector<128x32xbf16>, vector<64x32xf32> -> vector<64x32xf32>
    %163 = arith.truncf %162 : vector<64x32xf32> to vector<64x32xbf16>
    %c0_149 = arith.constant 0 : index
    %c0_150 = arith.constant 0 : index
    %c0_151 = arith.constant 0 : index
    %164 = vector.load %arg8[%c0_149, %c0_150, %c0_151] : memref<4x32x128xbf16, #tpu.memory_space<vmem>>, vector<1x32x128xbf16>
    %165 = vector.shape_cast %164 : vector<1x32x128xbf16> to vector<32x128xbf16>
    %cst_152 = arith.constant dense<0.000000e+00> : vector<64x128xf32>
    %166 = tpu.matmul %163, %165, %cst_152 {dimension_numbers = #tpu.dot_dimension_numbers<[1], [0], [0], [1], [0, 0, 1, 1], [], []>} : vector<64x32xbf16>, vector<32x128xbf16>, vector<64x128xf32> -> vector<64x128xf32>
    %167 = arith.addf %159, %166 : vector<64x128xf32>
    %c1_153 = arith.constant 1 : index
    %c0_154 = arith.constant 0 : index
    %c0_155 = arith.constant 0 : index
    %168 = vector.load %arg7[%c1_153, %c0_154, %c0_155] : memref<4x64x128xbf16, #tpu.memory_space<vmem>>, vector<1x64x128xbf16>
    %169 = vector.shape_cast %168 : vector<1x64x128xbf16> to vector<64x128xbf16>
    %cst_156 = arith.constant dense<0.000000e+00> : vector<64x32xf32>
    %170 = tpu.matmul %169, %158, %cst_156 {dimension_numbers = #tpu.dot_dimension_numbers<[1], [0], [0], [1], [0, 0, 1, 1], [], []>} : vector<64x128xbf16>, vector<128x32xbf16>, vector<64x32xf32> -> vector<64x32xf32>
    %171 = arith.truncf %170 : vector<64x32xf32> to vector<64x32xbf16>
    %c1_157 = arith.constant 1 : index
    %c0_158 = arith.constant 0 : index
    %c0_159 = arith.constant 0 : index
    %172 = vector.load %arg8[%c1_157, %c0_158, %c0_159] : memref<4x32x128xbf16, #tpu.memory_space<vmem>>, vector<1x32x128xbf16>
    %173 = vector.shape_cast %172 : vector<1x32x128xbf16> to vector<32x128xbf16>
    %cst_160 = arith.constant dense<0.000000e+00> : vector<64x128xf32>
    %174 = tpu.matmul %171, %173, %cst_160 {dimension_numbers = #tpu.dot_dimension_numbers<[1], [0], [0], [1], [0, 0, 1, 1], [], []>} : vector<64x32xbf16>, vector<32x128xbf16>, vector<64x128xf32> -> vector<64x128xf32>
    %175 = arith.addf %167, %174 : vector<64x128xf32>
    %c2_161 = arith.constant 2 : index
    %c0_162 = arith.constant 0 : index
    %c0_163 = arith.constant 0 : index
    %176 = vector.load %arg7[%c2_161, %c0_162, %c0_163] : memref<4x64x128xbf16, #tpu.memory_space<vmem>>, vector<1x64x128xbf16>
    %177 = vector.shape_cast %176 : vector<1x64x128xbf16> to vector<64x128xbf16>
    %cst_164 = arith.constant dense<0.000000e+00> : vector<64x32xf32>
    %178 = tpu.matmul %177, %158, %cst_164 {dimension_numbers = #tpu.dot_dimension_numbers<[1], [0], [0], [1], [0, 0, 1, 1], [], []>} : vector<64x128xbf16>, vector<128x32xbf16>, vector<64x32xf32> -> vector<64x32xf32>
    %179 = arith.truncf %178 : vector<64x32xf32> to vector<64x32xbf16>
    %c2_165 = arith.constant 2 : index
    %c0_166 = arith.constant 0 : index
    %c0_167 = arith.constant 0 : index
    %180 = vector.load %arg8[%c2_165, %c0_166, %c0_167] : memref<4x32x128xbf16, #tpu.memory_space<vmem>>, vector<1x32x128xbf16>
    %181 = vector.shape_cast %180 : vector<1x32x128xbf16> to vector<32x128xbf16>
    %cst_168 = arith.constant dense<0.000000e+00> : vector<64x128xf32>
    %182 = tpu.matmul %179, %181, %cst_168 {dimension_numbers = #tpu.dot_dimension_numbers<[1], [0], [0], [1], [0, 0, 1, 1], [], []>} : vector<64x32xbf16>, vector<32x128xbf16>, vector<64x128xf32> -> vector<64x128xf32>
    %183 = arith.addf %175, %182 : vector<64x128xf32>
    %c3_169 = arith.constant 3 : index
    %c0_170 = arith.constant 0 : index
    %c0_171 = arith.constant 0 : index
    %184 = vector.load %arg7[%c3_169, %c0_170, %c0_171] : memref<4x64x128xbf16, #tpu.memory_space<vmem>>, vector<1x64x128xbf16>
    %185 = vector.shape_cast %184 : vector<1x64x128xbf16> to vector<64x128xbf16>
    %cst_172 = arith.constant dense<0.000000e+00> : vector<64x32xf32>
    %186 = tpu.matmul %185, %158, %cst_172 {dimension_numbers = #tpu.dot_dimension_numbers<[1], [0], [0], [1], [0, 0, 1, 1], [], []>} : vector<64x128xbf16>, vector<128x32xbf16>, vector<64x32xf32> -> vector<64x32xf32>
    %187 = arith.truncf %186 : vector<64x32xf32> to vector<64x32xbf16>
    %c3_173 = arith.constant 3 : index
    %c0_174 = arith.constant 0 : index
    %c0_175 = arith.constant 0 : index
    %188 = vector.load %arg8[%c3_173, %c0_174, %c0_175] : memref<4x32x128xbf16, #tpu.memory_space<vmem>>, vector<1x32x128xbf16>
    %189 = vector.shape_cast %188 : vector<1x32x128xbf16> to vector<32x128xbf16>
    %cst_176 = arith.constant dense<0.000000e+00> : vector<64x128xf32>
    %190 = tpu.matmul %187, %189, %cst_176 {dimension_numbers = #tpu.dot_dimension_numbers<[1], [0], [0], [1], [0, 0, 1, 1], [], []>} : vector<64x32xbf16>, vector<32x128xbf16>, vector<64x128xf32> -> vector<64x128xf32>
    %191 = arith.addf %183, %190 : vector<64x128xf32>
    %c0_177 = arith.constant 0 : index
    %c0_178 = arith.constant 0 : index
    %192 = vector.load %arg9[%c0_177, %c0_178] : memref<64x1xf32, #tpu.memory_space<vmem>>, vector<64x1xf32>
    %193 = vector.broadcast %192 : vector<64x1xf32> to vector<64x128xf32>
    %194 = arith.addf %191, %193 : vector<64x128xf32>
    %cst_179 = arith.constant 0.000000e+00 : f32
    %195 = vector.broadcast %cst_179 : f32 to vector<64x128xf32>
    %196 = arith.maximumf %194, %195 : vector<64x128xf32>
    %197 = arith.truncf %196 : vector<64x128xf32> to vector<64x128xbf16>
    %cst_180 = arith.constant 0.000000e+00 : f32
    %198 = vector.broadcast %cst_180 : f32 to vector<3x512xf32>
    %c0_181 = arith.constant 0 : index
    %c0_182 = arith.constant 0 : index
    %c0_183 = arith.constant 0 : index
    %199 = vector.load %arg10[%c0_181, %c0_182, %c0_183] : memref<4x3x64xbf16, #tpu.memory_space<vmem>>, vector<1x3x64xbf16>
    %200 = vector.shape_cast %199 : vector<1x3x64xbf16> to vector<3x64xbf16>
    %cst_184 = arith.constant dense<0.000000e+00> : vector<3x128xf32>
    %201 = tpu.matmul %200, %197, %cst_184 {dimension_numbers = #tpu.dot_dimension_numbers<[1], [0], [0], [1], [0, 0, 1, 1], [], []>} : vector<3x64xbf16>, vector<64x128xbf16>, vector<3x128xf32> -> vector<3x128xf32>
    %202 = arith.truncf %201 : vector<3x128xf32> to vector<3x128xbf16>
    %c0_185 = arith.constant 0 : index
    %c0_186 = arith.constant 0 : index
    %c0_187 = arith.constant 0 : index
    %203 = vector.load %arg11[%c0_185, %c0_186, %c0_187] : memref<4x128x512xbf16, #tpu.memory_space<vmem>>, vector<1x128x512xbf16>
    %204 = vector.shape_cast %203 : vector<1x128x512xbf16> to vector<128x512xbf16>
    %cst_188 = arith.constant dense<0.000000e+00> : vector<3x512xf32>
    %205 = tpu.matmul %202, %204, %cst_188 {dimension_numbers = #tpu.dot_dimension_numbers<[1], [0], [0], [1], [0, 0, 1, 1], [], []>} : vector<3x128xbf16>, vector<128x512xbf16>, vector<3x512xf32> -> vector<3x512xf32>
    %206 = arith.addf %198, %205 : vector<3x512xf32>
    %c1_189 = arith.constant 1 : index
    %c0_190 = arith.constant 0 : index
    %c0_191 = arith.constant 0 : index
    %207 = vector.load %arg10[%c1_189, %c0_190, %c0_191] : memref<4x3x64xbf16, #tpu.memory_space<vmem>>, vector<1x3x64xbf16>
    %208 = vector.shape_cast %207 : vector<1x3x64xbf16> to vector<3x64xbf16>
    %cst_192 = arith.constant dense<0.000000e+00> : vector<3x128xf32>
    %209 = tpu.matmul %208, %197, %cst_192 {dimension_numbers = #tpu.dot_dimension_numbers<[1], [0], [0], [1], [0, 0, 1, 1], [], []>} : vector<3x64xbf16>, vector<64x128xbf16>, vector<3x128xf32> -> vector<3x128xf32>
    %210 = arith.truncf %209 : vector<3x128xf32> to vector<3x128xbf16>
    %c1_193 = arith.constant 1 : index
    %c0_194 = arith.constant 0 : index
    %c0_195 = arith.constant 0 : index
    %211 = vector.load %arg11[%c1_193, %c0_194, %c0_195] : memref<4x128x512xbf16, #tpu.memory_space<vmem>>, vector<1x128x512xbf16>
    %212 = vector.shape_cast %211 : vector<1x128x512xbf16> to vector<128x512xbf16>
    %cst_196 = arith.constant dense<0.000000e+00> : vector<3x512xf32>
    %213 = tpu.matmul %210, %212, %cst_196 {dimension_numbers = #tpu.dot_dimension_numbers<[1], [0], [0], [1], [0, 0, 1, 1], [], []>} : vector<3x128xbf16>, vector<128x512xbf16>, vector<3x512xf32> -> vector<3x512xf32>
    %214 = arith.addf %206, %213 : vector<3x512xf32>
    %c2_197 = arith.constant 2 : index
    %c0_198 = arith.constant 0 : index
    %c0_199 = arith.constant 0 : index
    %215 = vector.load %arg10[%c2_197, %c0_198, %c0_199] : memref<4x3x64xbf16, #tpu.memory_space<vmem>>, vector<1x3x64xbf16>
    %216 = vector.shape_cast %215 : vector<1x3x64xbf16> to vector<3x64xbf16>
    %cst_200 = arith.constant dense<0.000000e+00> : vector<3x128xf32>
    %217 = tpu.matmul %216, %197, %cst_200 {dimension_numbers = #tpu.dot_dimension_numbers<[1], [0], [0], [1], [0, 0, 1, 1], [], []>} : vector<3x64xbf16>, vector<64x128xbf16>, vector<3x128xf32> -> vector<3x128xf32>
    %218 = arith.truncf %217 : vector<3x128xf32> to vector<3x128xbf16>
    %c2_201 = arith.constant 2 : index
    %c0_202 = arith.constant 0 : index
    %c0_203 = arith.constant 0 : index
    %219 = vector.load %arg11[%c2_201, %c0_202, %c0_203] : memref<4x128x512xbf16, #tpu.memory_space<vmem>>, vector<1x128x512xbf16>
    %220 = vector.shape_cast %219 : vector<1x128x512xbf16> to vector<128x512xbf16>
    %cst_204 = arith.constant dense<0.000000e+00> : vector<3x512xf32>
    %221 = tpu.matmul %218, %220, %cst_204 {dimension_numbers = #tpu.dot_dimension_numbers<[1], [0], [0], [1], [0, 0, 1, 1], [], []>} : vector<3x128xbf16>, vector<128x512xbf16>, vector<3x512xf32> -> vector<3x512xf32>
    %222 = arith.addf %214, %221 : vector<3x512xf32>
    %c3_205 = arith.constant 3 : index
    %c0_206 = arith.constant 0 : index
    %c0_207 = arith.constant 0 : index
    %223 = vector.load %arg10[%c3_205, %c0_206, %c0_207] : memref<4x3x64xbf16, #tpu.memory_space<vmem>>, vector<1x3x64xbf16>
    %224 = vector.shape_cast %223 : vector<1x3x64xbf16> to vector<3x64xbf16>
    %cst_208 = arith.constant dense<0.000000e+00> : vector<3x128xf32>
    %225 = tpu.matmul %224, %197, %cst_208 {dimension_numbers = #tpu.dot_dimension_numbers<[1], [0], [0], [1], [0, 0, 1, 1], [], []>} : vector<3x64xbf16>, vector<64x128xbf16>, vector<3x128xf32> -> vector<3x128xf32>
    %226 = arith.truncf %225 : vector<3x128xf32> to vector<3x128xbf16>
    %c3_209 = arith.constant 3 : index
    %c0_210 = arith.constant 0 : index
    %c0_211 = arith.constant 0 : index
    %227 = vector.load %arg11[%c3_209, %c0_210, %c0_211] : memref<4x128x512xbf16, #tpu.memory_space<vmem>>, vector<1x128x512xbf16>
    %228 = vector.shape_cast %227 : vector<1x128x512xbf16> to vector<128x512xbf16>
    %cst_212 = arith.constant dense<0.000000e+00> : vector<3x512xf32>
    %229 = tpu.matmul %226, %228, %cst_212 {dimension_numbers = #tpu.dot_dimension_numbers<[1], [0], [0], [1], [0, 0, 1, 1], [], []>} : vector<3x128xbf16>, vector<128x512xbf16>, vector<3x512xf32> -> vector<3x512xf32>
    %230 = arith.addf %222, %229 : vector<3x512xf32>
    %c0_213 = arith.constant 0 : index
    %c0_214 = arith.constant 0 : index
    %231 = vector.load %arg12[%c0_213, %c0_214] : memref<3x1xf32, #tpu.memory_space<vmem>>, vector<3x1xf32>
    %232 = vector.broadcast %231 : vector<3x1xf32> to vector<3x512xf32>
    %233 = arith.addf %230, %232 : vector<3x512xf32>
    %234 = arith.negf %233 : vector<3x512xf32>
    %235 = math.exp %234 : vector<3x512xf32>
    %cst_215 = arith.constant 1.000000e+00 : f32
    %236 = vector.broadcast %cst_215 : f32 to vector<3x512xf32>
    %237 = arith.addf %236, %235 : vector<3x512xf32>
    %238 = arith.divf %236, %237 : vector<3x512xf32>
    %239 = vector.extract_strided_slice %238 {offsets = [0, 0], sizes = [3, 256], strides = [1, 1]} : vector<3x512xf32> to vector<3x256xf32>
    %c0_216 = arith.constant 0 : index
    %c0_217 = arith.constant 0 : index
    %c0_218 = arith.constant 0 : index
    %240 = vector.load %arg13[%c0_216, %c0_217, %c0_218] : memref<2x3x256xf32, #tpu.memory_space<vmem>>, vector<1x3x256xf32>
    %241 = vector.shape_cast %240 : vector<1x3x256xf32> to vector<3x256xf32>
    %242 = vector.shape_cast %239 : vector<3x256xf32> to vector<1x3x256xf32>
    tpu.vector_store %arg13[%c0_216, %c0_217, %c0_218], %242 {strides = array<i32>} : memref<2x3x256xf32, #tpu.memory_space<vmem>>, vector<1x3x256xf32>,
    %243 = vector.extract_strided_slice %238 {offsets = [0, 256], sizes = [3, 256], strides = [1, 1]} : vector<3x512xf32> to vector<3x256xf32>
    %c1_219 = arith.constant 1 : index
    %c0_220 = arith.constant 0 : index
    %c0_221 = arith.constant 0 : index
    %244 = vector.load %arg13[%c1_219, %c0_220, %c0_221] : memref<2x3x256xf32, #tpu.memory_space<vmem>>, vector<1x3x256xf32>
    %245 = vector.shape_cast %244 : vector<1x3x256xf32> to vector<3x256xf32>
    %246 = vector.shape_cast %243 : vector<3x256xf32> to vector<1x3x256xf32>
    tpu.vector_store %arg13[%c1_219, %c0_220, %c0_221], %246 {strides = array<i32>} : memref<2x3x256xf32, #tpu.memory_space<vmem>>, vector<1x3x256xf32>,
    return
  }
}

</mosaic_0001>

<bundles_post_ra>
// kernel: convreg_forward.1
= control target key start
LH: loop header
LB: loop body
LE: loop exit
PB: predicated region body
PF: predicated region fallthrough
CT: control target
= control target key end

     0   :  { %18 = vsyncpa [#allocation3], 0  ;;  %s15752_s0 = inlined_call_operand.vmem [shape: bf16[3,512], index: 0, kind: input, shape index: {}]   ;;  %s15753_s1 = inlined_call_operand.vmem [shape: bf16[9,64,3], index: 1, kind: input, shape index: {}]   ;;  %s15754_s2 = inlined_call_operand.vmem [shape: bf16[9,512,128], index: 2, kind: input, shape index: {}]   ;;  %s15755_s3 = inlined_call_operand.vmem [shape: f32[64,1], index: 3, kind: input, shape index: {}]   ;;  %s15756_s4 = inlined_call_operand.vmem [shape: bf16[9,128,64], index: 4, kind: input, shape index: {}]   ;;  %s15757_s5 = inlined_call_operand.vmem [shape: bf16[9,128,32], index: 5, kind: input, shape index: {}]   ;;  %s15758_s6 = inlined_call_operand.vmem [shape: f32[128,1], index: 6, kind: input, shape index: {}]   ;;  %s15759_s7 = inlined_call_operand.vmem [shape: bf16[4,64,128], index: 7, kind: input, shape index: {}]   ;;  %s15760_s8 = inlined_call_operand.hbm [shape: bf16[4,32,128], index: 8, kind: input, shape index: {}]   ;;  %s15761_s9 = inlined_call_operand.vmem [shape: f32[64,1], index: 9, kind: input, shape index: {}]   ;;  %s15762_s10 = inlined_call_operand.vmem [shape: bf16[4,3,64], index: 10, kind: input, shape index: {}]   ;;  %s15763_s11 = inlined_call_operand.hbm [shape: bf16[4,128,512], index: 11, kind: input, shape index: {}]   ;;  %s15764_s12 = inlined_call_operand.vmem [shape: f32[3,1], index: 12, kind: input, shape index: {}]   ;;  %s15765_s13 = inlined_call_operand.vmem [shape: f32[2,3,256], index: 13, kind: output, shape index: {}]  }
   0x1   :  { %19 = vsyncpa [#allocation5], 0  ;;  %s13342_s25 = smov [#allocation2]  }
   0x2   :  { %s41_s26 = sshll.u32 %s13342_s25, 4  ;;  %s42_s26 = int_to_ptr.vmem [resolvable:$true] %s41_s26 }
   0x3   :  { %s13306_s27 = scalar_lea.vmem %s42_s26, 1024  ;;  %p13311_p1 = scmp.lt.s32.totalorder %s42_s26, %s42_s26 }
   0x4   :  { %p13307_p0 = scmp.ne.s32.totalorder %s42_s26, %s13306_s27  ;;  %p13312_p2 = scmp.lt.s32.totalorder %s13306_s27, %s13306_s27 }
   0x6   :  { %p13313_p3 = por %p13312_p2, %p13311_p1 }
   0x8   :  { %p13314_p4 = pnand %p13313_p3, %p13307_p0 }
   0xa   :  { %13317 = shalt.err (!%p13314_p4)
}
   0xb   :  { %s13343_s28 = smov 64   ;;  %s13344_s29 = smov 4  }
   0xc   :  { %47 = dma.hbm_to_vmem [thread:$0]  %s15760_s8, 1024, %s42_s26, [#allocation3], %s13343_s28, %s13343_s28, %s13344_s29  }
   0xd   :  { %s13345_s15 = smov [#allocation4]  }
   0xe   :  { %s57_s16 = sshll.u32 %s13345_s15, 4  ;;  %s58_s16 = int_to_ptr.vmem [resolvable:$true] %s57_s16 }
   0xf   :  { %s13326_s17 = scalar_lea.vmem %s58_s16, 16384  ;;  %p13331_p6 = scmp.lt.s32.totalorder %s58_s16, %s58_s16 }
  0x10   :  { %p13327_p5 = scmp.ne.s32.totalorder %s58_s16, %s13326_s17  ;;  %p13332_p7 = scmp.lt.s32.totalorder %s13326_s17, %s13326_s17 }
  0x12   :  { %p13333_p8 = por %p13332_p7, %p13331_p6 }
  0x14   :  { %p13334_p9 = pnand %p13333_p8, %p13327_p5 }
  0x16   :  { %13337 = shalt.err (!%p13334_p9)
}
  0x17   :  { %s13346_s18 = smov 256   ;;  %s13347_s19 = smov 16  }
  0x18   :  { %63 = dma.hbm_to_vmem [thread:$0]  %s15763_s11, 16384, %s58_s16, [#allocation5], %s13346_s18, %s13346_s18, %s13347_s19  }
  0x19   :  { %13338 = dma.done.wait [#allocation3], 1024  }
  0x1a   :  { %13339 = vsyncadd [#allocation3], 4294966272 }
  0x1b   :  { %13340 = dma.done.wait [#allocation5], 16384  }
  0x1c   :  { %13341 = vsyncadd [#allocation5], 4294950912  ;;  %v12597_v0 = vld [vmem:[%s15754_s2 + $0x78] sm:$0xff]   ;;  %v12601_v4 = vld [vmem:[%s15754_s2 + $0x70] sm:$0xff]   ;;  %v13348_v22 = vmov 1983009808   ;;  %v143_v24 = vlaneseq }
  0x1d   :  { %v12598_v1 = vld [vmem:[%s15754_s2 + $0xf8] sm:$0xff]   ;;  %11121 = vmatprep.subr.bf16.mxu0 %v12597_v0  ;;  %v12602_v5 = vld [vmem:[%s15754_s2 + $0xf0] sm:$0xff]   ;;  %v12605_v8 = vld [vmem:[%s15754_s2 + $0x68] sm:$0xff]   ;;  %v141_v23 = vunpack.c.l.s4 %v13348_v22  ;;  %vm808_vm0 = vcmask 23552   ;;  %vm821_vm1 = vcmask 1040384   ;;  %vm822_vm2 = vcmask 1041408  }
  0x1e   :  { %v12599_v2 = vld [vmem:[%s15754_s2 + $0x38] sm:$0xff]   ;;  %11143 = vmatprep.subr.bf16.mxu1 %v12598_v1  ;;  %v12603_v6 = vld [vmem:[%s15754_s2 + $0x30] sm:$0xff]   ;;  %v12606_v9 = vld [vmem:[%s15754_s2 + $0xe8] sm:$0xff]   ;;  %v144_v30 = vshrl.u32 %v143_v24, 7  ;;  %vm4586_vm3 = vcmask 523264   ;;  %vm7525_vm4 = vcmask 261120  }
  0x1f   :  { %v12600_v3 = vld [vmem:[%s15754_s2 + $0xb8] sm:$0xff]   ;;  %11122 = vmatpush3.bf16.msra.mxu0 %v12599_v2  ;;  %v12604_v7 = vld [vmem:[%s15754_s2 + $0xb0] sm:$0xff]   ;;  %v12607_v10 = vld [vmem:[%s15754_s2 + $0x28] sm:$0xff]   ;;  %v142_v29 = vunpack.c.0.s8 %v141_v23  ;;  %vm13352_vm5 = vmmov 0  }
  0x20   :  { %11144 = vmatpush3.bf16.msra.mxu1 %v12600_v3  ;;  %11123 = vmatprep.subr.bf16.mxu0 %v12601_v4  ;;  %v12608_v11 = vld [vmem:[%s15754_s2 + $0xa8] sm:$0xff]   ;;  %v12609_v12 = vld [vmem:[%s15754_s2 + $0x60] sm:$0xff]   ;;  %v12613_v16 = vld [vmem:[%s15754_s2 + $0x58] sm:$0xff]  }
  0x21   :  { %11145 = vmatprep.subr.bf16.mxu1 %v12602_v5  ;;  %v12610_v13 = vld [vmem:[%s15754_s2 + $0xe0] sm:$0xff]   ;;  %v12614_v17 = vld [vmem:[%s15754_s2 + $0xd8] sm:$0xff]   ;;  %v12617_v20 = vld [vmem:[%s15754_s2 + $0x50] sm:$0xff]   ;;  %v145_v35 = vsub.s32 %v142_v29, %v144_v30 }
  0x22   :  { %v12611_v14 = vld [vmem:[%s15754_s2 + $0x20] sm:$0xff]   ;;  %v12615_v18 = vld [vmem:[%s15754_s2 + $0x18] sm:$0xff]   ;;  %v12618_v21 = vld [vmem:[%s15754_s2 + $0xd0] sm:$0xff]  }
  0x23   :  { %11124 = vmatpush3.bf16.msra.mxu0 %v12603_v6  ;;  %v12612_v15 = vld [vmem:[%s15754_s2 + $0xa0] sm:$0xff]   ;;  %v12616_v19 = vld [vmem:[%s15754_s2 + $0x98] sm:$0xff]   ;;  %v12619_v25 = vld [vmem:[%s15754_s2 + $0x10] sm:$0xff]  }
  0x24   :  { %11146 = vmatpush3.bf16.msra.mxu1 %v12604_v7  ;;  %11125 = vmatprep.subr.bf16.mxu0 %v12605_v8  ;;  %v12620_v26 = vld [vmem:[%s15754_s2 + $0x90] sm:$0xff]   ;;  %v12621_v27 = vld [vmem:[%s15754_s2 + $0x48] sm:$0xff]   ;;  %v12625_v33 = vld [vmem:[%s15754_s2 + $0x40] sm:$0xff]  }
  0x25   :  { %11147 = vmatprep.subr.bf16.mxu1 %v12606_v9  ;;  %v12622_v28 = vld [vmem:[%s15754_s2 + $0xc8] sm:$0xff]   ;;  %v12626_v34 = vld [vmem:[%s15754_s2 + $0xc0] sm:$0xff]   ;;  %v12630_v41 = vld [vmem:[%s15754_s2 + $0x178] sm:$0xff]  }
  0x26   :  { %v12623_v31 = vld [vmem:[%s15754_s2 + $0x8] sm:$0xff]   ;;  %v12627_v36 = vld [vmem:[%s15754_s2] sm:$0xff]   ;;  %v12631_v42 = vld [vmem:[%s15754_s2 + $0x1f8] sm:$0xff]  }
  0x27   :  { %11126 = vmatpush3.bf16.msra.mxu0 %v12607_v10  ;;  %v12624_v32 = vld [vmem:[%s15754_s2 + $0x88] sm:$0xff]   ;;  %v12628_v37 = vld [vmem:[%s15754_s2 + $0x80] sm:$0xff]   ;;  %v12632_v45 = vld [vmem:[%s15754_s2 + $0x138] sm:$0xff]  }
  0x28   :  { %11148 = vmatpush3.bf16.msra.mxu1 %v12608_v11  ;;  %11127 = vmatprep.subr.bf16.mxu0 %v12609_v12  ;;  %v73_v38 = vld [vmem:[%s15752_s0] sm:$0xff]  ;;  %v12633_v46 = vld [vmem:[%s15754_s2 + $0x1b8] sm:$0xff]   ;;  %v12634_v48 = vld [vmem:[%s15754_s2 + $0x170] sm:$0xff]  }
  0x29   :  { %11149 = vmatprep.subr.bf16.mxu1 %v12610_v13  ;;  %v13528_v39 = vrot.slane %v73_v38, %v145_v35  ;;  %v139_v40 = vcombine.high %v73_v38, %v73_v38  ;;  %v12635_v49 = vld [vmem:[%s15754_s2 + $0x1f0] sm:$0xff]   ;;  %v12638_v52 = vld [vmem:[%s15754_s2 + $0x168] sm:$0xff]   ;;  %v12642_v56 = vld [vmem:[%s15754_s2 + $0x160] sm:$0xff]  }
  0x2a   :  { %v12636_v50 = vld [vmem:[%s15754_s2 + $0x130] sm:$0xff]   ;;  %v12639_v53 = vld [vmem:[%s15754_s2 + $0x1e8] sm:$0xff]   ;;  %v12643_v57 = vld [vmem:[%s15754_s2 + $0x1e0] sm:$0xff]  }
  0x2b   :  { %11128 = vmatpush3.bf16.msra.mxu0 %v12611_v14  ;;  %v13538_v43 = vcombine.high %v13528_v39, %v13528_v39  ;;  %v13540_v44 = vrot.slane %v139_v40, %v145_v35  ;;  %v12637_v51 = vld [vmem:[%s15754_s2 + $0x1b0] sm:$0xff]   ;;  %v12640_v54 = vld [vmem:[%s15754_s2 + $0x128] sm:$0xff]   ;;  %v12644_v58 = vld [vmem:[%s15754_s2 + $0x120] sm:$0xff]   ;;  %v13349_v14 = vmov 65535  }
  0x2c   :  { %11150 = vmatpush3.bf16.msra.mxu1 %v12612_v15  ;;  %11129 = vmatprep.subr.bf16.mxu0 %v12613_v16  ;;  %v12641_v55 = vld [vmem:[%s15754_s2 + $0x1a8] sm:$0xff]   ;;  %v12645_v59 = vld [vmem:[%s15754_s2 + $0x1a0] sm:$0xff]   ;;  %v12646_v60 = vld [vmem:[%s15754_s2 + $0x158] sm:$0xff]   ;;  %v823_v15 = vsel %vm821_vm1, 4294967295, %v13349_v14 }
  0x2d   :  { %11151 = vmatprep.subr.bf16.mxu1 %v12614_v17  ;;  %384 = vmatprep.mubr.bf16.mxu0 %v13538_v43  ;;  %v13551_v47 = vcombine.high %v13540_v44, %v13540_v44  ;;  %v12647_v61 = vld [vmem:[%s15754_s2 + $0x1d8] sm:$0xff]   ;;  %v12650_v0 = vld [vmem:[%s15754_s2 + $0x150] sm:$0xff]   ;;  %v12654_v4 = vld [vmem:[%s15754_s2 + $0x148] sm:$0xff]   ;;  %v13652_v16 = vsel %vm822_vm2, %v823_v15, 0 }
  0x2e   :  { %v12648_v62 = vld [vmem:[%s15754_s2 + $0x118] sm:$0xff]   ;;  %v12651_v1 = vld [vmem:[%s15754_s2 + $0x1d0] sm:$0xff]   ;;  %v12655_v5 = vld [vmem:[%s15754_s2 + $0x1c8] sm:$0xff]  }
  0x2f   :  { %11130 = vmatpush3.bf16.msra.mxu0 %v12615_v18  ;;  %424 = vmatprep.mubr.bf16.mxu1 %v13551_v47  ;;  %v12649_v63 = vld [vmem:[%s15754_s2 + $0x198] sm:$0xff]   ;;  %v12652_v2 = vld [vmem:[%s15754_s2 + $0x110] sm:$0xff]   ;;  %v12656_v6 = vld [vmem:[%s15754_s2 + $0x108] sm:$0xff]  }
  0x30   :  { %11152 = vmatpush3.bf16.msra.mxu1 %v12616_v19  ;;  %11131 = vmatprep.subr.bf16.mxu0 %v12617_v20  ;;  %v12653_v3 = vld [vmem:[%s15754_s2 + $0x190] sm:$0xff]   ;;  %v12657_v7 = vld [vmem:[%s15754_s2 + $0x188] sm:$0xff]   ;;  %v12658_v8 = vld [vmem:[%s15754_s2 + $0x140] sm:$0xff]  }
  0x31   :  { %11153 = vmatprep.subr.bf16.mxu1 %v12618_v21  ;;  %v12659_v9 = vld [vmem:[%s15754_s2 + $0x1c0] sm:$0xff]   ;;  %v12663_v29 = vld [vmem:[%s15754_s2 + $0x2f8] sm:$0xff]   ;;  %v12668_v35 = vld [vmem:[%s15754_s2 + $0x2b0] sm:$0xff]  }
  0x32   :  { %v12660_v10 = vld [vmem:[%s15754_s2 + $0x100] sm:$0xff]   ;;  %v12673_v38 = vld [vmem:[%s15754_s2 + $0x2a8] sm:$0xff]   ;;  %v12689_v14 = vld [vmem:[%s15754_s2 + $0x218] sm:$0xff]  }
  0x33   :  { %11132 = vmatpush3.bf16.msra.mxu0 %v12619_v25  ;;  %v12661_v11 = vld [vmem:[%s15754_s2 + $0x180] sm:$0xff]   ;;  %v12694_v15 = vld [vmem:[%s15754_s2 + $0x250] sm:$0xff]  }
  0x34   :  { %11154 = vmatpush3.bf16.msra.mxu1 %v12620_v26  ;;  %11133 = vmatprep.subr.bf16.mxu0 %v12621_v27  ;;  %v12662_v12 = vld [vmem:[%s15753_s1] sm:$0xff]  }
  0x35   :  { %11155 = vmatprep.subr.bf16.mxu1 %v12622_v28  ;;  %v12667_v13 = vld [vmem:[%s15753_s1 + $0x20] sm:$0xff]  }
  0x36   :  { %v12676_v40 = vld [vmem:[%s15754_s2 + $0x2e0] sm:$0xff]  }
  0x37   :  { %11134 = vmatpush3.bf16.msra.mxu0 %v12623_v31  ;;  %v12664_v31 = vld [vmem:[%s15753_s1 + $0x8] sm:$0xff]  }
  0x38   :  { %11156 = vmatpush3.bf16.msra.mxu1 %v12624_v32  ;;  %11135 = vmatprep.subr.bf16.mxu0 %v12625_v33  ;;  %v12665_v32 = vld [vmem:[%s15754_s2 + $0x2b8] sm:$0xff]   ;;  %v12688_v33 = vld [vmem:[%s15753_s1 + $0x10] sm:$0xff]  }
  0x39   :  { %11157 = vmatprep.subr.bf16.mxu1 %v12626_v34  ;;  %v12666_v34 = vld [vmem:[%s15754_s2 + $0x2f0] sm:$0xff]  }
  0x3b   :  { %11136 = vmatpush3.bf16.msra.mxu0 %v12627_v36  ;;  %v12672_v36 = vld [vmem:[%s15754_s2 + $0x2e8] sm:$0xff]  }
  0x3c   :  { %11158 = vmatpush3.bf16.msra.mxu1 %v12628_v37  ;;  %11165 = vmatprep.subr.bf16.mxu0 %v12630_v41  ;;  %v12691_v37 = vld [vmem:[%s15753_s1 + $0x18] sm:$0xff]   ;;  %v12677_v41 = vld [vmem:[%s15754_s2 + $0x2a0] sm:$0xff]  }
  0x3d   :  { %11187 = vmatprep.subr.bf16.mxu1 %v12631_v42  ;;  %v12680_v42 = vld [vmem:[%s15754_s2 + $0x2d8] sm:$0xff]  }
  0x3e   :  { %385 = vmatmul.mubr.bf16.vlgmr.msra.gmra.mxu0 %v13528_v39 }
  0x3f   :  { %11166 = vmatpush3.bf16.msra.mxu0 %v12632_v45  ;;  %425 = vmatmul.mubr.bf16.vlgmr.msra.gmra.mxu1 %v13540_v44  ;;  %v12681_v45 = vld [vmem:[%s15754_s2 + $0x298] sm:$0xff]  }
  0x40   :  { %11167 = vmatprep.subr.bf16.mxu0 %v12634_v48  ;;  %11188 = vmatpush3.bf16.msra.mxu1 %v12633_v46  ;;  %v12684_v46 = vld [vmem:[%s15754_s2 + $0x2d0] sm:$0xff]  }
  0x41   :  { %730 = vmatprep.mubr.bf16.mxu0 %v13538_v43  ;;  %11189 = vmatprep.subr.bf16.mxu1 %v12635_v49  ;;  %v12685_v49 = vld [vmem:[%s15754_s2 + $0x290] sm:$0xff]  }
  0x42   :  { %770 = vmatprep.mubr.bf16.mxu1 %v13551_v47 }
  0x43   :  { %11168 = vmatpush3.bf16.msra.mxu0 %v12636_v50  ;;  %v12692_v50 = vld [vmem:[%s15754_s2 + $0x2c8] sm:$0xff]  }
  0x44   :  { %11169 = vmatprep.subr.bf16.mxu0 %v12638_v52  ;;  %11190 = vmatpush3.bf16.msra.mxu1 %v12637_v51 }
  0x45   :  { %11191 = vmatprep.subr.bf16.mxu1 %v12639_v53 }
  0x47   :  { %11170 = vmatpush3.bf16.msra.mxu0 %v12640_v54 }
  0x48   :  { %11171 = vmatprep.subr.bf16.mxu0 %v12642_v56  ;;  %11192 = vmatpush3.bf16.msra.mxu1 %v12641_v55  ;;  %v12693_v56 = vld [vmem:[%s15754_s2 + $0x288] sm:$0xff]  }
  0x49   :  { %11193 = vmatprep.subr.bf16.mxu1 %v12643_v57 }
  0x4b   :  { %11172 = vmatpush3.bf16.msra.mxu0 %v12644_v58  ;;  %v12696_v58 = vld [vmem:[%s15754_s2 + $0x2c0] sm:$0xff]  }
  0x4c   :  { %11173 = vmatprep.subr.bf16.mxu0 %v12646_v60  ;;  %11194 = vmatpush3.bf16.msra.mxu1 %v12645_v59 }
  0x4d   :  { %11195 = vmatprep.subr.bf16.mxu1 %v12647_v61 }
  0x4f   :  { %11174 = vmatpush3.bf16.msra.mxu0 %v12648_v62 }
  0x50   :  { %11175 = vmatprep.subr.bf16.mxu0 %v12650_v0  ;;  %11196 = vmatpush3.bf16.msra.mxu1 %v12649_v63  ;;  %v12697_v63 = vld [vmem:[%s15754_s2 + $0x280] sm:$0xff]  }
  0x51   :  { %11197 = vmatprep.subr.bf16.mxu1 %v12651_v1  ;;  %v12670_v1 = vld [vmem:[%s15754_s2 + $0x278] sm:$0xff]  }
  0x53   :  { %11176 = vmatpush3.bf16.msra.mxu0 %v12652_v2 }
  0x54   :  { %11177 = vmatprep.subr.bf16.mxu0 %v12654_v4  ;;  %11198 = vmatpush3.bf16.msra.mxu1 %v12653_v3  ;;  %v12669_v3 = vld [vmem:[%s15753_s1 + $0x28] sm:$0xff]   ;;  %v12671_v4 = vld [vmem:[%s15754_s2 + $0x238] sm:$0xff]  }
  0x55   :  { %11199 = vmatprep.subr.bf16.mxu1 %v12655_v5  ;;  %v12687_v5 = vld [vmem:[%s15753_s1 + $0x30] sm:$0xff]  }
  0x57   :  { %11178 = vmatpush3.bf16.msra.mxu0 %v12656_v6  ;;  %v12674_v6 = vld [vmem:[%s15754_s2 + $0x270] sm:$0xff]  }
  0x58   :  { %11179 = vmatprep.subr.bf16.mxu0 %v12658_v8  ;;  %11200 = vmatpush3.bf16.msra.mxu1 %v12657_v7  ;;  %v12675_v7 = vld [vmem:[%s15754_s2 + $0x230] sm:$0xff]   ;;  %v12678_v8 = vld [vmem:[%s15754_s2 + $0x268] sm:$0xff]  }
  0x59   :  { %11201 = vmatprep.subr.bf16.mxu1 %v12659_v9  ;;  %v12690_v9 = vld [vmem:[%s15753_s1 + $0x38] sm:$0xff]  }
  0x5b   :  { %11180 = vmatpush3.bf16.msra.mxu0 %v12660_v10  ;;  %v12679_v10 = vld [vmem:[%s15754_s2 + $0x228] sm:$0xff]  }
  0x5c   :  { %11202 = vmatpush3.bf16.msra.mxu1 %v12661_v11  ;;  %v12682_v11 = vld [vmem:[%s15754_s2 + $0x260] sm:$0xff]  }
  0x5e   :  { %731 = vmatmul.mubr.bf16.vlgmr.msra.gmra.mxu0 %v13528_v39 }
  0x5f   :  { %771 = vmatmul.mubr.bf16.vlgmr.msra.gmra.mxu1 %v13540_v44  ;;  %11872 = vmatprep.mubr.msk.bf16.mxu0 %vm808_vm0, %v12667_v13  ;;  %v12686_v13 = vld [vmem:[%s15754_s2 + $0x258] sm:$0xff]  }
  0x60   :  { %11882 = vmatprep.mubr.msk.bf16.mxu1 %vm808_vm0, %v12662_v12  ;;  %v12683_v12 = vld [vmem:[%s15754_s2 + $0x220] sm:$0xff]  }
  0xfe   :  { %v11137_v17 = vpop.f32.mrf.mxu0 }
  0xff   :  { %v11159_v18 = vpop.f32.mrf.mxu1 }
 0x100   :  { %v11138_v19 = vpop.f32.mrf.mxu0 }
 0x101   :  { %v11139_v20 = vadd.f32 %v11138_v19, %v11137_v17  ;;  %v11160_v21 = vpop.f32.mrf.mxu1  ;;  %v12695_v17 = vld [vmem:[%s15754_s2 + $0x210] sm:$0xff]   ;;  %v12699_v19 = vld [vmem:[%s15754_s2 + $0x208] sm:$0xff]  }
 0x102   :  { %v11140_v22 = vpop.f32.mrf.mxu0  ;;  %v11161_v23 = vadd.f32 %v11160_v21, %v11159_v18  ;;  %v12698_v18 = vld [vmem:[%s15754_s2 + $0x248] sm:$0xff]   ;;  %v12701_v21 = vld [vmem:[%s15754_s2 + $0x200] sm:$0xff]  }
 0x103   :  { %v11162_v24 = vpop.f32.mrf.mxu1  ;;  %v12702_v22 = vld [vmem:[%s15754_s2 + $0x378] sm:$0xff]  }
 0x104   :  { %v11141_v25 = vpop.f32.mrf.mxu0  ;;  %v427_v26 = vadd.f32 %v11161_v23, %v11139_v20  ;;  %v12700_v20 = vld [vmem:[%s15754_s2 + $0x240] sm:$0xff]   ;;  %v12703_v23 = vld [vmem:[%s15754_s2 + $0x338] sm:$0xff]   ;;  %v12704_v24 = vld [vmem:[%s15754_s2 + $0x370] sm:$0xff]  }
 0x105   :  { %v11163_v27 = vpop.f32.mrf.mxu1  ;;  %v12705_v25 = vld [vmem:[%s15753_s1 + $0x40] sm:$0xff]  }
 0x106   :  { %v440_v28 = vpack.c.bf16 %v427_v26, %v427_v26  ;;  %v12706_v26 = vld [vmem:[%s15754_s2 + $0x330] sm:$0xff]   ;;  %v12710_v27 = vld [vmem:[%s15754_s2 + $0x368] sm:$0xff]  }
 0x108   :  { %v926_v30 = vand.u32 %v13652_v16, %v440_v28  ;;  %v12711_v28 = vld [vmem:[%s15754_s2 + $0x328] sm:$0xff]  }
 0x10a   :  { %11880 = vmatprep.subr.bf16.mxu1 %v926_v30 }
 0x10b   :  { %11881 = vmatpush3.bf16.msra.mxu1 %v926_v30  ;;  %v12716_v30 = vld [vmem:[%s15754_s2 + $0x320] sm:$0xff]  }
 0x10c   :  { %11241 = vmatprep.subr.bf16.mxu1 %v12663_v29  ;;  %v12714_v29 = vld [vmem:[%s15754_s2 + $0x360] sm:$0xff]  }
 0x10e   :  { %11883 = vmatmul.mubr.msk.bf16.vlgmr.msra.gmra.mxu1 %vm808_vm0, %v12664_v31  ;;  %v12720_v31 = vld [vmem:[%s15754_s2 + $0x358] sm:$0xff]  }
 0x10f   :  { %11242 = vmatpush3.bf16.msra.mxu1 %v12665_v32  ;;  %11886 = vmatprep.mubr.msk.bf16.mxu1 %vm808_vm0, %v12688_v33  ;;  %v12721_v32 = vld [vmem:[%s15754_s2 + $0x318] sm:$0xff]   ;;  %v12724_v33 = vld [vmem:[%s15754_s2 + $0x350] sm:$0xff]  }
 0x110   :  { %11243 = vmatprep.subr.bf16.mxu1 %v12666_v34  ;;  %v12725_v34 = vld [vmem:[%s15754_s2 + $0x310] sm:$0xff]  }
 0x113   :  { %11244 = vmatpush3.bf16.msra.mxu1 %v12668_v35  ;;  %v12728_v35 = vld [vmem:[%s15754_s2 + $0x348] sm:$0xff]  }
 0x114   :  { %11245 = vmatprep.subr.bf16.mxu1 %v12672_v36  ;;  %v12729_v36 = vld [vmem:[%s15754_s2 + $0x308] sm:$0xff]  }
 0x116   :  { %11887 = vmatmul.mubr.msk.bf16.gmra.mxu1 %vm808_vm0, %v12691_v37  ;;  %v12732_v37 = vld [vmem:[%s15754_s2 + $0x340] sm:$0xff]  }
 0x117   :  { %11246 = vmatpush3.bf16.msra.mxu1 %v12673_v38  ;;  %1322 = vmatprep.mubr.bf16.mxu1 %v13551_v47  ;;  %v12733_v38 = vld [vmem:[%s15754_s2 + $0x300] sm:$0xff]  }
 0x118   :  { %11247 = vmatprep.subr.bf16.mxu1 %v12676_v40 }
 0x11b   :  { %11248 = vmatpush3.bf16.msra.mxu1 %v12677_v41 }
 0x11c   :  { %11249 = vmatprep.subr.bf16.mxu1 %v12680_v42 }
 0x11e   :  { %v11181_v48 = vpop.f32.mrf.mxu0 }
 0x11f   :  { %v11203_v51 = vpop.f32.mrf.mxu1  ;;  %11250 = vmatpush3.bf16.msra.mxu1 %v12681_v45 }
 0x120   :  { %v11182_v52 = vpop.f32.mrf.mxu0  ;;  %11251 = vmatprep.subr.bf16.mxu1 %v12684_v46 }
 0x121   :  { %v11183_v53 = vadd.f32 %v11182_v52, %v11181_v48  ;;  %v11204_v54 = vpop.f32.mrf.mxu1 }
 0x122   :  { %v11184_v55 = vpop.f32.mrf.mxu0  ;;  %v11205_v57 = vadd.f32 %v11204_v54, %v11203_v51 }
 0x123   :  { %v11206_v59 = vpop.f32.mrf.mxu1  ;;  %11252 = vmatpush3.bf16.msra.mxu1 %v12685_v49 }
 0x124   :  { %v11185_v60 = vpop.f32.mrf.mxu0  ;;  %v773_v61 = vadd.f32 %v11205_v57, %v11183_v53  ;;  %11253 = vmatprep.subr.bf16.mxu1 %v12692_v50 }
 0x125   :  { %v11207_v62 = vpop.f32.mrf.mxu1 }
 0x126   :  { %v787_v0 = vpack.c.bf16 %v773_v61, %v773_v61 }
 0x127   :  { %11254 = vmatpush3.bf16.msra.mxu1 %v12693_v56 }
 0x128   :  { %v826_v2 = vand.u32 %v13652_v16, %v787_v0  ;;  %11255 = vmatprep.subr.bf16.mxu1 %v12696_v58 }
 0x12a   :  { %11870 = vmatprep.subr.bf16.mxu0 %v826_v2 }
 0x12b   :  { %11871 = vmatpush3.bf16.msra.mxu0 %v826_v2  ;;  %11256 = vmatpush3.bf16.msra.mxu1 %v12697_v63 }
 0x12c   :  { %11219 = vmatprep.subr.bf16.mxu0 %v12670_v1  ;;  %11268 = vmatprep.subr.bf16.mxu1 %v12702_v22  ;;  %v12717_v22 = vld [vmem:[%s15753_s1 + $0x58] sm:$0xff]  }
 0x12e   :  { %11873 = vmatmul.mubr.msk.bf16.vlgmr.msra.gmra.mxu0 %vm808_vm0, %v12669_v3  ;;  %1323 = vmatmul.mubr.bf16.vlgmr.msra.gmra.mxu1 %v13540_v44 }
 0x12f   :  { %11220 = vmatpush3.bf16.msra.mxu0 %v12671_v4  ;;  %11876 = vmatprep.mubr.msk.bf16.mxu0 %vm808_vm0, %v12687_v5 }
 0x130   :  { %11221 = vmatprep.subr.bf16.mxu0 %v12674_v6  ;;  %1737 = vmatprep.mubr.bf16.mxu1 %v13538_v43 }
 0x131   :  { %11269 = vmatpush3.bf16.msra.mxu1 %v12703_v23  ;;  %v12719_v23 = vld [vmem:[%s15754_s2 + $0x3a8] sm:$0xff]  }
 0x132   :  { %11270 = vmatprep.subr.bf16.mxu1 %v12704_v24  ;;  %v12722_v24 = vld [vmem:[%s15754_s2 + $0x3e0] sm:$0xff]  }
 0x133   :  { %11222 = vmatpush3.bf16.msra.mxu0 %v12675_v7 }
 0x134   :  { %11223 = vmatprep.subr.bf16.mxu0 %v12678_v8 }
 0x135   :  { %11271 = vmatpush3.bf16.msra.mxu1 %v12706_v26  ;;  %v12726_v26 = vld [vmem:[%s15754_s2 + $0x3d8] sm:$0xff]  }
 0x136   :  { %11877 = vmatmul.mubr.msk.bf16.gmra.mxu0 %vm808_vm0, %v12690_v9  ;;  %11272 = vmatprep.subr.bf16.mxu1 %v12710_v27  ;;  %v12727_v27 = vld [vmem:[%s15754_s2 + $0x398] sm:$0xff]  }
 0x137   :  { %11224 = vmatpush3.bf16.msra.mxu0 %v12679_v10  ;;  %1282 = vmatprep.mubr.bf16.mxu0 %v13538_v43 }
 0x138   :  { %11225 = vmatprep.subr.bf16.mxu0 %v12682_v11 }
 0x139   :  { %11273 = vmatpush3.bf16.msra.mxu1 %v12711_v28  ;;  %v12730_v28 = vld [vmem:[%s15754_s2 + $0x3d0] sm:$0xff]  }
 0x13a   :  { %11274 = vmatprep.subr.bf16.mxu1 %v12714_v29  ;;  %v12731_v29 = vld [vmem:[%s15754_s2 + $0x390] sm:$0xff]  }
 0x13b   :  { %11226 = vmatpush3.bf16.msra.mxu0 %v12683_v12 }
 0x13c   :  { %11227 = vmatprep.subr.bf16.mxu0 %v12686_v13 }
 0x13d   :  { %11275 = vmatpush3.bf16.msra.mxu1 %v12716_v30  ;;  %v12734_v30 = vld [vmem:[%s15754_s2 + $0x3c8] sm:$0xff]  }
 0x13e   :  { %11276 = vmatprep.subr.bf16.mxu1 %v12720_v31  ;;  %v12735_v31 = vld [vmem:[%s15754_s2 + $0x388] sm:$0xff]  }
 0x13f   :  { %11228 = vmatpush3.bf16.msra.mxu0 %v12689_v14  ;;  %v12708_v14 = vld [vmem:[%s15754_s2 + $0x3f8] sm:$0xff]  }
 0x140   :  { %11229 = vmatprep.subr.bf16.mxu0 %v12694_v15  ;;  %v12707_v15 = vld [vmem:[%s15753_s1 + $0x48] sm:$0xff]  }
 0x141   :  { %11277 = vmatpush3.bf16.msra.mxu1 %v12721_v32  ;;  %v12736_v32 = vld [vmem:[%s15754_s2 + $0x3c0] sm:$0xff]  }
 0x142   :  { %11278 = vmatprep.subr.bf16.mxu1 %v12724_v33  ;;  %v12737_v33 = vld [vmem:[%s15754_s2 + $0x380] sm:$0xff]  }
 0x143   :  { %11230 = vmatpush3.bf16.msra.mxu0 %v12695_v17  ;;  %v12709_v17 = vld [vmem:[%s15754_s2 + $0x3b8] sm:$0xff]  }
 0x144   :  { %11231 = vmatprep.subr.bf16.mxu0 %v12698_v18  ;;  %v12715_v18 = vld [vmem:[%s15753_s1 + $0x50] sm:$0xff]  }
 0x145   :  { %11279 = vmatpush3.bf16.msra.mxu1 %v12725_v34 }
 0x146   :  { %11280 = vmatprep.subr.bf16.mxu1 %v12728_v35 }
 0x147   :  { %11232 = vmatpush3.bf16.msra.mxu0 %v12699_v19  ;;  %v12712_v19 = vld [vmem:[%s15754_s2 + $0x3f0] sm:$0xff]  }
 0x148   :  { %11233 = vmatprep.subr.bf16.mxu0 %v12700_v20  ;;  %v12713_v20 = vld [vmem:[%s15754_s2 + $0x3b0] sm:$0xff]  }
 0x149   :  { %11281 = vmatpush3.bf16.msra.mxu1 %v12729_v36 }
 0x14a   :  { %11282 = vmatprep.subr.bf16.mxu1 %v12732_v37 }
 0x14b   :  { %11234 = vmatpush3.bf16.msra.mxu0 %v12701_v21  ;;  %v12718_v21 = vld [vmem:[%s15754_s2 + $0x3e8] sm:$0xff]  }
 0x14d   :  { %11283 = vmatpush3.bf16.msra.mxu1 %v12733_v38 }
 0x14e   :  { %1283 = vmatmul.mubr.bf16.vlgmr.msra.gmra.mxu0 %v13528_v39 }
 0x14f   :  { %11892 = vmatprep.mubr.msk.bf16.mxu0 %vm808_vm0, %v12705_v25  ;;  %v12723_v25 = vld [vmem:[%s15754_s2 + $0x3a0] sm:$0xff]  }
 0x150   :  { %1738 = vmatmul.mubr.bf16.vlgmr.msra.gmra.mxu1 %v13528_v39 }
 0x1ce   :  { %v11884_v40 = vpop.f32.mrf.mxu1 }
 0x1d0   :  { %v962_v41 = vpop.f32.mrf.mxu1 }
 0x1d2   :  { %v11885_v42 = vpop.f32.mrf.mxu1 }
 0x1d4   :  { %v13834_v45 = vpop.f32.mrf.mxu1 }
 0x1d6   :  { %v11888_v46 = vpop.f32.mrf.mxu1 }
 0x1d8   :  { %v978_v48 = vpop.f32.mrf.mxu1 }
 0x1da   :  { %v11889_v49 = vpop.f32.mrf.mxu1 }
 0x1dc   :  { %v13836_v50 = vpop.f32.mrf.mxu1 }
 0x1ee   :  { %v11874_v51 = vpop.f32.mrf.mxu0  ;;  %v11257_v52 = vpop.f32.mrf.mxu1 }
 0x1ef   :  { %v13838_v53 = vadd.f32 %v11884_v40, %v11874_v51  ;;  %v12738_v40 = vld [vmem:[%s15754_s2 + $0x478] sm:$0xff]   ;;  %v12747_v51 = vld [vmem:[%s15754_s2 + $0x428] sm:$0xff]  }
 0x1f0   :  { %v862_v54 = vpop.f32.mrf.mxu0  ;;  %v11258_v55 = vpop.f32.mrf.mxu1 }
 0x1f1   :  { %v13840_v56 = vadd.f32 %v962_v41, %v862_v54  ;;  %v11259_v7 = vadd.f32 %v11258_v55, %v11257_v52  ;;  %v12739_v41 = vld [vmem:[%s15754_s2 + $0x438] sm:$0xff]   ;;  %v12750_v52 = vld [vmem:[%s15754_s2 + $0x460] sm:$0xff]  }
 0x1f2   :  { %v11875_v57 = vpop.f32.mrf.mxu0  ;;  %v11260_v58 = vpop.f32.mrf.mxu1  ;;  %v12752_v54 = vld [vmem:[%s15754_s2 + $0x420] sm:$0xff]   ;;  %v12756_v55 = vld [vmem:[%s15754_s2 + $0x458] sm:$0xff]  }
 0x1f3   :  { %v13842_v59 = vadd.f32 %v11885_v42, %v11875_v57  ;;  %v12740_v42 = vld [vmem:[%s15754_s2 + $0x470] sm:$0xff]   ;;  %v12757_v57 = vld [vmem:[%s15754_s2 + $0x418] sm:$0xff]  }
 0x1f4   :  { %v13844_v60 = vpop.f32.mrf.mxu0  ;;  %v11261_v61 = vpop.f32.mrf.mxu1  ;;  %v12760_v58 = vld [vmem:[%s15754_s2 + $0x450] sm:$0xff]  }
 0x1f5   :  { %v12761_v61 = vld [vmem:[%s15754_s2 + $0x410] sm:$0xff]  }
 0x1f6   :  { %v11878_v62 = vpop.f32.mrf.mxu0 }
 0x1f7   :  { %v13846_v63 = vadd.f32 %v11888_v46, %v11878_v62  ;;  %v12741_v46 = vld [vmem:[%s15753_s1 + $0x60] sm:$0xff]   ;;  %v12764_v62 = vld [vmem:[%s15754_s2 + $0x448] sm:$0xff]  }
 0x1f8   :  { %v878_v0 = vpop.f32.mrf.mxu0  ;;  %11902 = vmatprep.mubr.msk.bf16.mxu1 %vm808_vm0, %v12741_v46 }
 0x1f9   :  { %v13848_v1 = vadd.f32 %v978_v48, %v878_v0  ;;  %v12742_v48 = vld [vmem:[%s15754_s2 + $0x430] sm:$0xff]   ;;  %v12765_v0 = vld [vmem:[%s15754_s2 + $0x408] sm:$0xff]  }
 0x1fa   :  { %v11879_v2 = vpop.f32.mrf.mxu0 }
 0x1fb   :  { %v13850_v3 = vadd.f32 %v11889_v49, %v11879_v2  ;;  %v12746_v49 = vld [vmem:[%s15754_s2 + $0x468] sm:$0xff]   ;;  %v12768_v2 = vld [vmem:[%s15754_s2 + $0x440] sm:$0xff]  }
 0x1fc   :  { %v13852_v4 = vpop.f32.mrf.mxu0 }
 0x20e   :  { %v11235_v5 = vpop.f32.mrf.mxu0 }
 0x210   :  { %v11236_v6 = vpop.f32.mrf.mxu0  ;;  %v11284_v34 = vpop.f32.mrf.mxu1 }
 0x211   :  { %v11237_v8 = vadd.f32 %v11236_v6, %v11235_v5  ;;  %v12769_v5 = vld [vmem:[%s15754_s2 + $0x400] sm:$0xff]  }
 0x212   :  { %v11238_v9 = vpop.f32.mrf.mxu0  ;;  %v11285_v35 = vpop.f32.mrf.mxu1 }
 0x213   :  { %v1325_v10 = vadd.f32 %v11259_v7, %v11237_v8  ;;  %v11286_v36 = vadd.f32 %v11285_v35, %v11284_v34  ;;  %v12762_v34 = vld [vmem:[%s15754_s2 + $0x4d8] sm:$0xff]  }
 0x214   :  { %v11239_v11 = vpop.f32.mrf.mxu0  ;;  %v11287_v37 = vpop.f32.mrf.mxu1  ;;  %v12763_v35 = vld [vmem:[%s15754_s2 + $0x498] sm:$0xff]  }
 0x215   :  { %v1339_v12 = vpack.c.bf16 %v1325_v10, %v1325_v10  ;;  %v12767_v37 = vld [vmem:[%s15754_s2 + $0x490] sm:$0xff]  }
 0x216   :  { %v11288_v38 = vpop.f32.mrf.mxu1 }
 0x217   :  { %v1373_v13 = vand.u32 %v1339_v12, %v13652_v16  ;;  %v12770_v38 = vld [vmem:[%s15754_s2 + $0x4c8] sm:$0xff]  }
 0x219   :  { %11890 = vmatprep.subr.bf16.mxu0 %v1373_v13 }
 0x21a   :  { %11891 = vmatpush3.bf16.msra.mxu0 %v1373_v13 }
 0x21b   :  { %11290 = vmatprep.subr.bf16.mxu0 %v12708_v14 }
 0x21d   :  { %11893 = vmatmul.mubr.msk.bf16.vlgmr.msra.gmra.mxu0 %vm808_vm0, %v12707_v15 }
 0x21e   :  { %11291 = vmatpush3.bf16.msra.mxu0 %v12709_v17  ;;  %11896 = vmatprep.mubr.msk.bf16.mxu0 %vm808_vm0, %v12715_v18 }
 0x21f   :  { %11292 = vmatprep.subr.bf16.mxu0 %v12712_v19 }
 0x222   :  { %11293 = vmatpush3.bf16.msra.mxu0 %v12713_v20 }
 0x223   :  { %11294 = vmatprep.subr.bf16.mxu0 %v12718_v21 }
 0x225   :  { %11897 = vmatmul.mubr.msk.bf16.gmra.mxu0 %vm808_vm0, %v12717_v22 }
 0x226   :  { %11295 = vmatpush3.bf16.msra.mxu0 %v12719_v23  ;;  %1777 = vmatprep.mubr.bf16.mxu0 %v13551_v47 }
 0x227   :  { %11296 = vmatprep.subr.bf16.mxu0 %v12722_v24 }
 0x22a   :  { %11297 = vmatpush3.bf16.msra.mxu0 %v12723_v25  ;;  %v12745_v25 = vld [vmem:[%s15754_s2 + $0x4b8] sm:$0xff]  }
 0x22b   :  { %11298 = vmatprep.subr.bf16.mxu0 %v12726_v26  ;;  %v12751_v26 = vld [vmem:[%s15753_s1 + $0x70] sm:$0xff]  }
 0x22e   :  { %11299 = vmatpush3.bf16.msra.mxu0 %v12727_v27  ;;  %v12748_v27 = vld [vmem:[%s15754_s2 + $0x4f0] sm:$0xff]  }
 0x22f   :  { %11300 = vmatprep.subr.bf16.mxu0 %v12730_v28  ;;  %v12749_v28 = vld [vmem:[%s15754_s2 + $0x4b0] sm:$0xff]  }
 0x232   :  { %11301 = vmatpush3.bf16.msra.mxu0 %v12731_v29  ;;  %v12754_v29 = vld [vmem:[%s15754_s2 + $0x4e8] sm:$0xff]  }
 0x233   :  { %11302 = vmatprep.subr.bf16.mxu0 %v12734_v30  ;;  %v12753_v30 = vld [vmem:[%s15753_s1 + $0x78] sm:$0xff]  }
 0x236   :  { %11303 = vmatpush3.bf16.msra.mxu0 %v12735_v31  ;;  %v12755_v31 = vld [vmem:[%s15754_s2 + $0x4a8] sm:$0xff]  }
 0x237   :  { %11304 = vmatprep.subr.bf16.mxu0 %v12736_v32  ;;  %v12758_v32 = vld [vmem:[%s15754_s2 + $0x4e0] sm:$0xff]  }
 0x23a   :  { %11305 = vmatpush3.bf16.msra.mxu0 %v12737_v33  ;;  %v12759_v33 = vld [vmem:[%s15754_s2 + $0x4a0] sm:$0xff]  }
 0x23b   :  { %11317 = vmatprep.subr.bf16.mxu0 %v12738_v40  ;;  %v12771_v40 = vld [vmem:[%s15754_s2 + $0x488] sm:$0xff]  }
 0x23d   :  { %1778 = vmatmul.mubr.bf16.vlgmr.msra.gmra.mxu0 %v13540_v44 }
 0x23e   :  { %2192 = vmatprep.mubr.bf16.mxu0 %v13538_v43  ;;  %11318 = vmatpush3.bf16.msra.mxu0 %v12739_v41  ;;  %v12772_v41 = vld [vmem:[%s15754_s2 + $0x4c0] sm:$0xff]  }
 0x23f   :  { %11319 = vmatprep.subr.bf16.mxu0 %v12740_v42  ;;  %v12773_v42 = vld [vmem:[%s15754_s2 + $0x480] sm:$0xff]  }
 0x242   :  { %11320 = vmatpush3.bf16.msra.mxu0 %v12742_v48 }
 0x243   :  { %11321 = vmatprep.subr.bf16.mxu0 %v12746_v49 }
 0x246   :  { %11322 = vmatpush3.bf16.msra.mxu0 %v12747_v51 }
 0x247   :  { %11323 = vmatprep.subr.bf16.mxu0 %v12750_v52 }
 0x24a   :  { %11324 = vmatpush3.bf16.msra.mxu0 %v12752_v54  ;;  %v12774_v54 = vld [vmem:[%s15754_s2 + $0x578] sm:$0xff]  }
 0x24b   :  { %11325 = vmatprep.subr.bf16.mxu0 %v12756_v55  ;;  %v12775_v55 = vld [vmem:[%s15754_s2 + $0x538] sm:$0xff]  }
 0x24e   :  { %11326 = vmatpush3.bf16.msra.mxu0 %v12757_v57  ;;  %v12776_v57 = vld [vmem:[%s15754_s2 + $0x570] sm:$0xff]  }
 0x24f   :  { %11327 = vmatprep.subr.bf16.mxu0 %v12760_v58  ;;  %v12777_v58 = vld [vmem:[%s15753_s1 + $0x80] sm:$0xff]  }
 0x252   :  { %11328 = vmatpush3.bf16.msra.mxu0 %v12761_v61  ;;  %v12778_v61 = vld [vmem:[%s15754_s2 + $0x530] sm:$0xff]  }
 0x253   :  { %11329 = vmatprep.subr.bf16.mxu0 %v12764_v62  ;;  %v12782_v62 = vld [vmem:[%s15754_s2 + $0x568] sm:$0xff]  }
 0x256   :  { %11330 = vmatpush3.bf16.msra.mxu0 %v12765_v0  ;;  %v12783_v0 = vld [vmem:[%s15754_s2 + $0x528] sm:$0xff]  }
 0x257   :  { %11331 = vmatprep.subr.bf16.mxu0 %v12768_v2  ;;  %v12786_v2 = vld [vmem:[%s15754_s2 + $0x560] sm:$0xff]  }
 0x25a   :  { %11332 = vmatpush3.bf16.msra.mxu0 %v12769_v5  ;;  %v12788_v5 = vld [vmem:[%s15754_s2 + $0x520] sm:$0xff]  }
 0x25d   :  { %2193 = vmatmul.mubr.bf16.vlgmr.msra.gmra.mxu0 %v13528_v39 }
 0x25e   :  { %11912 = vmatprep.mubr.msk.bf16.mxu0 %vm808_vm0, %v12777_v58  ;;  %v12808_v58 = vld [vmem:[%s15754_s2 + $0x5c0] sm:$0xff]  }
 0x2dd   :  { %v11894_v6 = vpop.f32.mrf.mxu0 }
 0x2de   :  { %v13972_v7 = vadd.f32 %v11894_v6, %v13838_v53  ;;  %v12792_v6 = vld [vmem:[%s15754_s2 + $0x558] sm:$0xff]  }
 0x2df   :  { %v1409_v8 = vpop.f32.mrf.mxu0 }
 0x2e0   :  { %v13975_v9 = vadd.f32 %v1409_v8, %v13840_v56  ;;  %v12793_v8 = vld [vmem:[%s15754_s2 + $0x518] sm:$0xff]  }
 0x2e1   :  { %v11895_v10 = vpop.f32.mrf.mxu0 }
 0x2e2   :  { %v13978_v11 = vadd.f32 %v11895_v10, %v13842_v59  ;;  %v12796_v10 = vld [vmem:[%s15754_s2 + $0x550] sm:$0xff]  }
 0x2e3   :  { %v13980_v12 = vpop.f32.mrf.mxu0 }
 0x2e5   :  { %v11898_v13 = vpop.f32.mrf.mxu0 }
 0x2e6   :  { %v13983_v14 = vadd.f32 %v11898_v13, %v13846_v63  ;;  %v12797_v13 = vld [vmem:[%s15754_s2 + $0x510] sm:$0xff]  }
 0x2e7   :  { %v1425_v15 = vpop.f32.mrf.mxu0 }
 0x2e8   :  { %v13986_v17 = vadd.f32 %v1425_v15, %v13848_v1  ;;  %v12744_v1 = vld [vmem:[%s15754_s2 + $0x4f8] sm:$0xff]   ;;  %v12800_v15 = vld [vmem:[%s15754_s2 + $0x548] sm:$0xff]  }
 0x2e9   :  { %v11899_v53 = vpop.f32.mrf.mxu0 }
 0x2ea   :  { %v13989_v18 = vadd.f32 %v11899_v53, %v13850_v3  ;;  %v12743_v3 = vld [vmem:[%s15753_s1 + $0x68] sm:$0xff]  }
 0x2eb   :  { %v13991_v56 = vpop.f32.mrf.mxu0  ;;  %v12801_v53 = vld [vmem:[%s15754_s2 + $0x508] sm:$0xff]  }
 0x2fd   :  { %v11306_v19 = vpop.f32.mrf.mxu0 }
 0x2ff   :  { %v11307_v20 = vpop.f32.mrf.mxu0 }
 0x300   :  { %v11308_v59 = vadd.f32 %v11307_v20, %v11306_v19  ;;  %v12804_v19 = vld [vmem:[%s15754_s2 + $0x540] sm:$0xff]  }
 0x301   :  { %v11309_v21 = vpop.f32.mrf.mxu0  ;;  %v12805_v20 = vld [vmem:[%s15754_s2 + $0x500] sm:$0xff]  }
 0x302   :  { %v1780_v22 = vadd.f32 %v11308_v59, %v11286_v36  ;;  %v12766_v36 = vld [vmem:[%s15754_s2 + $0x4d0] sm:$0xff]  }
 0x303   :  { %v11310_v23 = vpop.f32.mrf.mxu0 }
 0x304   :  { %v1794_v24 = vpack.c.bf16 %v1780_v22, %v1780_v22 }
 0x306   :  { %v1828_v63 = vand.u32 %v1794_v24, %v13652_v16 }
 0x308   :  { %11900 = vmatprep.subr.bf16.mxu1 %v1828_v63 }
 0x309   :  { %11901 = vmatpush3.bf16.msra.mxu1 %v1828_v63 }
 0x30a   :  { %11339 = vmatprep.subr.bf16.mxu1 %v12744_v1 }
 0x30c   :  { %11903 = vmatmul.mubr.msk.bf16.vlgmr.msra.gmra.mxu1 %vm808_vm0, %v12743_v3 }
 0x30d   :  { %11340 = vmatpush3.bf16.msra.mxu1 %v12745_v25  ;;  %11906 = vmatprep.mubr.msk.bf16.mxu1 %vm808_vm0, %v12751_v26 }
 0x30e   :  { %11341 = vmatprep.subr.bf16.mxu1 %v12748_v27 }
 0x311   :  { %11342 = vmatpush3.bf16.msra.mxu1 %v12749_v28 }
 0x312   :  { %11343 = vmatprep.subr.bf16.mxu1 %v12754_v29 }
 0x314   :  { %11907 = vmatmul.mubr.msk.bf16.gmra.mxu1 %vm808_vm0, %v12753_v30 }
 0x315   :  { %11344 = vmatpush3.bf16.msra.mxu1 %v12755_v31  ;;  %2232 = vmatprep.mubr.bf16.mxu1 %v13551_v47 }
 0x316   :  { %11345 = vmatprep.subr.bf16.mxu1 %v12758_v32 }
 0x319   :  { %11346 = vmatpush3.bf16.msra.mxu1 %v12759_v33 }
 0x31a   :  { %11347 = vmatprep.subr.bf16.mxu1 %v12762_v34 }
 0x31d   :  { %11348 = vmatpush3.bf16.msra.mxu1 %v12763_v35  ;;  %v11333_v46 = vpop.f32.mrf.mxu0  ;;  %v12781_v35 = vld [vmem:[%s15754_s2 + $0x5b8] sm:$0xff]  }
 0x31e   :  { %11349 = vmatprep.subr.bf16.mxu1 %v12766_v36  ;;  %v12787_v36 = vld [vmem:[%s15753_s1 + $0x90] sm:$0xff]  }
 0x31f   :  { %v11334_v48 = vpop.f32.mrf.mxu0 }
 0x320   :  { %v11335_v49 = vadd.f32 %v11334_v48, %v11333_v46  ;;  %v12794_v46 = vld [vmem:[%s15754_s2 + $0x5e0] sm:$0xff]  }
 0x321   :  { %11350 = vmatpush3.bf16.msra.mxu1 %v12767_v37  ;;  %v11336_v51 = vpop.f32.mrf.mxu0  ;;  %v12784_v37 = vld [vmem:[%s15754_s2 + $0x5f0] sm:$0xff]   ;;  %v12795_v48 = vld [vmem:[%s15754_s2 + $0x5a0] sm:$0xff]  }
 0x322   :  { %11351 = vmatprep.subr.bf16.mxu1 %v12770_v38  ;;  %v12785_v38 = vld [vmem:[%s15754_s2 + $0x5b0] sm:$0xff]   ;;  %v12799_v51 = vld [vmem:[%s15754_s2 + $0x598] sm:$0xff]  }
 0x323   :  { %v11337_v52 = vpop.f32.mrf.mxu0 }
 0x324   :  { %v12802_v52 = vld [vmem:[%s15754_s2 + $0x5d0] sm:$0xff]  }
 0x325   :  { %11352 = vmatpush3.bf16.msra.mxu1 %v12771_v40  ;;  %v12790_v40 = vld [vmem:[%s15754_s2 + $0x5e8] sm:$0xff]  }
 0x326   :  { %11353 = vmatprep.subr.bf16.mxu1 %v12772_v41  ;;  %v12789_v41 = vld [vmem:[%s15753_s1 + $0x98] sm:$0xff]  }
 0x329   :  { %11354 = vmatpush3.bf16.msra.mxu1 %v12773_v42  ;;  %v12791_v42 = vld [vmem:[%s15754_s2 + $0x5a8] sm:$0xff]  }
 0x32a   :  { %11366 = vmatprep.subr.bf16.mxu1 %v12774_v54  ;;  %v12803_v54 = vld [vmem:[%s15754_s2 + $0x590] sm:$0xff]  }
 0x32c   :  { %2233 = vmatmul.mubr.bf16.vlgmr.msra.gmra.mxu1 %v13540_v44 }
 0x32d   :  { %2647 = vmatprep.mubr.bf16.mxu1 %v13538_v43  ;;  %11367 = vmatpush3.bf16.msra.mxu1 %v12775_v55  ;;  %v12806_v55 = vld [vmem:[%s15754_s2 + $0x5c8] sm:$0xff]  }
 0x32e   :  { %11368 = vmatprep.subr.bf16.mxu1 %v12776_v57  ;;  %v12807_v57 = vld [vmem:[%s15754_s2 + $0x588] sm:$0xff]  }
 0x331   :  { %11369 = vmatpush3.bf16.msra.mxu1 %v12778_v61  ;;  %v12809_v61 = vld [vmem:[%s15754_s2 + $0x580] sm:$0xff]  }
 0x332   :  { %11370 = vmatprep.subr.bf16.mxu1 %v12782_v62 }
 0x335   :  { %11371 = vmatpush3.bf16.msra.mxu1 %v12783_v0 }
 0x336   :  { %11372 = vmatprep.subr.bf16.mxu1 %v12786_v2 }
 0x339   :  { %11373 = vmatpush3.bf16.msra.mxu1 %v12788_v5 }
 0x33a   :  { %11374 = vmatprep.subr.bf16.mxu1 %v12792_v6 }
 0x33d   :  { %11375 = vmatpush3.bf16.msra.mxu1 %v12793_v8  ;;  %v12810_v8 = vld [vmem:[%s15754_s2 + $0x678] sm:$0xff]  }
 0x33e   :  { %11376 = vmatprep.subr.bf16.mxu1 %v12796_v10  ;;  %v12811_v10 = vld [vmem:[%s15754_s2 + $0x638] sm:$0xff]  }
 0x341   :  { %11377 = vmatpush3.bf16.msra.mxu1 %v12797_v13  ;;  %v12812_v13 = vld [vmem:[%s15754_s2 + $0x670] sm:$0xff]  }
 0x342   :  { %11378 = vmatprep.subr.bf16.mxu1 %v12800_v15  ;;  %v12813_v15 = vld [vmem:[%s15753_s1 + $0xa0] sm:$0xff]  }
 0x345   :  { %11379 = vmatpush3.bf16.msra.mxu1 %v12801_v53  ;;  %v12814_v53 = vld [vmem:[%s15754_s2 + $0x630] sm:$0xff]  }
 0x346   :  { %11380 = vmatprep.subr.bf16.mxu1 %v12804_v19  ;;  %v12818_v19 = vld [vmem:[%s15754_s2 + $0x668] sm:$0xff]  }
 0x349   :  { %11381 = vmatpush3.bf16.msra.mxu1 %v12805_v20  ;;  %v12819_v20 = vld [vmem:[%s15754_s2 + $0x628] sm:$0xff]  }
 0x34c   :  { %2648 = vmatmul.mubr.bf16.vlgmr.msra.gmra.mxu1 %v13528_v39 }
 0x34d   :  { %11922 = vmatprep.mubr.msk.bf16.mxu1 %vm808_vm0, %v12813_v15  ;;  %v12842_v15 = vld [vmem:[%s15754_s2 + $0x6c8] sm:$0xff]  }
 0x3cc   :  { %v11904_v59 = vpop.f32.mrf.mxu1 }
 0x3cd   :  { %v14111_v21 = vadd.f32 %v11904_v59, %v13972_v7  ;;  %v12822_v59 = vld [vmem:[%s15754_s2 + $0x660] sm:$0xff]  }
 0x3ce   :  { %v1864_v22 = vpop.f32.mrf.mxu1 }
 0x3cf   :  { %v14114_v23 = vadd.f32 %v1864_v22, %v13975_v9  ;;  %v12824_v22 = vld [vmem:[%s15754_s2 + $0x620] sm:$0xff]  }
 0x3d0   :  { %v11905_v24 = vpop.f32.mrf.mxu1 }
 0x3d1   :  { %v14117_v63 = vadd.f32 %v11905_v24, %v13978_v11  ;;  %v12828_v24 = vld [vmem:[%s15754_s2 + $0x658] sm:$0xff]  }
 0x3d2   :  { %v14119_v1 = vpop.f32.mrf.mxu1 }
 0x3d4   :  { %v11908_v3 = vpop.f32.mrf.mxu1 }
 0x3d5   :  { %v14122_v25 = vadd.f32 %v11908_v3, %v13983_v14  ;;  %v12829_v3 = vld [vmem:[%s15754_s2 + $0x618] sm:$0xff]  }
 0x3d6   :  { %v1880_v26 = vpop.f32.mrf.mxu1 }
 0x3d7   :  { %v14125_v27 = vadd.f32 %v1880_v26, %v13986_v17  ;;  %v12780_v17 = vld [vmem:[%s15754_s2 + $0x5f8] sm:$0xff]   ;;  %v12832_v26 = vld [vmem:[%s15754_s2 + $0x650] sm:$0xff]  }
 0x3d8   :  { %v11909_v7 = vpop.f32.mrf.mxu1 }
 0x3d9   :  { %v14128_v28 = vadd.f32 %v11909_v7, %v13989_v18  ;;  %v12779_v18 = vld [vmem:[%s15753_s1 + $0x88] sm:$0xff]   ;;  %v12833_v7 = vld [vmem:[%s15754_s2 + $0x610] sm:$0xff]  }
 0x3da   :  { %v14130_v9 = vpop.f32.mrf.mxu1 }
 0x3ec   :  { %v11355_v29 = vpop.f32.mrf.mxu1 }
 0x3ee   :  { %v11356_v30 = vpop.f32.mrf.mxu1 }
 0x3ef   :  { %v11357_v11 = vadd.f32 %v11356_v30, %v11355_v29  ;;  %v12836_v29 = vld [vmem:[%s15754_s2 + $0x648] sm:$0xff]  }
 0x3f0   :  { %v11358_v31 = vpop.f32.mrf.mxu1  ;;  %v12837_v30 = vld [vmem:[%s15754_s2 + $0x608] sm:$0xff]  }
 0x3f1   :  { %v2235_v32 = vadd.f32 %v11357_v11, %v11335_v49  ;;  %v12798_v49 = vld [vmem:[%s15754_s2 + $0x5d8] sm:$0xff]   ;;  %v12840_v11 = vld [vmem:[%s15754_s2 + $0x640] sm:$0xff]  }
 0x3f2   :  { %v11359_v33 = vpop.f32.mrf.mxu1  ;;  %v12841_v31 = vld [vmem:[%s15754_s2 + $0x600] sm:$0xff]  }
 0x3f3   :  { %v2249_v34 = vpack.c.bf16 %v2235_v32, %v2235_v32 }
 0x3f5   :  { %v2283_v14 = vand.u32 %v2249_v34, %v13652_v16 }
 0x3f7   :  { %11910 = vmatprep.subr.bf16.mxu0 %v2283_v14 }
 0x3f8   :  { %11911 = vmatpush3.bf16.msra.mxu0 %v2283_v14 }
 0x3f9   :  { %11388 = vmatprep.subr.bf16.mxu0 %v12780_v17 }
 0x3fb   :  { %11913 = vmatmul.mubr.msk.bf16.vlgmr.msra.gmra.mxu0 %vm808_vm0, %v12779_v18 }
 0x3fc   :  { %11389 = vmatpush3.bf16.msra.mxu0 %v12781_v35  ;;  %11916 = vmatprep.mubr.msk.bf16.mxu0 %vm808_vm0, %v12787_v36 }
 0x3fd   :  { %11390 = vmatprep.subr.bf16.mxu0 %v12784_v37 }
 0x400   :  { %11391 = vmatpush3.bf16.msra.mxu0 %v12785_v38 }
 0x401   :  { %11392 = vmatprep.subr.bf16.mxu0 %v12790_v40 }
 0x403   :  { %11917 = vmatmul.mubr.msk.bf16.gmra.mxu0 %vm808_vm0, %v12789_v41 }
 0x404   :  { %11393 = vmatpush3.bf16.msra.mxu0 %v12791_v42  ;;  %2687 = vmatprep.mubr.bf16.mxu0 %v13551_v47 }
 0x405   :  { %11394 = vmatprep.subr.bf16.mxu0 %v12794_v46 }
 0x408   :  { %11395 = vmatpush3.bf16.msra.mxu0 %v12795_v48 }
 0x409   :  { %11396 = vmatprep.subr.bf16.mxu0 %v12798_v49 }
 0x40c   :  { %11397 = vmatpush3.bf16.msra.mxu0 %v12799_v51  ;;  %v11382_v62 = vpop.f32.mrf.mxu1 }
 0x40d   :  { %11398 = vmatprep.subr.bf16.mxu0 %v12802_v52 }
 0x40e   :  { %v11383_v0 = vpop.f32.mrf.mxu1 }
 0x40f   :  { %v11384_v2 = vadd.f32 %v11383_v0, %v11382_v62  ;;  %v12825_v62 = vld [vmem:[%s15753_s1 + $0xb8] sm:$0xff]   ;;  %v12827_v0 = vld [vmem:[%s15754_s2 + $0x6a8] sm:$0xff]  }
 0x410   :  { %11399 = vmatpush3.bf16.msra.mxu0 %v12803_v54  ;;  %v11385_v5 = vpop.f32.mrf.mxu1  ;;  %v12817_v54 = vld [vmem:[%s15754_s2 + $0x6b8] sm:$0xff]  }
 0x411   :  { %11400 = vmatprep.subr.bf16.mxu0 %v12806_v55  ;;  %v12823_v55 = vld [vmem:[%s15753_s1 + $0xb0] sm:$0xff]   ;;  %v12831_v5 = vld [vmem:[%s15754_s2 + $0x6a0] sm:$0xff]  }
 0x412   :  { %v11386_v6 = vpop.f32.mrf.mxu1 }
 0x413   :  { %v12834_v6 = vld [vmem:[%s15754_s2 + $0x6d8] sm:$0xff]  }
 0x414   :  { %11401 = vmatpush3.bf16.msra.mxu0 %v12807_v57  ;;  %v12820_v57 = vld [vmem:[%s15754_s2 + $0x6f0] sm:$0xff]  }
 0x415   :  { %11402 = vmatprep.subr.bf16.mxu0 %v12808_v58  ;;  %v12821_v58 = vld [vmem:[%s15754_s2 + $0x6b0] sm:$0xff]  }
 0x418   :  { %11403 = vmatpush3.bf16.msra.mxu0 %v12809_v61  ;;  %v12826_v61 = vld [vmem:[%s15754_s2 + $0x6e8] sm:$0xff]  }
 0x419   :  { %11415 = vmatprep.subr.bf16.mxu0 %v12810_v8  ;;  %v12835_v8 = vld [vmem:[%s15754_s2 + $0x698] sm:$0xff]  }
 0x41b   :  { %2688 = vmatmul.mubr.bf16.vlgmr.msra.gmra.mxu0 %v13540_v44 }
 0x41c   :  { %3102 = vmatprep.mubr.bf16.mxu0 %v13538_v43  ;;  %11416 = vmatpush3.bf16.msra.mxu0 %v12811_v10  ;;  %v12838_v10 = vld [vmem:[%s15754_s2 + $0x6d0] sm:$0xff]  }
 0x41d   :  { %11417 = vmatprep.subr.bf16.mxu0 %v12812_v13  ;;  %v12839_v13 = vld [vmem:[%s15754_s2 + $0x690] sm:$0xff]  }
 0x420   :  { %11418 = vmatpush3.bf16.msra.mxu0 %v12814_v53  ;;  %v12843_v53 = vld [vmem:[%s15754_s2 + $0x688] sm:$0xff]  }
 0x421   :  { %11419 = vmatprep.subr.bf16.mxu0 %v12818_v19  ;;  %v12844_v19 = vld [vmem:[%s15754_s2 + $0x6c0] sm:$0xff]  }
 0x424   :  { %11420 = vmatpush3.bf16.msra.mxu0 %v12819_v20  ;;  %v12845_v20 = vld [vmem:[%s15754_s2 + $0x680] sm:$0xff]  }
 0x425   :  { %11421 = vmatprep.subr.bf16.mxu0 %v12822_v59 }
 0x428   :  { %11422 = vmatpush3.bf16.msra.mxu0 %v12824_v22 }
 0x429   :  { %11423 = vmatprep.subr.bf16.mxu0 %v12828_v24 }
 0x42c   :  { %11424 = vmatpush3.bf16.msra.mxu0 %v12829_v3 }
 0x42d   :  { %11425 = vmatprep.subr.bf16.mxu0 %v12832_v26 }
 0x430   :  { %11426 = vmatpush3.bf16.msra.mxu0 %v12833_v7  ;;  %v12846_v7 = vld [vmem:[%s15754_s2 + $0x778] sm:$0xff]  }
 0x431   :  { %11427 = vmatprep.subr.bf16.mxu0 %v12836_v29  ;;  %v12847_v29 = vld [vmem:[%s15754_s2 + $0x738] sm:$0xff]  }
 0x434   :  { %11428 = vmatpush3.bf16.msra.mxu0 %v12837_v30  ;;  %v12848_v30 = vld [vmem:[%s15754_s2 + $0x770] sm:$0xff]  }
 0x435   :  { %11429 = vmatprep.subr.bf16.mxu0 %v12840_v11  ;;  %v12849_v11 = vld [vmem:[%s15753_s1 + $0xc0] sm:$0xff]  }
 0x438   :  { %11430 = vmatpush3.bf16.msra.mxu0 %v12841_v31  ;;  %v12850_v31 = vld [vmem:[%s15754_s2 + $0x730] sm:$0xff]  }
 0x43b   :  { %3103 = vmatmul.mubr.bf16.vlgmr.msra.gmra.mxu0 %v13528_v39 }
 0x43c   :  { %11932 = vmatprep.mubr.msk.bf16.mxu0 %vm808_vm0, %v12849_v11  ;;  %v12874_v11 = vld [vmem:[%s15754_s2 + $0x7d0] sm:$0xff]  }
 0x4bb   :  { %v11914_v32 = vpop.f32.mrf.mxu0 }
 0x4bc   :  { %v14250_v33 = vadd.f32 %v11914_v32, %v14111_v21  ;;  %v12854_v32 = vld [vmem:[%s15754_s2 + $0x768] sm:$0xff]  }
 0x4bd   :  { %v2319_v34 = vpop.f32.mrf.mxu0 }
 0x4be   :  { %v14253_v14 = vadd.f32 %v2319_v34, %v14114_v23  ;;  %v12855_v34 = vld [vmem:[%s15754_s2 + $0x728] sm:$0xff]  }
 0x4bf   :  { %v11915_v17 = vpop.f32.mrf.mxu0 }
 0x4c0   :  { %v14256_v18 = vadd.f32 %v11915_v17, %v14117_v63  ;;  %v12858_v17 = vld [vmem:[%s15754_s2 + $0x760] sm:$0xff]  }
 0x4c1   :  { %v14258_v35 = vpop.f32.mrf.mxu0 }
 0x4c3   :  { %v11918_v36 = vpop.f32.mrf.mxu0 }
 0x4c4   :  { %v14261_v37 = vadd.f32 %v11918_v36, %v14122_v25  ;;  %v12860_v36 = vld [vmem:[%s15754_s2 + $0x720] sm:$0xff]  }
 0x4c5   :  { %v2335_v38 = vpop.f32.mrf.mxu0 }
 0x4c6   :  { %v14264_v40 = vadd.f32 %v2335_v38, %v14125_v27  ;;  %v12816_v27 = vld [vmem:[%s15754_s2 + $0x6f8] sm:$0xff]  }
 0x4c7   :  { %v11919_v21 = vpop.f32.mrf.mxu0  ;;  %v12864_v38 = vld [vmem:[%s15754_s2 + $0x758] sm:$0xff]  }
 0x4c8   :  { %v14267_v41 = vadd.f32 %v11919_v21, %v14128_v28  ;;  %v12815_v28 = vld [vmem:[%s15753_s1 + $0xa8] sm:$0xff]   ;;  %v12865_v21 = vld [vmem:[%s15754_s2 + $0x718] sm:$0xff]  }
 0x4c9   :  { %v14269_v23 = vpop.f32.mrf.mxu0 }
 0x4db   :  { %v11404_v42 = vpop.f32.mrf.mxu0 }
 0x4dd   :  { %v11405_v46 = vpop.f32.mrf.mxu0 }
 0x4de   :  { %v11406_v63 = vadd.f32 %v11405_v46, %v11404_v42  ;;  %v12868_v42 = vld [vmem:[%s15754_s2 + $0x750] sm:$0xff]  }
 0x4df   :  { %v11407_v48 = vpop.f32.mrf.mxu0  ;;  %v12869_v46 = vld [vmem:[%s15754_s2 + $0x710] sm:$0xff]  }
 0x4e0   :  { %v2690_v49 = vadd.f32 %v11406_v63, %v11384_v2  ;;  %v12830_v2 = vld [vmem:[%s15754_s2 + $0x6e0] sm:$0xff]   ;;  %v12872_v63 = vld [vmem:[%s15754_s2 + $0x748] sm:$0xff]  }
 0x4e1   :  { %v11408_v51 = vpop.f32.mrf.mxu0  ;;  %v12873_v48 = vld [vmem:[%s15754_s2 + $0x708] sm:$0xff]  }
 0x4e2   :  { %v2704_v52 = vpack.c.bf16 %v2690_v49, %v2690_v49  ;;  %v12876_v49 = vld [vmem:[%s15754_s2 + $0x740] sm:$0xff]  }
 0x4e3   :  { %v12877_v51 = vld [vmem:[%s15754_s2 + $0x700] sm:$0xff]  }
 0x4e4   :  { %v2738_v25 = vand.u32 %v2704_v52, %v13652_v16 }
 0x4e6   :  { %11920 = vmatprep.subr.bf16.mxu1 %v2738_v25 }
 0x4e7   :  { %11921 = vmatpush3.bf16.msra.mxu1 %v2738_v25 }
 0x4e8   :  { %11437 = vmatprep.subr.bf16.mxu1 %v12816_v27 }
 0x4ea   :  { %11923 = vmatmul.mubr.msk.bf16.vlgmr.msra.gmra.mxu1 %vm808_vm0, %v12815_v28 }
 0x4eb   :  { %11438 = vmatpush3.bf16.msra.mxu1 %v12817_v54  ;;  %11926 = vmatprep.mubr.msk.bf16.mxu1 %vm808_vm0, %v12823_v55 }
 0x4ec   :  { %11439 = vmatprep.subr.bf16.mxu1 %v12820_v57 }
 0x4ef   :  { %11440 = vmatpush3.bf16.msra.mxu1 %v12821_v58 }
 0x4f0   :  { %11441 = vmatprep.subr.bf16.mxu1 %v12826_v61 }
 0x4f2   :  { %11927 = vmatmul.mubr.msk.bf16.gmra.mxu1 %vm808_vm0, %v12825_v62 }
 0x4f3   :  { %11442 = vmatpush3.bf16.msra.mxu1 %v12827_v0  ;;  %3142 = vmatprep.mubr.bf16.mxu1 %v13551_v47 }
 0x4f4   :  { %11443 = vmatprep.subr.bf16.mxu1 %v12830_v2 }
 0x4f7   :  { %11444 = vmatpush3.bf16.msra.mxu1 %v12831_v5 }
 0x4f8   :  { %11445 = vmatprep.subr.bf16.mxu1 %v12834_v6 }
 0x4fb   :  { %11446 = vmatpush3.bf16.msra.mxu1 %v12835_v8  ;;  %v11431_v59 = vpop.f32.mrf.mxu0 }
 0x4fc   :  { %11447 = vmatprep.subr.bf16.mxu1 %v12838_v10 }
 0x4fd   :  { %v11432_v22 = vpop.f32.mrf.mxu0 }
 0x4fe   :  { %v11433_v24 = vadd.f32 %v11432_v22, %v11431_v59  ;;  %v12857_v59 = vld [vmem:[%s15754_s2 + $0x7b0] sm:$0xff]   ;;  %v12862_v22 = vld [vmem:[%s15754_s2 + $0x7e8] sm:$0xff]  }
 0x4ff   :  { %11448 = vmatpush3.bf16.msra.mxu1 %v12839_v13  ;;  %v11434_v3 = vpop.f32.mrf.mxu0 }
 0x500   :  { %11449 = vmatprep.subr.bf16.mxu1 %v12842_v15  ;;  %v12863_v3 = vld [vmem:[%s15754_s2 + $0x7a8] sm:$0xff]  }
 0x501   :  { %v11435_v26 = vpop.f32.mrf.mxu0 }
 0x502   :  { %v12866_v26 = vld [vmem:[%s15754_s2 + $0x7e0] sm:$0xff]  }
 0x503   :  { %11450 = vmatpush3.bf16.msra.mxu1 %v12843_v53  ;;  %v12853_v53 = vld [vmem:[%s15754_s2 + $0x7b8] sm:$0xff]  }
 0x504   :  { %11451 = vmatprep.subr.bf16.mxu1 %v12844_v19  ;;  %v12859_v19 = vld [vmem:[%s15753_s1 + $0xd0] sm:$0xff]  }
 0x507   :  { %11452 = vmatpush3.bf16.msra.mxu1 %v12845_v20  ;;  %v12856_v20 = vld [vmem:[%s15754_s2 + $0x7f0] sm:$0xff]  }
 0x508   :  { %11464 = vmatprep.subr.bf16.mxu1 %v12846_v7  ;;  %v12867_v7 = vld [vmem:[%s15754_s2 + $0x7a0] sm:$0xff]  }
 0x50a   :  { %3143 = vmatmul.mubr.bf16.vlgmr.msra.gmra.mxu1 %v13540_v44 }
 0x50b   :  { %3557 = vmatprep.mubr.bf16.mxu1 %v13538_v43  ;;  %11465 = vmatpush3.bf16.msra.mxu1 %v12847_v29  ;;  %v12870_v29 = vld [vmem:[%s15754_s2 + $0x7d8] sm:$0xff]  }
 0x50c   :  { %11466 = vmatprep.subr.bf16.mxu1 %v12848_v30  ;;  %v12871_v30 = vld [vmem:[%s15754_s2 + $0x798] sm:$0xff]  }
 0x50f   :  { %11467 = vmatpush3.bf16.msra.mxu1 %v12850_v31  ;;  %v12875_v31 = vld [vmem:[%s15754_s2 + $0x790] sm:$0xff]  }
 0x510   :  { %11468 = vmatprep.subr.bf16.mxu1 %v12854_v32  ;;  %v12878_v32 = vld [vmem:[%s15754_s2 + $0x7c8] sm:$0xff]  }
 0x513   :  { %11469 = vmatpush3.bf16.msra.mxu1 %v12855_v34  ;;  %v12879_v34 = vld [vmem:[%s15754_s2 + $0x788] sm:$0xff]  }
 0x514   :  { %11470 = vmatprep.subr.bf16.mxu1 %v12858_v17  ;;  %v12880_v17 = vld [vmem:[%s15754_s2 + $0x7c0] sm:$0xff]  }
 0x517   :  { %11471 = vmatpush3.bf16.msra.mxu1 %v12860_v36  ;;  %v12881_v36 = vld [vmem:[%s15754_s2 + $0x780] sm:$0xff]  }
 0x518   :  { %11472 = vmatprep.subr.bf16.mxu1 %v12864_v38 }
 0x51b   :  { %11473 = vmatpush3.bf16.msra.mxu1 %v12865_v21 }
 0x51c   :  { %11474 = vmatprep.subr.bf16.mxu1 %v12868_v42 }
 0x51f   :  { %11475 = vmatpush3.bf16.msra.mxu1 %v12869_v46 }
 0x520   :  { %11476 = vmatprep.subr.bf16.mxu1 %v12872_v63 }
 0x523   :  { %11477 = vmatpush3.bf16.msra.mxu1 %v12873_v48  ;;  %v12882_v48 = vld [vmem:[%s15754_s2 + $0x878] sm:$0xff]  }
 0x524   :  { %11478 = vmatprep.subr.bf16.mxu1 %v12876_v49  ;;  %v12883_v49 = vld [vmem:[%s15754_s2 + $0x838] sm:$0xff]  }
 0x527   :  { %11479 = vmatpush3.bf16.msra.mxu1 %v12877_v51  ;;  %v12884_v51 = vld [vmem:[%s15754_s2 + $0x870] sm:$0xff]  }
 0x52a   :  { %3558 = vmatmul.mubr.bf16.vlgmr.msra.gmra.mxu1 %v13528_v39 }
 0x5aa   :  { %v11924_v52 = vpop.f32.mrf.mxu1 }
 0x5ab   :  { %v14389_v25 = vadd.f32 %v11924_v52, %v14250_v33  ;;  %v12886_v52 = vld [vmem:[%s15754_s2 + $0x830] sm:$0xff]  }
 0x5ac   :  { %v2774_v27 = vpop.f32.mrf.mxu1 }
 0x5ad   :  { %v14392_v28 = vadd.f32 %v2774_v27, %v14253_v14  ;;  %v12890_v27 = vld [vmem:[%s15754_s2 + $0x868] sm:$0xff]  }
 0x5ae   :  { %v11925_v54 = vpop.f32.mrf.mxu1 }
 0x5af   :  { %v14395_v55 = vadd.f32 %v11925_v54, %v14256_v18  ;;  %v12891_v54 = vld [vmem:[%s15754_s2 + $0x828] sm:$0xff]  }
 0x5b0   :  { %v14397_v57 = vpop.f32.mrf.mxu1 }
 0x5b2   :  { %v11928_v58 = vpop.f32.mrf.mxu1 }
 0x5b3   :  { %v14400_v61 = vadd.f32 %v11928_v58, %v14261_v37  ;;  %v12894_v58 = vld [vmem:[%s15754_s2 + $0x860] sm:$0xff]  }
 0x5b4   :  { %v2790_v62 = vpop.f32.mrf.mxu1 }
 0x5b5   :  { %v14403_v0 = vadd.f32 %v2790_v62, %v14264_v40  ;;  %v12852_v40 = vld [vmem:[%s15754_s2 + $0x7f8] sm:$0xff]   ;;  %v12896_v62 = vld [vmem:[%s15754_s2 + $0x820] sm:$0xff]  }
 0x5b6   :  { %v11929_v33 = vpop.f32.mrf.mxu1 }
 0x5b7   :  { %v14406_v2 = vadd.f32 %v11929_v33, %v14267_v41  ;;  %v12851_v41 = vld [vmem:[%s15753_s1 + $0xc8] sm:$0xff]   ;;  %v12900_v33 = vld [vmem:[%s15754_s2 + $0x858] sm:$0xff]  }
 0x5b8   :  { %v14408_v14 = vpop.f32.mrf.mxu1 }
 0x5ca   :  { %v11453_v5 = vpop.f32.mrf.mxu1 }
 0x5cc   :  { %v11454_v6 = vpop.f32.mrf.mxu1 }
 0x5cd   :  { %v11455_v18 = vadd.f32 %v11454_v6, %v11453_v5  ;;  %v12901_v5 = vld [vmem:[%s15754_s2 + $0x818] sm:$0xff]   ;;  %v12904_v6 = vld [vmem:[%s15754_s2 + $0x850] sm:$0xff]  }
 0x5ce   :  { %v11456_v8 = vpop.f32.mrf.mxu1 }
 0x5cf   :  { %v3145_v10 = vadd.f32 %v11455_v18, %v11433_v24  ;;  %v12861_v24 = vld [vmem:[%s15753_s1 + $0xd8] sm:$0xff]   ;;  %v12905_v18 = vld [vmem:[%s15754_s2 + $0x810] sm:$0xff]   ;;  %v12908_v8 = vld [vmem:[%s15754_s2 + $0x848] sm:$0xff]  }
 0x5d0   :  { %v11457_v13 = vpop.f32.mrf.mxu1 }
 0x5d1   :  { %v3159_v15 = vpack.c.bf16 %v3145_v10, %v3145_v10  ;;  %v12909_v10 = vld [vmem:[%s15754_s2 + $0x808] sm:$0xff]   ;;  %v12912_v13 = vld [vmem:[%s15754_s2 + $0x840] sm:$0xff]  }
 0x5d3   :  { %v3193_v37 = vand.u32 %v3159_v15, %v13652_v16  ;;  %v12913_v15 = vld [vmem:[%s15754_s2 + $0x800] sm:$0xff]  }
 0x5d5   :  { %11930 = vmatprep.subr.bf16.mxu0 %v3193_v37 }
 0x5d6   :  { %11931 = vmatpush3.bf16.msra.mxu0 %v3193_v37 }
 0x5d7   :  { %11486 = vmatprep.subr.bf16.mxu0 %v12852_v40 }
 0x5d9   :  { %11933 = vmatmul.mubr.msk.bf16.vlgmr.msra.gmra.mxu0 %vm808_vm0, %v12851_v41 }
 0x5da   :  { %11487 = vmatpush3.bf16.msra.mxu0 %v12853_v53  ;;  %11936 = vmatprep.mubr.msk.bf16.mxu0 %vm808_vm0, %v12859_v19 }
 0x5db   :  { %11488 = vmatprep.subr.bf16.mxu0 %v12856_v20 }
 0x5de   :  { %11489 = vmatpush3.bf16.msra.mxu0 %v12857_v59 }
 0x5df   :  { %11490 = vmatprep.subr.bf16.mxu0 %v12862_v22 }
 0x5e1   :  { %11937 = vmatmul.mubr.msk.bf16.gmra.mxu0 %vm808_vm0, %v12861_v24 }
 0x5e2   :  { %11491 = vmatpush3.bf16.msra.mxu0 %v12863_v3  ;;  %3597 = vmatprep.mubr.bf16.mxu0 %v13551_v47 }
 0x5e3   :  { %11492 = vmatprep.subr.bf16.mxu0 %v12866_v26 }
 0x5e6   :  { %11493 = vmatpush3.bf16.msra.mxu0 %v12867_v7 }
 0x5e7   :  { %11494 = vmatprep.subr.bf16.mxu0 %v12870_v29 }
 0x5ea   :  { %11495 = vmatpush3.bf16.msra.mxu0 %v12871_v30  ;;  %v11480_v38 = vpop.f32.mrf.mxu1 }
 0x5eb   :  { %11496 = vmatprep.subr.bf16.mxu0 %v12874_v11 }
 0x5ec   :  { %v11481_v21 = vpop.f32.mrf.mxu1 }
 0x5ed   :  { %v11482_v42 = vadd.f32 %v11481_v21, %v11480_v38  ;;  %v12893_v38 = vld [vmem:[%s15754_s2 + $0x8b0] sm:$0xff]   ;;  %v12898_v21 = vld [vmem:[%s15754_s2 + $0x8e8] sm:$0xff]  }
 0x5ee   :  { %11497 = vmatpush3.bf16.msra.mxu0 %v12875_v31  ;;  %v11483_v46 = vpop.f32.mrf.mxu1 }
 0x5ef   :  { %11498 = vmatprep.subr.bf16.mxu0 %v12878_v32  ;;  %v12899_v46 = vld [vmem:[%s15754_s2 + $0x8a8] sm:$0xff]  }
 0x5f0   :  { %v11484_v63 = vpop.f32.mrf.mxu1 }
 0x5f1   :  { %v12902_v63 = vld [vmem:[%s15754_s2 + $0x8e0] sm:$0xff]  }
 0x5f2   :  { %11499 = vmatpush3.bf16.msra.mxu0 %v12879_v34  ;;  %v12889_v34 = vld [vmem:[%s15754_s2 + $0x8b8] sm:$0xff]  }
 0x5f3   :  { %11500 = vmatprep.subr.bf16.mxu0 %v12880_v17  ;;  %v12895_v17 = vld [vmem:[%s15753_s1 + $0xf0] sm:$0xff]  }
 0x5f6   :  { %11501 = vmatpush3.bf16.msra.mxu0 %v12881_v36  ;;  %v12892_v36 = vld [vmem:[%s15754_s2 + $0x8f0] sm:$0xff]  }
 0x5f7   :  { %11513 = vmatprep.subr.bf16.mxu0 %v12882_v48  ;;  %v12903_v48 = vld [vmem:[%s15754_s2 + $0x8a0] sm:$0xff]  }
 0x5f9   :  { %3598 = vmatmul.mubr.bf16.vlgmr.msra.gmra.mxu0 %v13540_v44 }
 0x5fa   :  { %4012 = vmatprep.mubr.bf16.mxu0 %v13538_v43  ;;  %11514 = vmatpush3.bf16.msra.mxu0 %v12883_v49  ;;  %v12885_v43 = vld [vmem:[%s15753_s1 + $0xe0] sm:$0xff]   ;;  %v12906_v49 = vld [vmem:[%s15754_s2 + $0x8d8] sm:$0xff]  }
 0x5fb   :  { %11515 = vmatprep.subr.bf16.mxu0 %v12884_v51  ;;  %11942 = vmatprep.mubr.msk.bf16.mxu1 %vm808_vm0, %v12885_v43  ;;  %v12907_v51 = vld [vmem:[%s15754_s2 + $0x898] sm:$0xff]   ;;  %v12910_v43 = vld [vmem:[%s15754_s2 + $0x8d0] sm:$0xff]  }
 0x5fe   :  { %11516 = vmatpush3.bf16.msra.mxu0 %v12886_v52  ;;  %v12914_v52 = vld [vmem:[%s15754_s2 + $0x8c8] sm:$0xff]  }
 0x5ff   :  { %11517 = vmatprep.subr.bf16.mxu0 %v12890_v27  ;;  %v12915_v27 = vld [vmem:[%s15754_s2 + $0x888] sm:$0xff]  }
 0x602   :  { %11518 = vmatpush3.bf16.msra.mxu0 %v12891_v54  ;;  %v12916_v54 = vld [vmem:[%s15754_s2 + $0x8c0] sm:$0xff]  }
 0x603   :  { %11519 = vmatprep.subr.bf16.mxu0 %v12894_v58  ;;  %v12917_v58 = vld [vmem:[%s15754_s2 + $0x880] sm:$0xff]  }
 0x606   :  { %11520 = vmatpush3.bf16.msra.mxu0 %v12896_v62 }
 0x607   :  { %11521 = vmatprep.subr.bf16.mxu0 %v12900_v33 }
 0x60a   :  { %11522 = vmatpush3.bf16.msra.mxu0 %v12901_v5 }
 0x60b   :  { %11523 = vmatprep.subr.bf16.mxu0 %v12904_v6 }
 0x60e   :  { %11524 = vmatpush3.bf16.msra.mxu0 %v12905_v18 }
 0x60f   :  { %11525 = vmatprep.subr.bf16.mxu0 %v12908_v8  ;;  %v12918_v8 = vld [vmem:[%s15753_s1 + $0x100] sm:$0xff]  }
 0x612   :  { %11526 = vmatpush3.bf16.msra.mxu0 %v12909_v10  ;;  %v15766_v10 = vmov 0  }
 0x613   :  { %11527 = vmatprep.subr.bf16.mxu0 %v12912_v13  ;;  %12595 = vset.pattern.permute.xlu0 %v15766_v10  ;;  %v4180_v13 = vld [vmem:[%s15755_s3 + $0x10] sm:$0xff] }
 0x614   :  { %12596 = vset.pattern.permute.xlu1 %v15766_v10 }
 0x615   :  { %4198 = vperm.xlu1 %12596, %v4180_v13  }
 0x616   :  { %11528 = vmatpush3.bf16.msra.mxu0 %v12913_v15  ;;  %v4179_v15 = vld [vmem:[%s15755_s3 + $0x8] sm:$0xff] }
 0x619   :  { %4013 = vmatmul.mubr.bf16.vlgmr.msra.gmra.mxu0 %v13528_v39 }
 0x61a   :  { %11952 = vmatprep.mubr.msk.bf16.mxu0 %vm808_vm0, %v12918_v8 }
 0x699   :  { %v11934_v37 = vpop.f32.mrf.mxu0 }
 0x69a   :  { %v14528_v40 = vadd.f32 %v11934_v37, %v14389_v25  ;;  %v4181_v37 = vld [vmem:[%s15755_s3 + $0x18] sm:$0xff] }
 0x69b   :  { %v3229_v41 = vpop.f32.mrf.mxu0  ;;  %4203 = vperm.xlu1 %12596, %v4181_v37  }
 0x69c   :  { %v14531_v53 = vadd.f32 %v3229_v41, %v14392_v28  ;;  %v4182_v41 = vld [vmem:[%s15755_s3 + $0x20] sm:$0xff] }
 0x69d   :  { %v11935_v19 = vpop.f32.mrf.mxu0 }
 0x69e   :  { %v14534_v20 = vadd.f32 %v11935_v19, %v14395_v55  ;;  %v4183_v19 = vld [vmem:[%s15755_s3 + $0x28] sm:$0xff] }
 0x69f   :  { %v14536_v59 = vpop.f32.mrf.mxu0  ;;  %4213 = vperm.xlu1 %12596, %v4183_v19  }
 0x6a1   :  { %v11938_v22 = vpop.f32.mrf.mxu0 }
 0x6a2   :  { %v14539_v24 = vadd.f32 %v11938_v22, %v14400_v61  ;;  %v4184_v22 = vld [vmem:[%s15755_s3 + $0x30] sm:$0xff] }
 0x6a3   :  { %v3245_v3 = vpop.f32.mrf.mxu0 }
 0x6a4   :  { %v14542_v39 = vadd.f32 %v3245_v3, %v14403_v0  ;;  %v12888_v0 = vld [vmem:[%s15754_s2 + $0x8f8] sm:$0xff]  }
 0x6a5   :  { %v11939_v25 = vpop.f32.mrf.mxu0  ;;  %v4185_v3 = vld [vmem:[%s15755_s3 + $0x38] sm:$0xff] }
 0x6a6   :  { %v14545_v26 = vadd.f32 %v11939_v25, %v14406_v2  ;;  %v12887_v2 = vld [vmem:[%s15753_s1 + $0xe8] sm:$0xff]   ;;  %4223 = vperm.xlu1 %12596, %v4185_v3   ;;  %v7179_v25 = vld [vmem:[%s15758_s6 + $0x70] sm:$0xff] }
 0x6a7   :  { %v14547_v28 = vpop.f32.mrf.mxu0 }
 0x6b9   :  { %v11502_v7 = vpop.f32.mrf.mxu0 }
 0x6bb   :  { %v11503_v29 = vpop.f32.mrf.mxu0 }
 0x6bc   :  { %v11504_v55 = vadd.f32 %v11503_v29, %v11502_v7  ;;  %v7180_v7 = vld [vmem:[%s15758_s6 + $0x78] sm:$0xff]  ;;  %v7177_v29 = vld [vmem:[%s15758_s6 + $0x60] sm:$0xff] }
 0x6bd   :  { %v11505_v30 = vpop.f32.mrf.mxu0  ;;  %7258 = vperm.xlu1 %12596, %v7180_v7  }
 0x6be   :  { %v3600_v11 = vadd.f32 %v11504_v55, %v11482_v42  ;;  %v12897_v42 = vld [vmem:[%s15753_s1 + $0xf8] sm:$0xff]   ;;  %v7178_v55 = vld [vmem:[%s15758_s6 + $0x68] sm:$0xff]  ;;  %v7175_v30 = vld [vmem:[%s15758_s6 + $0x50] sm:$0xff] }
 0x6bf   :  { %v11506_v31 = vpop.f32.mrf.mxu0 }
 0x6c0   :  { %v3614_v32 = vpack.c.bf16 %v3600_v11, %v3600_v11  ;;  %v7176_v11 = vld [vmem:[%s15758_s6 + $0x58] sm:$0xff]  ;;  %v7173_v31 = vld [vmem:[%s15758_s6 + $0x40] sm:$0xff] }
 0x6c1   :  { %7248 = vperm.xlu1 %12596, %v7178_v55  }
 0x6c2   :  { %v3648_v61 = vand.u32 %v3614_v32, %v13652_v16  ;;  %v7174_v32 = vld [vmem:[%s15758_s6 + $0x48] sm:$0xff] }
 0x6c4   :  { %11940 = vmatprep.subr.bf16.mxu1 %v3648_v61 }
 0x6c5   :  { %11941 = vmatpush3.bf16.msra.mxu1 %v3648_v61  ;;  %7238 = vperm.xlu1 %12596, %v7176_v11   ;;  %v7171_v61 = vld [vmem:[%s15758_s6 + $0x30] sm:$0xff] }
 0x6c6   :  { %11535 = vmatprep.subr.bf16.mxu1 %v12888_v0  ;;  %v7172_v0 = vld [vmem:[%s15758_s6 + $0x38] sm:$0xff] }
 0x6c8   :  { %11943 = vmatmul.mubr.msk.bf16.vlgmr.msra.gmra.mxu1 %vm808_vm0, %v12887_v2  ;;  %v7169_v2 = vld [vmem:[%s15758_s6 + $0x20] sm:$0xff] }
 0x6c9   :  { %11536 = vmatpush3.bf16.msra.mxu1 %v12889_v34  ;;  %11946 = vmatprep.mubr.msk.bf16.mxu1 %vm808_vm0, %v12895_v17  ;;  %v7170_v34 = vld [vmem:[%s15758_s6 + $0x28] sm:$0xff]  ;;  %v7167_v17 = vld [vmem:[%s15758_s6 + $0x10] sm:$0xff] }
 0x6ca   :  { %11537 = vmatprep.subr.bf16.mxu1 %v12892_v36  ;;  %7228 = vperm.xlu1 %12596, %v7174_v32   ;;  %v7168_v36 = vld [vmem:[%s15758_s6 + $0x18] sm:$0xff] }
 0x6cb   :  { %v12921_v32 = vld [vmem:[%s15753_s1 + $0x118] sm:$0xff]  }
 0x6cd   :  { %11538 = vmatpush3.bf16.msra.mxu1 %v12893_v38  ;;  %v12922_v38 = vld [vmem:[%s15757_s5 + $0x38] sm:$0xff]  }
 0x6ce   :  { %11539 = vmatprep.subr.bf16.mxu1 %v12898_v21  ;;  %7218 = vperm.xlu1 %12596, %v7172_v0   ;;  %v7165_v21 = vld [vmem:[%s15758_s6] sm:$0xff]  ;;  %v12930_v0 = vld [vmem:[%s15757_s5 + $0x18] sm:$0xff]  }
 0x6d0   :  { %11947 = vmatmul.mubr.msk.bf16.gmra.mxu1 %vm808_vm0, %v12897_v42  ;;  %v7166_v42 = vld [vmem:[%s15758_s6 + $0x8] sm:$0xff] }
 0x6d1   :  { %11540 = vmatpush3.bf16.msra.mxu1 %v12899_v46  ;;  %4052 = vmatprep.mubr.bf16.mxu1 %v13551_v47  ;;  %v12911_v47 = vld [vmem:[%s15754_s2 + $0x890] sm:$0xff]  }
 0x6d2   :  { %11541 = vmatprep.subr.bf16.mxu1 %v12902_v63  ;;  %7208 = vperm.xlu1 %12596, %v7170_v34   ;;  %v12924_v46 = vld [vmem:[%s15757_s5 + $0x30] sm:$0xff]  }
 0x6d3   :  { %v8106_v63 = vld [vmem:[%s15761_s9 + $0x30] sm:$0xff] }
 0x6d4   :  { %v12932_v34 = vld [vmem:[%s15757_s5 + $0x10] sm:$0xff]  }
 0x6d5   :  { %11542 = vmatpush3.bf16.msra.mxu1 %v12903_v48  ;;  %v8107_v48 = vld [vmem:[%s15761_s9 + $0x38] sm:$0xff] }
 0x6d6   :  { %11543 = vmatprep.subr.bf16.mxu1 %v12906_v49  ;;  %7198 = vperm.xlu1 %12596, %v7168_v36   ;;  %v12926_v49 = vld [vmem:[%s15757_s5 + $0x28] sm:$0xff]  }
 0x6d7   :  { %v12934_v36 = vld [vmem:[%s15757_s5 + $0x8] sm:$0xff]  }
 0x6d9   :  { %11544 = vmatpush3.bf16.msra.mxu1 %v12907_v51  ;;  %v11529_v62 = vpop.f32.mrf.mxu0  ;;  %v8104_v51 = vld [vmem:[%s15761_s9 + $0x20] sm:$0xff] }
 0x6da   :  { %11545 = vmatprep.subr.bf16.mxu1 %v12910_v43  ;;  %7188 = vperm.xlu1 %12596, %v7166_v42   ;;  %v8105_v43 = vld [vmem:[%s15761_s9 + $0x28] sm:$0xff]  ;;  %v12937_v42 = vld [vmem:[%s15757_s5 + $0x40] sm:$0xff]  }
 0x6db   :  { %v11530_v33 = vpop.f32.mrf.mxu0 }
 0x6dc   :  { %v14612_v5 = vadd.f32 %v11530_v33, %v11529_v62  ;;  %v9458_v62 = vld [vmem:[%s15764_s12] sm:$0x7] }
 0x6dd   :  { %11546 = vmatpush3.bf16.msra.mxu1 %v12911_v47  ;;  %v11532_v6 = vpop.f32.mrf.mxu0  ;;  %v12928_v47 = vld [vmem:[%s15757_s5 + $0x20] sm:$0xff]  }
 0x6de   :  { %11547 = vmatprep.subr.bf16.mxu1 %v12914_v52  ;;  %8145 = vperm.xlu1 %12596, %v8107_v48   ;;  %v8102_v52 = vld [vmem:[%s15761_s9 + $0x10] sm:$0xff] }
 0x6df   :  { %v11533_v18 = vpop.f32.mrf.mxu0 }
 0x6e1   :  { %11548 = vmatpush3.bf16.msra.mxu1 %v12915_v27  ;;  %v8103_v27 = vld [vmem:[%s15761_s9 + $0x18] sm:$0xff] }
 0x6e2   :  { %11549 = vmatprep.subr.bf16.mxu1 %v12916_v54  ;;  %8135 = vperm.xlu1 %12596, %v8105_v43   ;;  %v8100_v54 = vld [vmem:[%s15761_s9] sm:$0xff] }
 0x6e5   :  { %11550 = vmatpush3.bf16.msra.mxu1 %v12917_v58  ;;  %v8101_v58 = vld [vmem:[%s15761_s9 + $0x8] sm:$0xff] }
 0x6e6   :  { %11960 = vmatprep.subr.bf16.mxu1 %v12922_v38  ;;  %8125 = vperm.xlu1 %12596, %v8103_v27  }
 0x6e8   :  { %4053 = vmatmul.mubr.bf16.vlgmr.msra.gmra.mxu1 %v13540_v44  ;;  %v4178_v44 = vld [vmem:[%s15755_s3] sm:$0xff] }
 0x6e9   :  { %4188 = vperm.xlu0 %12595, %v4178_v44   ;;  %11961 = vmatpush3.bf16.msra.mxu1 %v12922_v38  ;;  %v12935_v38 = vld [vmem:[%s15757_s5 + $0x48] sm:$0xff]  }
 0x6ea   :  { %11962 = vmatprep.subr.bf16.mxu1 %v12924_v46  ;;  %8115 = vperm.xlu1 %12596, %v8101_v58  }
 0x6ed   :  { %4193 = vperm.xlu0 %12595, %v4179_v15   ;;  %11963 = vmatpush3.bf16.msra.mxu1 %v12924_v46  ;;  %v966_v46 = vadd.f32 %v13834_v45, %v13844_v60 }
 0x6ee   :  { %11964 = vmatprep.subr.bf16.mxu1 %v12926_v49 }
 0x6ef   :  { %v1441_v48 = vadd.f32 %v13980_v12, %v966_v46 }
 0x6f1   :  { %4208 = vperm.xlu0 %12595, %v4182_v41   ;;  %11965 = vmatpush3.bf16.msra.mxu1 %v12926_v49  ;;  %v4199_v49 = vpop.permute.xlu1 %4198 }
 0x6f2   :  { %11966 = vmatprep.subr.bf16.mxu1 %v12928_v47 }
 0x6f5   :  { %4218 = vperm.xlu0 %12595, %v4184_v22   ;;  %11967 = vmatpush3.bf16.msra.mxu1 %v12928_v47  ;;  %v982_v47 = vadd.f32 %v13836_v50, %v13852_v4 }
 0x6f6   :  { %11968 = vmatprep.subr.bf16.mxu1 %v12930_v0 }
 0x6f9   :  { %7253 = vperm.xlu0 %12595, %v7179_v25   ;;  %11969 = vmatpush3.bf16.msra.mxu1 %v12930_v0 }
 0x6fa   :  { %11970 = vmatprep.subr.bf16.mxu1 %v12932_v34 }
 0x6fd   :  { %7243 = vperm.xlu0 %12595, %v7177_v29   ;;  %11971 = vmatpush3.bf16.msra.mxu1 %v12932_v34 }
 0x6fe   :  { %11972 = vmatprep.subr.bf16.mxu1 %v12934_v36 }
 0x701   :  { %7233 = vperm.xlu0 %12595, %v7175_v30   ;;  %11973 = vmatpush3.bf16.msra.mxu1 %v12934_v36  ;;  %v12939_v36 = vld [vmem:[%s15756_s4] sm:$0xff]  }
 0x705   :  { %7223 = vperm.xlu0 %12595, %v7173_v31   ;;  %v12920_v31 = vld [vmem:[%s15753_s1 + $0x110] sm:$0xff]  }
 0x709   :  { %7213 = vperm.xlu0 %12595, %v7171_v61   ;;  %v12929_v61 = vld [vmem:[%s15757_s5 + $0x60] sm:$0xff]  }
 0x70d   :  { %7203 = vperm.xlu0 %12595, %v7169_v2   ;;  %v12931_v2 = vld [vmem:[%s15757_s5 + $0x58] sm:$0xff]  }
 0x711   :  { %7193 = vperm.xlu0 %12595, %v7167_v17   ;;  %v12933_v17 = vld [vmem:[%s15757_s5 + $0x50] sm:$0xff]  }
 0x715   :  { %7183 = vperm.xlu0 %12595, %v7165_v21   ;;  %v12936_v21 = vld [vmem:[%s15757_s5] sm:$0xff]  }
 0x716   :  { %11974 = vmatprep.subr.bf16.mxu1 %v12936_v21  ;;  %v4204_v45 = vpop.permute.xlu1 %4203 }
 0x717   :  { %11975 = vmatpush3.bf16.msra.mxu1 %v12936_v21 }
 0x719   :  { %8140 = vperm.xlu0 %12595, %v8106_v63  }
 0x71d   :  { %8130 = vperm.xlu0 %12595, %v8104_v51   ;;  %v1896_v51 = vadd.f32 %v14119_v1, %v1441_v48 }
 0x71f   :  { %v2351_v43 = vadd.f32 %v14258_v35, %v1896_v51 }
 0x721   :  { %8120 = vperm.xlu0 %12595, %v8102_v52  }
 0x725   :  { %8110 = vperm.xlu0 %12595, %v8100_v54   ;;  %v2806_v54 = vadd.f32 %v14397_v57, %v2351_v43 }
 0x727   :  { %v3261_v12 = vadd.f32 %v14536_v59, %v2806_v54  ;;  %v4214_v59 = vpop.permute.xlu1 %4213 }
 0x729   :  { %9461 = vperm.xlu0 %12595, %v9458_v62   ;;  %v1445_v62 = vadd.f32 %v13991_v56, %v982_v47 }
 0x72b   :  { %v1900_v1 = vadd.f32 %v14130_v9, %v1445_v62 }
 0x72d   :  { %v2355_v57 = vadd.f32 %v14269_v23, %v1900_v1 }
 0x764   :  { %v4189_v63 = vpop.permute.xlu0 %4188 }
 0x768   :  { %v4194_v52 = vpop.permute.xlu0 %4193 }
 0x788   :  { %v11944_v33 = vpop.f32.mrf.mxu1 }
 0x789   :  { %v14732_v6 = vadd.f32 %v11944_v33, %v14528_v40 }
 0x78a   :  { %v3684_v18 = vpop.f32.mrf.mxu1 }
 0x78b   :  { %v14735_v8 = vadd.f32 %v3684_v18, %v14531_v53 }
 0x78c   :  { %v11945_v44 = vpop.f32.mrf.mxu1 }
 0x78d   :  { %v14738_v13 = vadd.f32 %v11945_v44, %v14534_v20  ;;  %v4209_v44 = vpop.permute.xlu0 %4208 }
 0x78e   :  { %v14740_v15 = vpop.f32.mrf.mxu1 }
 0x78f   :  { %v3716_v18 = vadd.f32 %v14740_v15, %v3261_v12 }
 0x790   :  { %v11948_v37 = vpop.f32.mrf.mxu1 }
 0x791   :  { %v14743_v41 = vadd.f32 %v11948_v37, %v14539_v24 }
 0x792   :  { %v3700_v19 = vpop.f32.mrf.mxu1 }
 0x793   :  { %v14746_v22 = vadd.f32 %v3700_v19, %v14542_v39  ;;  %v12923_v39 = vld [vmem:[%s15757_s5 + $0x78] sm:$0xff]  }
 0x794   :  { %v11949_v40 = vpop.f32.mrf.mxu1 }
 0x795   :  { %v14749_v3 = vadd.f32 %v11949_v40, %v14545_v26  ;;  %v12919_v26 = vld [vmem:[%s15753_s1 + $0x108] sm:$0xff]   ;;  %v2810_v40 = vadd.f32 %v14408_v14, %v2355_v57  ;;  %v12942_v57 = vld [vmem:[%s15757_s5 + $0xb8] sm:$0xff]  }
 0x796   :  { %v14751_v53 = vpop.f32.mrf.mxu1 }
 0x797   :  { %v3265_v15 = vadd.f32 %v14547_v28, %v2810_v40  ;;  %v12948_v40 = vld [vmem:[%s15757_s5 + $0xa8] sm:$0xff]  }
 0x799   :  { %v3720_v14 = vadd.f32 %v14751_v53, %v3265_v15  ;;  %v12952_v15 = vld [vmem:[%s15756_s4 + $0x68] sm:$0xff]  }
 0x7a8   :  { %v11551_v25 = vpop.f32.mrf.mxu1 }
 0x7aa   :  { %v11552_v7 = vpop.f32.mrf.mxu1 }
 0x7ab   :  { %v11553_v20 = vadd.f32 %v11552_v7, %v11551_v25 }
 0x7ac   :  { %v11554_v29 = vpop.f32.mrf.mxu1 }
 0x7ad   :  { %v4055_v55 = vadd.f32 %v11553_v20, %v14612_v5  ;;  %v12925_v5 = vld [vmem:[%s15757_s5 + $0x70] sm:$0xff]  }
 0x7ae   :  { %v11555_v30 = vpop.f32.mrf.mxu1 }
 0x7af   :  { %v4069_v11 = vpack.c.bf16 %v4055_v55, %v4055_v55 }
 0x7b1   :  { %v4103_v24 = vand.u32 %v4069_v11, %v13652_v16  ;;  %v12927_v16 = vld [vmem:[%s15757_s5 + $0x68] sm:$0xff]   ;;  %v4219_v11 = vpop.permute.xlu0 %4218 }
 0x7b3   :  { %11950 = vmatprep.subr.bf16.mxu0 %v4103_v24 }
 0x7b4   :  { %11951 = vmatpush3.bf16.msra.mxu0 %v4103_v24 }
 0x7b5   :  { %11984 = vmatprep.subr.bf16.mxu0 %v12923_v39 }
 0x7b7   :  { %11953 = vmatmul.mubr.msk.bf16.vlgmr.msra.gmra.mxu0 %vm808_vm0, %v12919_v26 }
 0x7b8   :  { %11956 = vmatprep.mubr.msk.bf16.mxu0 %vm808_vm0, %v12920_v31  ;;  %11985 = vmatpush3.bf16.msra.mxu0 %v12923_v39 }
 0x7b9   :  { %11986 = vmatprep.subr.bf16.mxu0 %v12925_v5 }
 0x7bc   :  { %11987 = vmatpush3.bf16.msra.mxu0 %v12925_v5  ;;  %v4224_v5 = vpop.permute.xlu1 %4223 }
 0x7bd   :  { %11988 = vmatprep.subr.bf16.mxu0 %v12927_v16 }
 0x7bf   :  { %11957 = vmatmul.mubr.msk.bf16.gmra.mxu0 %vm808_vm0, %v12921_v32 }
 0x7c0   :  { %11989 = vmatpush3.bf16.msra.mxu0 %v12927_v16 }
 0x7c1   :  { %11990 = vmatprep.subr.bf16.mxu0 %v12929_v61 }
 0x7c4   :  { %11991 = vmatpush3.bf16.msra.mxu0 %v12929_v61 }
 0x7c5   :  { %11992 = vmatprep.subr.bf16.mxu0 %v12931_v2 }
 0x7c8   :  { %11993 = vmatpush3.bf16.msra.mxu0 %v12931_v2 }
 0x7c9   :  { %11994 = vmatprep.subr.bf16.mxu0 %v12933_v17 }
 0x7cc   :  { %11995 = vmatpush3.bf16.msra.mxu0 %v12933_v17  ;;  %v12938_v17 = vld [vmem:[%s15756_s4 + $0x40] sm:$0xff]  }
 0x7cd   :  { %11996 = vmatprep.subr.bf16.mxu0 %v12935_v38 }
 0x7d0   :  { %11997 = vmatpush3.bf16.msra.mxu0 %v12935_v38 }
 0x7d1   :  { %11998 = vmatprep.subr.bf16.mxu0 %v12937_v42 }
 0x7d4   :  { %11999 = vmatpush3.bf16.msra.mxu0 %v12937_v42 }
 0x877   :  { %v11954_v27 = vpop.f32.mrf.mxu0 }
 0x878   :  { %v4172_v58 = vadd.f32 %v11954_v27, %v14732_v6 }
 0x879   :  { %v4139_v60 = vpop.f32.mrf.mxu0 }
 0x87a   :  { %v4170_v33 = vadd.f32 %v4139_v60, %v14735_v8  ;;  %v4228_v50 = vadd.f32 %v4199_v49, %v4172_v58 }
 0x87b   :  { %v11955_v35 = vpop.f32.mrf.mxu0 }
 0x87c   :  { %v4173_v4 = vadd.f32 %v11955_v35, %v14738_v13  ;;  %v4226_v37 = vadd.f32 %v4189_v63, %v4170_v33  ;;  %v4236_v8 = vmax.f32 %v4228_v50, 0.0 }
 0x87d   :  { %v4142_v6 = vpop.f32.mrf.mxu0 }
 0x87e   :  { %v4229_v56 = vadd.f32 %v4204_v45, %v4173_v4  ;;  %v4171_v19 = vadd.f32 %v4142_v6, %v3716_v18  ;;  %v4234_v13 = vmax.f32 %v4226_v37, 0.0  ;;  %v12941_v6 = vld [vmem:[%s15756_s4 + $0x8] sm:$0xff]   ;;  %v12944_v37 = vld [vmem:[%s15756_s4 + $0x50] sm:$0xff]  }
 0x87f   :  { %v11958_v25 = vpop.f32.mrf.mxu0 }
 0x880   :  { %v4237_v7 = vmax.f32 %v4229_v56, 0.0  ;;  %v4227_v9 = vadd.f32 %v4194_v52, %v4171_v19  ;;  %v4176_v20 = vadd.f32 %v11958_v25, %v14743_v41  ;;  %v12943_v56 = vld [vmem:[%s15757_s5 + $0xb0] sm:$0xff]   ;;  %v12947_v25 = vld [vmem:[%s15756_s4 + $0x18] sm:$0xff]  }
 0x881   :  { %v4155_v29 = vpop.f32.mrf.mxu0  ;;  %v12945_v19 = vld [vmem:[%s15756_s4 + $0x10] sm:$0xff]  }
 0x882   :  { %v14822_v55 = vpack.c.bf16 %v4237_v7, %v4236_v8  ;;  %v4235_v23 = vmax.f32 %v4227_v9, 0.0  ;;  %v4174_v30 = vadd.f32 %v4155_v29, %v14746_v22  ;;  %v4232_v26 = vadd.f32 %v4219_v11, %v4176_v20  ;;  %v12950_v8 = vld [vmem:[%s15756_s4 + $0x60] sm:$0xff]   ;;  %v12954_v20 = vld [vmem:[%s15757_s5 + $0x98] sm:$0xff]   ;;  %v12953_v29 = vld [vmem:[%s15756_s4 + $0x28] sm:$0xff]  }
 0x883   :  { %v11959_v24 = vpop.f32.mrf.mxu0  ;;  %v12949_v7 = vld [vmem:[%s15757_s5 + $0xa0] sm:$0xff]   ;;  %v12960_v11 = vld [vmem:[%s15757_s5 + $0x88] sm:$0xff]  }
 0x884   :  { %v14826_v39 = vpack.c.bf16 %v4235_v23, %v4234_v13  ;;  %v4177_v31 = vadd.f32 %v11959_v24, %v14749_v3  ;;  %v4230_v16 = vadd.f32 %v4209_v44, %v4174_v30  ;;  %v4240_v22 = vmax.f32 %v4232_v26, 0.0  ;;  %v12940_v44 = vld [vmem:[%s15756_s4 + $0x48] sm:$0xff]   ;;  %v12951_v9 = vld [vmem:[%s15756_s4 + $0x20] sm:$0xff]   ;;  %v12956_v13 = vld [vmem:[%s15756_s4 + $0x70] sm:$0xff]  }
 0x885   :  { %v4158_v41 = vpop.f32.mrf.mxu0  ;;  %v12955_v23 = vld [vmem:[%s15757_s5 + $0x90] sm:$0xff]   ;;  %v12958_v24 = vld [vmem:[%s15756_s4 + $0x78] sm:$0xff]   ;;  %v12961_v26 = vld [vmem:[%s15757_s5 + $0x80] sm:$0xff]  }
 0x886   :  { %v4233_v28 = vadd.f32 %v4224_v5, %v4177_v31  ;;  %v4175_v32 = vadd.f32 %v4158_v41, %v3720_v14  ;;  %11976 = vmatprep.mubr.bf16.mxu1 %v14826_v39  ;;  %12000 = vmatprep.mubr.bf16.mxu0 %v14826_v39  ;;  %v4238_v0 = vmax.f32 %v4230_v16, 0.0  ;;  %v12957_v30 = vld [vmem:[%s15756_s4 + $0x30] sm:$0xff]   ;;  %v12959_v14 = vld [vmem:[%s15756_s4 + $0x38] sm:$0xff]   ;;  %v12964_v41 = vld [vmem:[%s15757_s5 + $0xe8] sm:$0xff]  }
 0x887   :  { %11977 = vmatmul.mubr.bf16.vlgmr.msra.gmra.mxu1 %v14822_v55  ;;  %12001 = vmatmul.mubr.bf16.vlgmr.msra.gmra.mxu0 %v14822_v55  ;;  %v12962_v31 = vld [vmem:[%s15757_s5 + $0xf8] sm:$0xff]   ;;  %v12963_v5 = vld [vmem:[%s15757_s5 + $0xf0] sm:$0xff]   ;;  %v12965_v16 = vld [vmem:[%s15757_s5 + $0xe0] sm:$0xff]  }
 0x888   :  { %v4241_v53 = vmax.f32 %v4233_v28, 0.0  ;;  %v4231_v61 = vadd.f32 %v4214_v59, %v4175_v32  ;;  %v12946_v59 = vld [vmem:[%s15756_s4 + $0x58] sm:$0xff]   ;;  %v12967_v32 = vld [vmem:[%s15757_s5 + $0xd0] sm:$0xff]  }
 0x889   :  { %v12966_v28 = vld [vmem:[%s15757_s5 + $0xd8] sm:$0xff]  }
 0x88a   :  { %v14833_v2 = vpack.c.bf16 %v4241_v53, %v4240_v22  ;;  %v4239_v3 = vmax.f32 %v4231_v61, 0.0  ;;  %v12968_v22 = vld [vmem:[%s15757_s5 + $0xc8] sm:$0xff]   ;;  %v12969_v53 = vld [vmem:[%s15757_s5 + $0xc0] sm:$0xff]   ;;  %v12970_v61 = vld [vmem:[%s15757_s5 + $0x138] sm:$0xff]  }
 0x88c   :  { %v14835_v34 = vpack.c.bf16 %v4239_v3, %v4238_v0  ;;  %v12971_v0 = vld [vmem:[%s15757_s5 + $0x130] sm:$0xff]   ;;  %v12972_v3 = vld [vmem:[%s15757_s5 + $0x128] sm:$0xff]  }
 0x88e   :  { %11980 = vmatprep.mubr.bf16.mxu1 %v14835_v34  ;;  %12004 = vmatprep.mubr.bf16.mxu0 %v14835_v34 }
 0x88f   :  { %11981 = vmatmul.mubr.bf16.gmra.mxu1 %v14833_v2  ;;  %12005 = vmatmul.mubr.bf16.gmra.mxu0 %v14833_v2 }
 0x890   :  { %12016 = vmatprep.mubr.msk.bf16.mxu1 %vm4586_vm3, %v12938_v17  ;;  %12040 = vmatprep.mubr.msk.bf16.mxu0 %vm4586_vm3, %v12939_v36  ;;  %v12973_v17 = vld [vmem:[%s15757_s5 + $0x120] sm:$0xff]   ;;  %v12974_v36 = vld [vmem:[%s15757_s5 + $0x118] sm:$0xff]  }
 0x947   :  { %v11978_v38 = vpop.f32.mrf.mxu1  ;;  %v12002_v21 = vpop.f32.mrf.mxu0 }
 0x949   :  { %v4344_v42 = vpop.f32.mrf.mxu1  ;;  %v4494_v46 = vpop.f32.mrf.mxu0 }
 0x94b   :  { %v11979_v63 = vpop.f32.mrf.mxu1  ;;  %v12003_v48 = vpop.f32.mrf.mxu0 }
 0x94c   :  { %v4392_v35 = vpack.c.bf16 %v11979_v63, %v11978_v38  ;;  %v4543_v18 = vpack.c.bf16 %v12003_v48, %v12002_v21  ;;  %v12975_v38 = vld [vmem:[%s15757_s5 + $0x110] sm:$0xff]   ;;  %v12976_v21 = vld [vmem:[%s15757_s5 + $0x108] sm:$0xff]  }
 0x94d   :  { %v4347_v49 = vpop.f32.mrf.mxu1  ;;  %v4497_v51 = vpop.f32.mrf.mxu0  ;;  %v12979_v63 = vld [vmem:[%s15757_s5 + $0x170] sm:$0xff]   ;;  %v12980_v48 = vld [vmem:[%s15757_s5 + $0x168] sm:$0xff]  }
 0x94e   :  { %v4391_v50 = vpack.c.bf16 %v4347_v49, %v4344_v42  ;;  %v4542_v4 = vpack.c.bf16 %v4497_v51, %v4494_v46  ;;  %v12977_v42 = vld [vmem:[%s15757_s5 + $0x100] sm:$0xff]   ;;  %v12978_v46 = vld [vmem:[%s15757_s5 + $0x178] sm:$0xff]  }
 0x94f   :  { %v11982_v43 = vpop.f32.mrf.mxu1  ;;  %v12006_v47 = vpop.f32.mrf.mxu0  ;;  %v12981_v49 = vld [vmem:[%s15757_s5 + $0x160] sm:$0xff]   ;;  %v12982_v51 = vld [vmem:[%s15757_s5 + $0x158] sm:$0xff]  }
 0x951   :  { %v4360_v52 = vpop.f32.mrf.mxu1  ;;  %v4510_v27 = vpop.f32.mrf.mxu0 }
 0x953   :  { %v11983_v54 = vpop.f32.mrf.mxu1  ;;  %v12007_v58 = vpop.f32.mrf.mxu0 }
 0x954   :  { %v4394_v62 = vpack.c.bf16 %v11983_v54, %v11982_v43  ;;  %v4545_v45 = vpack.c.bf16 %v12007_v58, %v12006_v47  ;;  %v12983_v43 = vld [vmem:[%s15757_s5 + $0x150] sm:$0xff]   ;;  %v12984_v47 = vld [vmem:[%s15757_s5 + $0x148] sm:$0xff]   ;;  %v13010_v54 = vld [vmem:[%s15756_s4 + $0x80] sm:$0xff]  }
 0x955   :  { %v4363_v60 = vpop.f32.mrf.mxu1  ;;  %v4513_v12 = vpop.f32.mrf.mxu0  ;;  %v12987_v58 = vld [vmem:[%s15757_s5 + $0x1b0] sm:$0xff]  }
 0x956   :  { %v4393_v33 = vpack.c.bf16 %v4363_v60, %v4360_v52  ;;  %v4544_v1 = vpack.c.bf16 %v4513_v12, %v4510_v27  ;;  %12008 = vmatprep.subr.bf16.mxu1 %v4545_v45  ;;  %12032 = vmatprep.subr.bf16.mxu0 %v4394_v62  ;;  %v12985_v52 = vld [vmem:[%s15757_s5 + $0x140] sm:$0xff]   ;;  %v12986_v27 = vld [vmem:[%s15757_s5 + $0x1b8] sm:$0xff]   ;;  %v12991_v12 = vld [vmem:[%s15757_s5 + $0x190] sm:$0xff]  }
 0x957   :  { %12009 = vmatpush3.bf16.msra.mxu1 %v4545_v45  ;;  %12033 = vmatpush3.bf16.msra.mxu0 %v4394_v62  ;;  %v12988_v62 = vld [vmem:[%s15757_s5 + $0x1a8] sm:$0xff]   ;;  %v12989_v45 = vld [vmem:[%s15757_s5 + $0x1a0] sm:$0xff]   ;;  %v12990_v60 = vld [vmem:[%s15757_s5 + $0x198] sm:$0xff]  }
 0x958   :  { %12010 = vmatprep.subr.bf16.mxu1 %v4544_v1  ;;  %12034 = vmatprep.subr.bf16.mxu0 %v4393_v33 }
 0x95b   :  { %12011 = vmatpush3.bf16.msra.mxu1 %v4544_v1  ;;  %12035 = vmatpush3.bf16.msra.mxu0 %v4393_v33  ;;  %v12992_v33 = vld [vmem:[%s15757_s5 + $0x188] sm:$0xff]   ;;  %v12993_v1 = vld [vmem:[%s15757_s5 + $0x180] sm:$0xff]  }
 0x95c   :  { %12012 = vmatprep.subr.bf16.mxu1 %v4543_v18  ;;  %12036 = vmatprep.subr.bf16.mxu0 %v4392_v35 }
 0x95f   :  { %12013 = vmatpush3.bf16.msra.mxu1 %v4543_v18  ;;  %12037 = vmatpush3.bf16.msra.mxu0 %v4392_v35  ;;  %v12994_v35 = vld [vmem:[%s15757_s5 + $0x1f8] sm:$0xff]   ;;  %v12995_v18 = vld [vmem:[%s15757_s5 + $0x1f0] sm:$0xff]  }
 0x960   :  { %12014 = vmatprep.subr.bf16.mxu1 %v4542_v4  ;;  %12038 = vmatprep.subr.bf16.mxu0 %v4391_v50 }
 0x963   :  { %12015 = vmatpush3.bf16.msra.mxu1 %v4542_v4  ;;  %12039 = vmatpush3.bf16.msra.mxu0 %v4391_v50  ;;  %v12996_v50 = vld [vmem:[%s15757_s5 + $0x1e8] sm:$0xff]   ;;  %v12997_v4 = vld [vmem:[%s15757_s5 + $0x1e0] sm:$0xff]  }
 0x964   :  { %12056 = vmatprep.subr.bf16.mxu1 %v12942_v57 }
 0x966   :  { %12017 = vmatmul.mubr.msk.bf16.vlgmr.msra.gmra.mxu1 %vm4586_vm3, %v12940_v44  ;;  %12041 = vmatmul.mubr.msk.bf16.vlgmr.msra.gmra.mxu0 %vm4586_vm3, %v12941_v6  ;;  %v12999_v44 = vld [vmem:[%s15757_s5 + $0x1d0] sm:$0xff]   ;;  %v13000_v6 = vld [vmem:[%s15757_s5 + $0x1c8] sm:$0xff]  }
 0x967   :  { %12057 = vmatpush3.bf16.msra.mxu1 %v12942_v57  ;;  %12020 = vmatprep.mubr.msk.bf16.mxu1 %vm4586_vm3, %v12944_v37  ;;  %v12998_v57 = vld [vmem:[%s15757_s5 + $0x1d8] sm:$0xff]   ;;  %v13001_v37 = vld [vmem:[%s15757_s5 + $0x1c0] sm:$0xff]  }
 0x968   :  { %12058 = vmatprep.subr.bf16.mxu1 %v12943_v56  ;;  %12044 = vmatprep.mubr.msk.bf16.mxu0 %vm4586_vm3, %v12945_v19  ;;  %v13003_v19 = vld [vmem:[%s15757_s5 + $0x230] sm:$0xff]  }
 0x96b   :  { %12059 = vmatpush3.bf16.msra.mxu1 %v12943_v56  ;;  %v13002_v56 = vld [vmem:[%s15757_s5 + $0x238] sm:$0xff]  }
 0x96c   :  { %12060 = vmatprep.subr.bf16.mxu1 %v12948_v40 }
 0x96e   :  { %12021 = vmatmul.mubr.msk.bf16.gmra.mxu1 %vm4586_vm3, %v12946_v59  ;;  %12045 = vmatmul.mubr.msk.bf16.gmra.mxu0 %vm4586_vm3, %v12947_v25 }
 0x96f   :  { %12061 = vmatpush3.bf16.msra.mxu1 %v12948_v40  ;;  %12024 = vmatprep.mubr.msk.bf16.mxu1 %vm4586_vm3, %v12950_v8 }
 0x970   :  { %12062 = vmatprep.subr.bf16.mxu1 %v12949_v7  ;;  %12048 = vmatprep.mubr.msk.bf16.mxu0 %vm4586_vm3, %v12951_v9  ;;  %v13004_v9 = vld [vmem:[%s15757_s5 + $0x228] sm:$0xff]  }
 0x973   :  { %12063 = vmatpush3.bf16.msra.mxu1 %v12949_v7 }
 0x974   :  { %12064 = vmatprep.subr.bf16.mxu1 %v12954_v20 }
 0x976   :  { %12025 = vmatmul.mubr.msk.bf16.gmra.mxu1 %vm4586_vm3, %v12952_v15  ;;  %12049 = vmatmul.mubr.msk.bf16.gmra.mxu0 %vm4586_vm3, %v12953_v29 }
 0x977   :  { %12065 = vmatpush3.bf16.msra.mxu1 %v12954_v20  ;;  %12028 = vmatprep.mubr.msk.bf16.mxu1 %vm4586_vm3, %v12956_v13 }
 0x978   :  { %12066 = vmatprep.subr.bf16.mxu1 %v12955_v23  ;;  %12052 = vmatprep.mubr.msk.bf16.mxu0 %vm4586_vm3, %v12957_v30 }
 0x97b   :  { %12067 = vmatpush3.bf16.msra.mxu1 %v12955_v23 }
 0x97c   :  { %12068 = vmatprep.subr.bf16.mxu1 %v12960_v11 }
 0x97e   :  { %12029 = vmatmul.mubr.msk.bf16.gmra.mxu1 %vm4586_vm3, %v12958_v24  ;;  %12053 = vmatmul.mubr.msk.bf16.gmra.mxu0 %vm4586_vm3, %v12959_v14 }
 0x97f   :  { %12069 = vmatpush3.bf16.msra.mxu1 %v12960_v11  ;;  %12072 = vmatprep.mubr.bf16.mxu1 %v14826_v39  ;;  %v13005_v11 = vld [vmem:[%s15757_s5 + $0x220] sm:$0xff]  }
 0x980   :  { %12070 = vmatprep.subr.bf16.mxu1 %v12961_v26  ;;  %12088 = vmatprep.mubr.msk.bf16.mxu0 %vm4586_vm3, %v13010_v54 }
 0x983   :  { %12071 = vmatpush3.bf16.msra.mxu1 %v12961_v26 }
 0x984   :  { %12104 = vmatprep.subr.bf16.mxu1 %v12962_v31 }
 0x986   :  { %12073 = vmatmul.mubr.bf16.vlgmr.msra.gmra.mxu1 %v14822_v55 }
 0x987   :  { %12076 = vmatprep.mubr.bf16.mxu1 %v14835_v34  ;;  %12105 = vmatpush3.bf16.msra.mxu1 %v12962_v31 }
 0x988   :  { %12106 = vmatprep.subr.bf16.mxu1 %v12963_v5 }
 0x98b   :  { %12107 = vmatpush3.bf16.msra.mxu1 %v12963_v5 }
 0x98c   :  { %12108 = vmatprep.subr.bf16.mxu1 %v12964_v41 }
 0x98e   :  { %12077 = vmatmul.mubr.bf16.gmra.mxu1 %v14833_v2 }
 0x98f   :  { %12109 = vmatpush3.bf16.msra.mxu1 %v12964_v41  ;;  %12120 = vmatprep.mubr.bf16.mxu1 %v14826_v39  ;;  %v13006_v41 = vld [vmem:[%s15757_s5 + $0x218] sm:$0xff]  }
 0x990   :  { %12110 = vmatprep.subr.bf16.mxu1 %v12965_v16 }
 0x993   :  { %12111 = vmatpush3.bf16.msra.mxu1 %v12965_v16 }
 0x994   :  { %12112 = vmatprep.subr.bf16.mxu1 %v12966_v28 }
 0x997   :  { %12113 = vmatpush3.bf16.msra.mxu1 %v12966_v28 }
 0x998   :  { %12114 = vmatprep.subr.bf16.mxu1 %v12967_v32 }
 0x99b   :  { %12115 = vmatpush3.bf16.msra.mxu1 %v12967_v32 }
 0x99c   :  { %12116 = vmatprep.subr.bf16.mxu1 %v12968_v22 }
 0x99f   :  { %12117 = vmatpush3.bf16.msra.mxu1 %v12968_v22 }
 0x9a0   :  { %12118 = vmatprep.subr.bf16.mxu1 %v12969_v53 }
 0x9a3   :  { %12119 = vmatpush3.bf16.msra.mxu1 %v12969_v53 }
 0x9a4   :  { %12152 = vmatprep.subr.bf16.mxu1 %v12970_v61 }
 0x9a6   :  { %12121 = vmatmul.mubr.bf16.vlgmr.msra.gmra.mxu1 %v14822_v55 }
 0x9a7   :  { %12124 = vmatprep.mubr.bf16.mxu1 %v14835_v34  ;;  %12153 = vmatpush3.bf16.msra.mxu1 %v12970_v61 }
 0x9a8   :  { %12154 = vmatprep.subr.bf16.mxu1 %v12971_v0 }
 0x9ab   :  { %12155 = vmatpush3.bf16.msra.mxu1 %v12971_v0 }
 0x9ac   :  { %12156 = vmatprep.subr.bf16.mxu1 %v12972_v3 }
 0x9ae   :  { %12125 = vmatmul.mubr.bf16.gmra.mxu1 %v14833_v2 }
 0x9af   :  { %12157 = vmatpush3.bf16.msra.mxu1 %v12972_v3  ;;  %12168 = vmatprep.mubr.bf16.mxu1 %v14826_v39 }
 0x9b0   :  { %12158 = vmatprep.subr.bf16.mxu1 %v12973_v17 }
 0x9b3   :  { %12159 = vmatpush3.bf16.msra.mxu1 %v12973_v17 }
 0x9b4   :  { %12160 = vmatprep.subr.bf16.mxu1 %v12974_v36 }
 0x9b7   :  { %12161 = vmatpush3.bf16.msra.mxu1 %v12974_v36 }
 0x9b8   :  { %12162 = vmatprep.subr.bf16.mxu1 %v12975_v38 }
 0x9bb   :  { %12163 = vmatpush3.bf16.msra.mxu1 %v12975_v38 }
 0x9bc   :  { %12164 = vmatprep.subr.bf16.mxu1 %v12976_v21 }
 0x9bf   :  { %12165 = vmatpush3.bf16.msra.mxu1 %v12976_v21  ;;  %v13008_v21 = vld [vmem:[%s15757_s5 + $0x208] sm:$0xff]  }
 0x9c0   :  { %12166 = vmatprep.subr.bf16.mxu1 %v12977_v42 }
 0x9c3   :  { %12167 = vmatpush3.bf16.msra.mxu1 %v12977_v42 }
 0x9c4   :  { %12200 = vmatprep.subr.bf16.mxu1 %v12978_v46 }
 0x9c6   :  { %12169 = vmatmul.mubr.bf16.vlgmr.msra.gmra.mxu1 %v14822_v55 }
 0x9c7   :  { %12172 = vmatprep.mubr.bf16.mxu1 %v14835_v34  ;;  %12201 = vmatpush3.bf16.msra.mxu1 %v12978_v46 }
 0x9c8   :  { %12202 = vmatprep.subr.bf16.mxu1 %v12979_v63 }
 0x9cb   :  { %12203 = vmatpush3.bf16.msra.mxu1 %v12979_v63 }
 0x9cc   :  { %12204 = vmatprep.subr.bf16.mxu1 %v12980_v48 }
 0x9ce   :  { %12173 = vmatmul.mubr.bf16.gmra.mxu1 %v14833_v2 }
 0x9cf   :  { %12205 = vmatpush3.bf16.msra.mxu1 %v12980_v48  ;;  %12216 = vmatprep.mubr.bf16.mxu1 %v14826_v39 }
 0x9d0   :  { %12206 = vmatprep.subr.bf16.mxu1 %v12981_v49 }
 0x9d3   :  { %12207 = vmatpush3.bf16.msra.mxu1 %v12981_v49 }
 0x9d4   :  { %12208 = vmatprep.subr.bf16.mxu1 %v12982_v51 }
 0x9d7   :  { %12209 = vmatpush3.bf16.msra.mxu1 %v12982_v51 }
 0x9d8   :  { %12210 = vmatprep.subr.bf16.mxu1 %v12983_v43 }
 0x9db   :  { %12211 = vmatpush3.bf16.msra.mxu1 %v12983_v43  ;;  %v13009_v43 = vld [vmem:[%s15757_s5 + $0x200] sm:$0xff]  }
 0x9dc   :  { %12212 = vmatprep.subr.bf16.mxu1 %v12984_v47 }
 0x9df   :  { %12213 = vmatpush3.bf16.msra.mxu1 %v12984_v47 }
 0x9e0   :  { %12214 = vmatprep.subr.bf16.mxu1 %v12985_v52 }
 0x9e3   :  { %12215 = vmatpush3.bf16.msra.mxu1 %v12985_v52 }
 0x9e4   :  { %12248 = vmatprep.subr.bf16.mxu1 %v12986_v27 }
 0x9e6   :  { %12217 = vmatmul.mubr.bf16.vlgmr.msra.gmra.mxu1 %v14822_v55 }
 0x9e7   :  { %12220 = vmatprep.mubr.bf16.mxu1 %v14835_v34  ;;  %12249 = vmatpush3.bf16.msra.mxu1 %v12986_v27 }
 0x9e8   :  { %12250 = vmatprep.subr.bf16.mxu1 %v12987_v58 }
 0x9eb   :  { %12251 = vmatpush3.bf16.msra.mxu1 %v12987_v58 }
 0x9ec   :  { %12252 = vmatprep.subr.bf16.mxu1 %v12988_v62 }
 0x9ee   :  { %12221 = vmatmul.mubr.bf16.gmra.mxu1 %v14833_v2 }
 0x9ef   :  { %12253 = vmatpush3.bf16.msra.mxu1 %v12988_v62  ;;  %12264 = vmatprep.mubr.bf16.mxu1 %v14826_v39 }
 0x9f0   :  { %12254 = vmatprep.subr.bf16.mxu1 %v12989_v45 }
 0x9f3   :  { %12255 = vmatpush3.bf16.msra.mxu1 %v12989_v45 }
 0x9f4   :  { %12256 = vmatprep.subr.bf16.mxu1 %v12990_v60 }
 0x9f7   :  { %12257 = vmatpush3.bf16.msra.mxu1 %v12990_v60 }
 0x9f8   :  { %12258 = vmatprep.subr.bf16.mxu1 %v12991_v12 }
 0x9fb   :  { %12259 = vmatpush3.bf16.msra.mxu1 %v12991_v12 }
 0x9fc   :  { %12260 = vmatprep.subr.bf16.mxu1 %v12992_v33 }
 0x9ff   :  { %12261 = vmatpush3.bf16.msra.mxu1 %v12992_v33 }
 0xa00   :  { %12262 = vmatprep.subr.bf16.mxu1 %v12993_v1 }
 0xa03   :  { %12263 = vmatpush3.bf16.msra.mxu1 %v12993_v1 }
 0xa04   :  { %12296 = vmatprep.subr.bf16.mxu1 %v12994_v35 }
 0xa06   :  { %12265 = vmatmul.mubr.bf16.vlgmr.msra.gmra.mxu1 %v14822_v55 }
 0xa07   :  { %12268 = vmatprep.mubr.bf16.mxu1 %v14835_v34  ;;  %12297 = vmatpush3.bf16.msra.mxu1 %v12994_v35 }
 0xa08   :  { %12298 = vmatprep.subr.bf16.mxu1 %v12995_v18 }
 0xa0b   :  { %12299 = vmatpush3.bf16.msra.mxu1 %v12995_v18 }
 0xa0c   :  { %12300 = vmatprep.subr.bf16.mxu1 %v12996_v50 }
 0xa0e   :  { %12269 = vmatmul.mubr.bf16.gmra.mxu1 %v14833_v2 }
 0xa0f   :  { %12301 = vmatpush3.bf16.msra.mxu1 %v12996_v50  ;;  %12312 = vmatprep.mubr.bf16.mxu1 %v14826_v39 }
 0xa10   :  { %12302 = vmatprep.subr.bf16.mxu1 %v12997_v4 }
 0xa13   :  { %12303 = vmatpush3.bf16.msra.mxu1 %v12997_v4 }
 0xa14   :  { %12304 = vmatprep.subr.bf16.mxu1 %v12998_v57 }
 0xa17   :  { %12305 = vmatpush3.bf16.msra.mxu1 %v12998_v57 }
 0xa18   :  { %12306 = vmatprep.subr.bf16.mxu1 %v12999_v44 }
 0xa1b   :  { %12307 = vmatpush3.bf16.msra.mxu1 %v12999_v44 }
 0xa1c   :  { %12308 = vmatprep.subr.bf16.mxu1 %v13000_v6 }
 0xa1f   :  { %12309 = vmatpush3.bf16.msra.mxu1 %v13000_v6 }
 0xa20   :  { %12310 = vmatprep.subr.bf16.mxu1 %v13001_v37 }
 0xa23   :  { %12311 = vmatpush3.bf16.msra.mxu1 %v13001_v37 }
 0xa24   :  { %12344 = vmatprep.subr.bf16.mxu1 %v13002_v56 }
 0xa26   :  { %v12018_v40 = vpop.f32.mrf.mxu1  ;;  %v12042_v59 = vpop.f32.mrf.mxu0  ;;  %12313 = vmatmul.mubr.bf16.vlgmr.msra.gmra.mxu1 %v14822_v55 }
 0xa27   :  { %v15081_v25 = vadd.f32 %v12042_v59, %v12018_v40  ;;  %12316 = vmatprep.mubr.bf16.mxu1 %v14835_v34  ;;  %12345 = vmatpush3.bf16.msra.mxu1 %v13002_v56 }
 0xa28   :  { %v4645_v8 = vpop.f32.mrf.mxu1  ;;  %v4806_v7 = vpop.f32.mrf.mxu0  ;;  %12346 = vmatprep.subr.bf16.mxu1 %v13003_v19 }
 0xa29   :  { %v15087_v20 = vadd.f32 %v4806_v7, %v4645_v8  ;;  %v13013_v8 = vld [vmem:[%s15756_s4 + $0x98] sm:$0xff]  }
 0xa2a   :  { %v12019_v15 = vpop.f32.mrf.mxu1  ;;  %v12043_v29 = vpop.f32.mrf.mxu0 }
 0xa2b   :  { %v15089_v13 = vadd.f32 %v12043_v29, %v12019_v15  ;;  %12347 = vmatpush3.bf16.msra.mxu1 %v13003_v19 }
 0xa2c   :  { %v15091_v23 = vpop.f32.mrf.mxu1  ;;  %v15093_v30 = vpop.f32.mrf.mxu0  ;;  %12348 = vmatprep.subr.bf16.mxu1 %v13004_v9 }
 0xa2e   :  { %v12022_v24 = vpop.f32.mrf.mxu1  ;;  %v12046_v14 = vpop.f32.mrf.mxu0  ;;  %12317 = vmatmul.mubr.bf16.gmra.mxu1 %v14833_v2 }
 0xa2f   :  { %v15099_v26 = vadd.f32 %v12046_v14, %v12022_v24  ;;  %12349 = vmatpush3.bf16.msra.mxu1 %v13004_v9  ;;  %12360 = vmatprep.mubr.bf16.mxu1 %v14826_v39  ;;  %v13007_v39 = vld [vmem:[%s15757_s5 + $0x210] sm:$0xff]   ;;  %v13014_v9 = vld [vmem:[%s15756_s4 + $0xa0] sm:$0xff]   ;;  %v13015_v24 = vld [vmem:[%s15756_s4 + $0xa8] sm:$0xff]  }
 0xa30   :  { %v4661_v31 = vpop.f32.mrf.mxu1  ;;  %v4822_v5 = vpop.f32.mrf.mxu0  ;;  %12350 = vmatprep.subr.bf16.mxu1 %v13005_v11 }
 0xa31   :  { %v15105_v16 = vadd.f32 %v4822_v5, %v4661_v31  ;;  %v13016_v31 = vld [vmem:[%s15756_s4 + $0xb0] sm:$0xff]  }
 0xa32   :  { %v12023_v28 = vpop.f32.mrf.mxu1  ;;  %v12047_v32 = vpop.f32.mrf.mxu0 }
 0xa33   :  { %v15107_v22 = vadd.f32 %v12047_v32, %v12023_v28  ;;  %12351 = vmatpush3.bf16.msra.mxu1 %v13005_v11 }
 0xa34   :  { %v15109_v53 = vpop.f32.mrf.mxu1  ;;  %v15111_v61 = vpop.f32.mrf.mxu0  ;;  %12352 = vmatprep.subr.bf16.mxu1 %v13006_v41 }
 0xa36   :  { %v12026_v0 = vpop.f32.mrf.mxu1  ;;  %v12050_v3 = vpop.f32.mrf.mxu0 }
 0xa37   :  { %v15116_v17 = vadd.f32 %v12050_v3, %v12026_v0  ;;  %12353 = vmatpush3.bf16.msra.mxu1 %v13006_v41  ;;  %v13018_v0 = vld [vmem:[%s15756_s4 + $0xc0] sm:$0xff]  }
 0xa38   :  { %v4677_v36 = vpop.f32.mrf.mxu1  ;;  %v4838_v38 = vpop.f32.mrf.mxu0  ;;  %12354 = vmatprep.subr.bf16.mxu1 %v13007_v39 }
 0xa39   :  { %v15121_v42 = vadd.f32 %v4838_v38, %v4677_v36  ;;  %v13019_v36 = vld [vmem:[%s15756_s4 + $0xc8] sm:$0xff]   ;;  %v13020_v38 = vld [vmem:[%s15756_s4 + $0xd0] sm:$0xff]  }
 0xa3a   :  { %v12027_v46 = vpop.f32.mrf.mxu1  ;;  %v12051_v63 = vpop.f32.mrf.mxu0 }
 0xa3b   :  { %v15123_v48 = vadd.f32 %v12051_v63, %v12027_v46  ;;  %12355 = vmatpush3.bf16.msra.mxu1 %v13007_v39  ;;  %v13017_v39 = vld [vmem:[%s15756_s4 + $0xb8] sm:$0xff]  }
 0xa3c   :  { %v15125_v49 = vpop.f32.mrf.mxu1  ;;  %v15127_v51 = vpop.f32.mrf.mxu0  ;;  %12356 = vmatprep.subr.bf16.mxu1 %v13008_v21  ;;  %v13021_v63 = vld [vmem:[%s15756_s4 + $0xd8] sm:$0xff]  }
 0xa3e   :  { %v12030_v47 = vpop.f32.mrf.mxu1  ;;  %v12054_v52 = vpop.f32.mrf.mxu0 }
 0xa3f   :  { %v15132_v27 = vadd.f32 %v12054_v52, %v12030_v47  ;;  %12357 = vmatpush3.bf16.msra.mxu1 %v13008_v21  ;;  %v13022_v47 = vld [vmem:[%s15756_s4 + $0xe0] sm:$0xff]  }
 0xa40   :  { %v4693_v54 = vpop.f32.mrf.mxu1  ;;  %v4854_v58 = vpop.f32.mrf.mxu0  ;;  %12358 = vmatprep.subr.bf16.mxu1 %v13009_v43 }
 0xa41   :  { %v15134_v62 = vadd.f32 %v4854_v58, %v4693_v54 }
 0xa42   :  { %v12031_v45 = vpop.f32.mrf.mxu1  ;;  %v12055_v60 = vpop.f32.mrf.mxu0 }
 0xa43   :  { %v15136_v12 = vadd.f32 %v12055_v60, %v12031_v45  ;;  %12359 = vmatpush3.bf16.msra.mxu1 %v13009_v43  ;;  %v13023_v45 = vld [vmem:[%s15756_s4 + $0xe8] sm:$0xff]  }
 0xa44   :  { %v15138_v33 = vpop.f32.mrf.mxu1 }
 0xa46   :  { %v12074_v1 = vpop.f32.mrf.mxu1  ;;  %12361 = vmatmul.mubr.bf16.vlgmr.msra.gmra.mxu1 %v14822_v55 }
 0xa47   :  { %12364 = vmatprep.mubr.bf16.mxu1 %v14835_v34  ;;  %v13011_v34 = vld [vmem:[%s15756_s4 + $0x88] sm:$0xff]  }
 0xa48   :  { %v4968_v35 = vpop.f32.mrf.mxu1 }
 0xa4a   :  { %v12075_v18 = vpop.f32.mrf.mxu1 }
 0xa4b   :  { %v5017_v19 = vpack.c.bf16 %v12075_v18, %v12074_v1  ;;  %v13024_v1 = vld [vmem:[%s15756_s4 + $0xf0] sm:$0xff]  }
 0xa4c   :  { %v4971_v50 = vpop.f32.mrf.mxu1 }
 0xa4d   :  { %v5016_v55 = vpack.c.bf16 %v4971_v50, %v4968_v35 }
 0xa4e   :  { %v12078_v4 = vpop.f32.mrf.mxu1  ;;  %12365 = vmatmul.mubr.bf16.gmra.mxu1 %v14833_v2  ;;  %v13012_v2 = vld [vmem:[%s15756_s4 + $0x90] sm:$0xff]  }
 0xa50   :  { %v4984_v57 = vpop.f32.mrf.mxu1 }
 0xa52   :  { %v12079_v44 = vpop.f32.mrf.mxu1 }
 0xa53   :  { %v5019_v6 = vpack.c.bf16 %v12079_v44, %v12078_v4  ;;  %v13026_v44 = vld [vmem:[%s15756_s4 + $0x100] sm:$0xff]  }
 0xa54   :  { %v4987_v37 = vpop.f32.mrf.mxu1 }
 0xa55   :  { %v5018_v56 = vpack.c.bf16 %v4987_v37, %v4984_v57  ;;  %12080 = vmatprep.subr.bf16.mxu0 %v5019_v6  ;;  %v13025_v57 = vld [vmem:[%s15756_s4 + $0xf8] sm:$0xff]   ;;  %v13027_v37 = vld [vmem:[%s15756_s4 + $0x108] sm:$0xff]  }
 0xa56   :  { %12081 = vmatpush3.bf16.msra.mxu0 %v5019_v6 }
 0xa57   :  { %12082 = vmatprep.subr.bf16.mxu0 %v5018_v56 }
 0xa5a   :  { %12083 = vmatpush3.bf16.msra.mxu0 %v5018_v56  ;;  %v13028_v56 = vld [vmem:[%s15756_s4 + $0x110] sm:$0xff]  }
 0xa5b   :  { %12084 = vmatprep.subr.bf16.mxu0 %v5017_v19 }
 0xa5e   :  { %12085 = vmatpush3.bf16.msra.mxu0 %v5017_v19 }
 0xa5f   :  { %12086 = vmatprep.subr.bf16.mxu0 %v5016_v55 }
 0xa62   :  { %12087 = vmatpush3.bf16.msra.mxu0 %v5016_v55 }
 0xa65   :  { %12089 = vmatmul.mubr.msk.bf16.vlgmr.msra.gmra.mxu0 %vm4586_vm3, %v13011_v34  ;;  %v13029_v34 = vld [vmem:[%s15756_s4 + $0x118] sm:$0xff]  }
 0xa66   :  { %v12122_v40 = vpop.f32.mrf.mxu1  ;;  %12092 = vmatprep.mubr.msk.bf16.mxu0 %vm4586_vm3, %v13012_v2 }
 0xa68   :  { %v5296_v59 = vpop.f32.mrf.mxu1 }
 0xa6a   :  { %v12123_v7 = vpop.f32.mrf.mxu1 }
 0xa6b   :  { %v5345_v32 = vpack.c.bf16 %v12123_v7, %v12122_v40  ;;  %v13030_v40 = vld [vmem:[%s15756_s4 + $0x120] sm:$0xff]  }
 0xa6c   :  { %v5299_v15 = vpop.f32.mrf.mxu1 }
 0xa6d   :  { %12093 = vmatmul.mubr.msk.bf16.gmra.mxu0 %vm4586_vm3, %v13013_v8  ;;  %v5344_v3 = vpack.c.bf16 %v5299_v15, %v5296_v59 }
 0xa6e   :  { %v12126_v29 = vpop.f32.mrf.mxu1  ;;  %12096 = vmatprep.mubr.msk.bf16.mxu0 %vm4586_vm3, %v13014_v9  ;;  %v13031_v9 = vld [vmem:[%s15756_s4 + $0x128] sm:$0xff]  }
 0xa70   :  { %v5312_v11 = vpop.f32.mrf.mxu1 }
 0xa72   :  { %v12127_v14 = vpop.f32.mrf.mxu1 }
 0xa73   :  { %v5347_v5 = vpack.c.bf16 %v12127_v14, %v12126_v29  ;;  %v13032_v29 = vld [vmem:[%s15756_s4 + $0x130] sm:$0xff]  }
 0xa74   :  { %v5315_v41 = vpop.f32.mrf.mxu1 }
 0xa75   :  { %v5346_v28 = vpack.c.bf16 %v5315_v41, %v5312_v11  ;;  %12097 = vmatmul.mubr.msk.bf16.gmra.mxu0 %vm4586_vm3, %v13015_v24  ;;  %12128 = vmatprep.subr.bf16.mxu0 %v5347_v5  ;;  %v13034_v41 = vld [vmem:[%s15756_s4 + $0x140] sm:$0xff]  }
 0xa76   :  { %12129 = vmatpush3.bf16.msra.mxu0 %v5347_v5  ;;  %12100 = vmatprep.mubr.msk.bf16.mxu0 %vm4586_vm3, %v13016_v31  ;;  %v13033_v5 = vld [vmem:[%s15756_s4 + $0x138] sm:$0xff]  }
 0xa77   :  { %12130 = vmatprep.subr.bf16.mxu0 %v5346_v28 }
 0xa7a   :  { %12131 = vmatpush3.bf16.msra.mxu0 %v5346_v28 }
 0xa7b   :  { %12132 = vmatprep.subr.bf16.mxu0 %v5345_v32 }
 0xa7d   :  { %12101 = vmatmul.mubr.msk.bf16.gmra.mxu0 %vm4586_vm3, %v13017_v39  ;;  %v13036_v39 = vld [vmem:[%s15756_s4 + $0x150] sm:$0xff]  }
 0xa7e   :  { %12133 = vmatpush3.bf16.msra.mxu0 %v5345_v32  ;;  %12136 = vmatprep.mubr.msk.bf16.mxu0 %vm4586_vm3, %v13018_v0  ;;  %v13035_v32 = vld [vmem:[%s15756_s4 + $0x148] sm:$0xff]  }
 0xa7f   :  { %12134 = vmatprep.subr.bf16.mxu0 %v5344_v3 }
 0xa82   :  { %12135 = vmatpush3.bf16.msra.mxu0 %v5344_v3 }
 0xa85   :  { %12137 = vmatmul.mubr.msk.bf16.vlgmr.msra.gmra.mxu0 %vm4586_vm3, %v13019_v36  ;;  %v13037_v36 = vld [vmem:[%s15756_s4 + $0x158] sm:$0xff]  }
 0xa86   :  { %v12170_v21 = vpop.f32.mrf.mxu1  ;;  %12140 = vmatprep.mubr.msk.bf16.mxu0 %vm4586_vm3, %v13020_v38 }
 0xa88   :  { %v5624_v46 = vpop.f32.mrf.mxu1 }
 0xa8a   :  { %v12171_v43 = vpop.f32.mrf.mxu1 }
 0xa8b   :  { %v5673_v4 = vpack.c.bf16 %v12171_v43, %v12170_v21  ;;  %v13038_v21 = vld [vmem:[%s15756_s4 + $0x160] sm:$0xff]  }
 0xa8c   :  { %v5627_v52 = vpop.f32.mrf.mxu1 }
 0xa8d   :  { %12141 = vmatmul.mubr.msk.bf16.gmra.mxu0 %vm4586_vm3, %v13021_v63  ;;  %v5672_v6 = vpack.c.bf16 %v5627_v52, %v5624_v46 }
 0xa8e   :  { %v12174_v54 = vpop.f32.mrf.mxu1  ;;  %12144 = vmatprep.mubr.msk.bf16.mxu0 %vm4586_vm3, %v13022_v47  ;;  %v13039_v47 = vld [vmem:[%s15756_s4 + $0x168] sm:$0xff]  }
 0xa90   :  { %v5640_v58 = vpop.f32.mrf.mxu1 }
 0xa92   :  { %v12175_v60 = vpop.f32.mrf.mxu1 }
 0xa93   :  { %v5675_v35 = vpack.c.bf16 %v12175_v60, %v12174_v54  ;;  %v13040_v54 = vld [vmem:[%s15756_s4 + $0x170] sm:$0xff]  }
 0xa94   :  { %v5643_v18 = vpop.f32.mrf.mxu1 }
 0xa95   :  { %v5674_v50 = vpack.c.bf16 %v5643_v18, %v5640_v58  ;;  %12145 = vmatmul.mubr.msk.bf16.gmra.mxu0 %vm4586_vm3, %v13023_v45  ;;  %12176 = vmatprep.subr.bf16.mxu0 %v5675_v35  ;;  %v13042_v18 = vld [vmem:[%s15756_s4 + $0x180] sm:$0xff]  }
 0xa96   :  { %12177 = vmatpush3.bf16.msra.mxu0 %v5675_v35  ;;  %12148 = vmatprep.mubr.msk.bf16.mxu0 %vm4586_vm3, %v13024_v1  ;;  %v13041_v35 = vld [vmem:[%s15756_s4 + $0x178] sm:$0xff]  }
 0xa97   :  { %12178 = vmatprep.subr.bf16.mxu0 %v5674_v50 }
 0xa9a   :  { %12179 = vmatpush3.bf16.msra.mxu0 %v5674_v50 }
 0xa9b   :  { %12180 = vmatprep.subr.bf16.mxu0 %v5673_v4 }
 0xa9d   :  { %12149 = vmatmul.mubr.msk.bf16.gmra.mxu0 %vm4586_vm3, %v13025_v57  ;;  %v13044_v57 = vld [vmem:[%s15756_s4 + $0x190] sm:$0xff]  }
 0xa9e   :  { %12181 = vmatpush3.bf16.msra.mxu0 %v5673_v4  ;;  %12184 = vmatprep.mubr.msk.bf16.mxu0 %vm4586_vm3, %v13026_v44  ;;  %v13043_v4 = vld [vmem:[%s15756_s4 + $0x188] sm:$0xff]  }
 0xa9f   :  { %12182 = vmatprep.subr.bf16.mxu0 %v5672_v6 }
 0xaa2   :  { %12183 = vmatpush3.bf16.msra.mxu0 %v5672_v6 }
 0xaa5   :  { %12185 = vmatmul.mubr.msk.bf16.vlgmr.msra.gmra.mxu0 %vm4586_vm3, %v13027_v37  ;;  %v13045_v37 = vld [vmem:[%s15756_s4 + $0x198] sm:$0xff]  }
 0xaa6   :  { %v12218_v19 = vpop.f32.mrf.mxu1  ;;  %12188 = vmatprep.mubr.msk.bf16.mxu0 %vm4586_vm3, %v13028_v56 }
 0xaa8   :  { %v5952_v55 = vpop.f32.mrf.mxu1 }
 0xaaa   :  { %v12219_v2 = vpop.f32.mrf.mxu1 }
 0xaab   :  { %v6001_v31 = vpack.c.bf16 %v12219_v2, %v12218_v19  ;;  %v13046_v19 = vld [vmem:[%s15756_s4 + $0x1a0] sm:$0xff]  }
 0xaac   :  { %v5955_v59 = vpop.f32.mrf.mxu1 }
 0xaad   :  { %12189 = vmatmul.mubr.msk.bf16.gmra.mxu0 %vm4586_vm3, %v13029_v34  ;;  %v6000_v28 = vpack.c.bf16 %v5955_v59, %v5952_v55 }
 0xaae   :  { %v12222_v8 = vpop.f32.mrf.mxu1  ;;  %12192 = vmatprep.mubr.msk.bf16.mxu0 %vm4586_vm3, %v13030_v40  ;;  %v13047_v40 = vld [vmem:[%s15756_s4 + $0x1a8] sm:$0xff]  }
 0xab0   :  { %v5968_v7 = vpop.f32.mrf.mxu1 }
 0xab2   :  { %v12223_v15 = vpop.f32.mrf.mxu1 }
 0xab3   :  { %v6003_v11 = vpack.c.bf16 %v12223_v15, %v12222_v8  ;;  %v13048_v8 = vld [vmem:[%s15756_s4 + $0x1b0] sm:$0xff]  }
 0xab4   :  { %v5971_v24 = vpop.f32.mrf.mxu1 }
 0xab5   :  { %v6002_v14 = vpack.c.bf16 %v5971_v24, %v5968_v7  ;;  %12193 = vmatmul.mubr.msk.bf16.gmra.mxu0 %vm4586_vm3, %v13031_v9  ;;  %12224 = vmatprep.subr.bf16.mxu0 %v6003_v11  ;;  %v13050_v24 = vld [vmem:[%s15756_s4 + $0x1c0] sm:$0xff]  }
 0xab6   :  { %12225 = vmatpush3.bf16.msra.mxu0 %v6003_v11  ;;  %12196 = vmatprep.mubr.msk.bf16.mxu0 %vm4586_vm3, %v13032_v29  ;;  %v13049_v11 = vld [vmem:[%s15756_s4 + $0x1b8] sm:$0xff]  }
 0xab7   :  { %12226 = vmatprep.subr.bf16.mxu0 %v6002_v14 }
 0xaba   :  { %12227 = vmatpush3.bf16.msra.mxu0 %v6002_v14 }
 0xabb   :  { %12228 = vmatprep.subr.bf16.mxu0 %v6001_v31 }
 0xabd   :  { %12197 = vmatmul.mubr.msk.bf16.gmra.mxu0 %vm4586_vm3, %v13033_v5  ;;  %v13052_v5 = vld [vmem:[%s15756_s4 + $0x1d0] sm:$0xff]  }
 0xabe   :  { %12229 = vmatpush3.bf16.msra.mxu0 %v6001_v31  ;;  %12232 = vmatprep.mubr.msk.bf16.mxu0 %vm4586_vm3, %v13034_v41  ;;  %v13051_v31 = vld [vmem:[%s15756_s4 + $0x1c8] sm:$0xff]  }
 0xabf   :  { %12230 = vmatprep.subr.bf16.mxu0 %v6000_v28 }
 0xac2   :  { %12231 = vmatpush3.bf16.msra.mxu0 %v6000_v28 }
 0xac5   :  { %12233 = vmatmul.mubr.msk.bf16.vlgmr.msra.gmra.mxu0 %vm4586_vm3, %v13035_v32  ;;  %v13053_v32 = vld [vmem:[%s15756_s4 + $0x1d8] sm:$0xff]  }
 0xac6   :  { %v12266_v0 = vpop.f32.mrf.mxu1  ;;  %12236 = vmatprep.mubr.msk.bf16.mxu0 %vm4586_vm3, %v13036_v39 }
 0xac8   :  { %v6280_v3 = vpop.f32.mrf.mxu1 }
 0xaca   :  { %v12267_v38 = vpop.f32.mrf.mxu1 }
 0xacb   :  { %v6329_v1 = vpack.c.bf16 %v12267_v38, %v12266_v0  ;;  %v13054_v0 = vld [vmem:[%s15756_s4 + $0x1e0] sm:$0xff]  }
 0xacc   :  { %v6283_v46 = vpop.f32.mrf.mxu1 }
 0xacd   :  { %12237 = vmatmul.mubr.msk.bf16.gmra.mxu0 %vm4586_vm3, %v13037_v36  ;;  %v6328_v50 = vpack.c.bf16 %v6283_v46, %v6280_v3 }
 0xace   :  { %v12270_v63 = vpop.f32.mrf.mxu1  ;;  %12240 = vmatprep.mubr.msk.bf16.mxu0 %vm4586_vm3, %v13038_v21  ;;  %v13055_v21 = vld [vmem:[%s15756_s4 + $0x1e8] sm:$0xff]  }
 0xad0   :  { %v6296_v43 = vpop.f32.mrf.mxu1 }
 0xad2   :  { %v12271_v52 = vpop.f32.mrf.mxu1 }
 0xad3   :  { %v6331_v58 = vpack.c.bf16 %v12271_v52, %v12270_v63  ;;  %v13056_v63 = vld [vmem:[%s15756_s4 + $0x1f0] sm:$0xff]  }
 0xad4   :  { %v6299_v45 = vpop.f32.mrf.mxu1 }
 0xad5   :  { %v6330_v60 = vpack.c.bf16 %v6299_v45, %v6296_v43  ;;  %12241 = vmatmul.mubr.msk.bf16.gmra.mxu0 %vm4586_vm3, %v13039_v47  ;;  %12272 = vmatprep.subr.bf16.mxu0 %v6331_v58  ;;  %v13058_v45 = vld [vmem:[%s15756_s4 + $0x200] sm:$0xff]  }
 0xad6   :  { %12273 = vmatpush3.bf16.msra.mxu0 %v6331_v58  ;;  %12244 = vmatprep.mubr.msk.bf16.mxu0 %vm4586_vm3, %v13040_v54  ;;  %v13057_v58 = vld [vmem:[%s15756_s4 + $0x1f8] sm:$0xff]  }
 0xad7   :  { %12274 = vmatprep.subr.bf16.mxu0 %v6330_v60 }
 0xada   :  { %12275 = vmatpush3.bf16.msra.mxu0 %v6330_v60 }
 0xadb   :  { %12276 = vmatprep.subr.bf16.mxu0 %v6329_v1 }
 0xadd   :  { %12245 = vmatmul.mubr.msk.bf16.gmra.mxu0 %vm4586_vm3, %v13041_v35  ;;  %v13060_v35 = vld [vmem:[%s15756_s4 + $0x210] sm:$0xff]  }
 0xade   :  { %12277 = vmatpush3.bf16.msra.mxu0 %v6329_v1  ;;  %12280 = vmatprep.mubr.msk.bf16.mxu0 %vm4586_vm3, %v13042_v18  ;;  %v13059_v1 = vld [vmem:[%s15756_s4 + $0x208] sm:$0xff]   ;;  %v15341_v18 = vpop.f32.mrf.mxu0 }
 0xadf   :  { %12278 = vmatprep.subr.bf16.mxu0 %v6328_v50 }
 0xae2   :  { %12279 = vmatpush3.bf16.msra.mxu0 %v6328_v50 }
 0xae5   :  { %12281 = vmatmul.mubr.msk.bf16.vlgmr.msra.gmra.mxu0 %vm4586_vm3, %v13043_v4 }
 0xae6   :  { %v12314_v44 = vpop.f32.mrf.mxu1  ;;  %12284 = vmatprep.mubr.msk.bf16.mxu0 %vm4586_vm3, %v13044_v57 }
 0xae8   :  { %v6608_v6 = vpop.f32.mrf.mxu1 }
 0xaea   :  { %v12315_v56 = vpop.f32.mrf.mxu1 }
 0xaeb   :  { %v6657_v29 = vpack.c.bf16 %v12315_v56, %v12314_v44 }
 0xaec   :  { %v6611_v55 = vpop.f32.mrf.mxu1 }
 0xaed   :  { %12285 = vmatmul.mubr.msk.bf16.gmra.mxu0 %vm4586_vm3, %v13045_v37  ;;  %v6656_v14 = vpack.c.bf16 %v6611_v55, %v6608_v6  ;;  %v13061_v37 = vld [vmem:[%s15756_s4 + $0x218] sm:$0xff]  }
 0xaee   :  { %v12318_v34 = vpop.f32.mrf.mxu1  ;;  %12288 = vmatprep.mubr.msk.bf16.mxu0 %vm4586_vm3, %v13046_v19  ;;  %v13062_v19 = vld [vmem:[%s15756_s4 + $0x220] sm:$0xff]  }
 0xaf0   :  { %v6624_v2 = vpop.f32.mrf.mxu1 }
 0xaf2   :  { %v12319_v59 = vpop.f32.mrf.mxu1 }
 0xaf3   :  { %v6659_v7 = vpack.c.bf16 %v12319_v59, %v12318_v34 }
 0xaf4   :  { %v6627_v9 = vpop.f32.mrf.mxu1 }
 0xaf5   :  { %v6658_v15 = vpack.c.bf16 %v6627_v9, %v6624_v2  ;;  %12289 = vmatmul.mubr.msk.bf16.gmra.mxu0 %vm4586_vm3, %v13047_v40  ;;  %12320 = vmatprep.subr.bf16.mxu0 %v6659_v7 }
 0xaf6   :  { %12321 = vmatpush3.bf16.msra.mxu0 %v6659_v7  ;;  %12292 = vmatprep.mubr.msk.bf16.mxu0 %vm4586_vm3, %v13048_v8  ;;  %v13064_v8 = vld [vmem:[%s15756_s4 + $0x230] sm:$0xff]  }
 0xaf7   :  { %12322 = vmatprep.subr.bf16.mxu0 %v6658_v15 }
 0xafa   :  { %12323 = vmatpush3.bf16.msra.mxu0 %v6658_v15 }
 0xafb   :  { %12324 = vmatprep.subr.bf16.mxu0 %v6657_v29 }
 0xafd   :  { %12293 = vmatmul.mubr.msk.bf16.gmra.mxu0 %vm4586_vm3, %v13049_v11 }
 0xafe   :  { %12325 = vmatpush3.bf16.msra.mxu0 %v6657_v29  ;;  %12328 = vmatprep.mubr.msk.bf16.mxu0 %vm4586_vm3, %v13050_v24 }
 0xaff   :  { %12326 = vmatprep.subr.bf16.mxu0 %v6656_v14 }
 0xb02   :  { %12327 = vmatpush3.bf16.msra.mxu0 %v6656_v14 }
 0xb05   :  { %12329 = vmatmul.mubr.msk.bf16.vlgmr.msra.gmra.mxu0 %vm4586_vm3, %v13051_v31 }
 0xb06   :  { %v12362_v41 = vpop.f32.mrf.mxu1  ;;  %12332 = vmatprep.mubr.msk.bf16.mxu0 %vm4586_vm3, %v13052_v5 }
 0xb08   :  { %v6936_v28 = vpop.f32.mrf.mxu1 }
 0xb0a   :  { %v12363_v39 = vpop.f32.mrf.mxu1 }
 0xb0b   :  { %v6985_v54 = vpack.c.bf16 %v12363_v39, %v12362_v41 }
 0xb0c   :  { %v6939_v3 = vpop.f32.mrf.mxu1 }
 0xb0d   :  { %12333 = vmatmul.mubr.msk.bf16.gmra.mxu0 %vm4586_vm3, %v13053_v32  ;;  %v6984_v60 = vpack.c.bf16 %v6939_v3, %v6936_v28 }
 0xb0e   :  { %v12366_v36 = vpop.f32.mrf.mxu1  ;;  %12336 = vmatprep.mubr.msk.bf16.mxu0 %vm4586_vm3, %v13054_v0 }
 0xb10   :  { %v6952_v38 = vpop.f32.mrf.mxu1 }
 0xb12   :  { %v12367_v46 = vpop.f32.mrf.mxu1 }
 0xb13   :  { %v6987_v43 = vpack.c.bf16 %v12367_v46, %v12366_v36 }
 0xb14   :  { %v6955_v47 = vpop.f32.mrf.mxu1 }
 0xb15   :  { %v6986_v52 = vpack.c.bf16 %v6955_v47, %v6952_v38  ;;  %12337 = vmatmul.mubr.msk.bf16.gmra.mxu0 %vm4586_vm3, %v13055_v21  ;;  %12368 = vmatprep.subr.bf16.mxu0 %v6987_v43 }
 0xb16   :  { %12369 = vmatpush3.bf16.msra.mxu0 %v6987_v43  ;;  %12340 = vmatprep.mubr.msk.bf16.mxu0 %vm4586_vm3, %v13056_v63 }
 0xb17   :  { %12370 = vmatprep.subr.bf16.mxu0 %v6986_v52 }
 0xb1a   :  { %12371 = vmatpush3.bf16.msra.mxu0 %v6986_v52 }
 0xb1b   :  { %12372 = vmatprep.subr.bf16.mxu0 %v6985_v54 }
 0xb1d   :  { %12341 = vmatmul.mubr.msk.bf16.gmra.mxu0 %vm4586_vm3, %v13057_v58 }
 0xb1e   :  { %12373 = vmatpush3.bf16.msra.mxu0 %v6985_v54  ;;  %12376 = vmatprep.mubr.msk.bf16.mxu0 %vm4586_vm3, %v13058_v45 }
 0xb1f   :  { %12374 = vmatprep.subr.bf16.mxu0 %v6984_v60 }
 0xb22   :  { %12375 = vmatpush3.bf16.msra.mxu0 %v6984_v60 }
 0xb25   :  { %v12090_v50 = vpop.f32.mrf.mxu0  ;;  %12377 = vmatmul.mubr.msk.bf16.vlgmr.msra.gmra.mxu0 %vm4586_vm3, %v13059_v1 }
 0xb26   :  { %v5183_v4 = vadd.f32 %v12090_v50, %v15081_v25  ;;  %12380 = vmatprep.mubr.msk.bf16.mxu0 %vm4586_vm3, %v13060_v35 }
 0xb27   :  { %v5118_v57 = vpop.f32.mrf.mxu0 }
 0xb28   :  { %v5181_v44 = vadd.f32 %v5118_v57, %v15087_v20 }
 0xb29   :  { %v12091_v6 = vpop.f32.mrf.mxu0 }
 0xb2a   :  { %v5184_v56 = vadd.f32 %v12091_v6, %v15089_v13  ;;  %v13063_v13 = vld [vmem:[%s15756_s4 + $0x228] sm:$0xff]  }
 0xb2b   :  { %v15354_v55 = vpop.f32.mrf.mxu0 }
 0xb2d   :  { %v12094_v34 = vpop.f32.mrf.mxu0  ;;  %12381 = vmatmul.mubr.msk.bf16.gmra.mxu0 %vm4586_vm3, %v13061_v37 }
 0xb2e   :  { %v5187_v25 = vadd.f32 %v12094_v34, %v15099_v26  ;;  %12384 = vmatprep.mubr.msk.bf16.mxu0 %vm4586_vm3, %v13062_v19 }
 0xb2f   :  { %v5134_v20 = vpop.f32.mrf.mxu0 }
 0xb30   :  { %v5185_v2 = vadd.f32 %v5134_v20, %v15105_v16 }
 0xb31   :  { %v12095_v40 = vpop.f32.mrf.mxu0 }
 0xb32   :  { %v5188_v59 = vadd.f32 %v12095_v40, %v15107_v22  ;;  %v13065_v22 = vld [vmem:[%s15756_s4 + $0x238] sm:$0xff]  }
 0xb33   :  { %v15367_v7 = vpop.f32.mrf.mxu0 }
 0xb35   :  { %v12098_v9 = vpop.f32.mrf.mxu0  ;;  %12385 = vmatmul.mubr.msk.bf16.gmra.mxu0 %vm4586_vm3, %v13063_v13 }
 0xb36   :  { %v5191_v26 = vadd.f32 %v12098_v9, %v15116_v17  ;;  %12388 = vmatprep.mubr.msk.bf16.mxu0 %vm4586_vm3, %v13064_v8 }
 0xb37   :  { %v5150_v16 = vpop.f32.mrf.mxu0 }
 0xb38   :  { %v5189_v15 = vadd.f32 %v5150_v16, %v15121_v42 }
 0xb39   :  { %v12099_v29 = vpop.f32.mrf.mxu0 }
 0xb3a   :  { %v5192_v11 = vadd.f32 %v12099_v29, %v15123_v48 }
 0xb3b   :  { %v15377_v24 = vpop.f32.mrf.mxu0 }
 0xb3d   :  { %v12102_v14 = vpop.f32.mrf.mxu0  ;;  %12389 = vmatmul.mubr.msk.bf16.gmra.mxu0 %vm4586_vm3, %v13065_v22 }
 0xb3e   :  { %v5195_v31 = vadd.f32 %v12102_v14, %v15132_v27 }
 0xb3f   :  { %v5166_v17 = vpop.f32.mrf.mxu0 }
 0xb40   :  { %v5193_v5 = vadd.f32 %v5166_v17, %v15134_v62 }
 0xb41   :  { %v12103_v41 = vpop.f32.mrf.mxu0 }
 0xb42   :  { %v5196_v42 = vadd.f32 %v12103_v41, %v15136_v12 }
 0xb43   :  { %v15383_v28 = vpop.f32.mrf.mxu0 }
 0xb45   :  { %v12138_v32 = vpop.f32.mrf.mxu0 }
 0xb46   :  { %v5511_v39 = vadd.f32 %v12138_v32, %v5183_v4 }
 0xb47   :  { %v5446_v0 = vpop.f32.mrf.mxu0 }
 0xb48   :  { %v5509_v3 = vadd.f32 %v5446_v0, %v5181_v44 }
 0xb49   :  { %v12139_v48 = vpop.f32.mrf.mxu0 }
 0xb4a   :  { %v5512_v36 = vadd.f32 %v12139_v48, %v5184_v56 }
 0xb4b   :  { %v15385_v38 = vpop.f32.mrf.mxu0 }
 0xb4d   :  { %v12142_v21 = vpop.f32.mrf.mxu0 }
 0xb4e   :  { %v5515_v46 = vadd.f32 %v12142_v21, %v5187_v25 }
 0xb4f   :  { %v5462_v63 = vpop.f32.mrf.mxu0 }
 0xb50   :  { %v5513_v27 = vadd.f32 %v5462_v63, %v5185_v2 }
 0xb51   :  { %v12143_v43 = vpop.f32.mrf.mxu0 }
 0xb52   :  { %v5516_v47 = vadd.f32 %v12143_v43, %v5188_v59 }
 0xb53   :  { %v15387_v62 = vpop.f32.mrf.mxu0 }
 0xb55   :  { %v12146_v52 = vpop.f32.mrf.mxu0 }
 0xb56   :  { %v5519_v12 = vadd.f32 %v12146_v52, %v5191_v26 }
 0xb57   :  { %v5478_v54 = vpop.f32.mrf.mxu0 }
 0xb58   :  { %v5517_v58 = vadd.f32 %v5478_v54, %v5189_v15 }
 0xb59   :  { %v12147_v45 = vpop.f32.mrf.mxu0 }
 0xb5a   :  { %v5520_v60 = vadd.f32 %v12147_v45, %v5192_v11 }
 0xb5b   :  { %v15389_v1 = vpop.f32.mrf.mxu0 }
 0xb5d   :  { %v12150_v35 = vpop.f32.mrf.mxu0 }
 0xb5e   :  { %v5523_v50 = vadd.f32 %v12150_v35, %v5195_v31 }
 0xb5f   :  { %v5494_v4 = vpop.f32.mrf.mxu0 }
 0xb60   :  { %v5521_v57 = vadd.f32 %v5494_v4, %v5193_v5 }
 0xb61   :  { %v12151_v44 = vpop.f32.mrf.mxu0 }
 0xb62   :  { %v5524_v6 = vadd.f32 %v12151_v44, %v5196_v42 }
 0xb63   :  { %v15391_v37 = vpop.f32.mrf.mxu0 }
 0xb65   :  { %v12186_v56 = vpop.f32.mrf.mxu0 }
 0xb66   :  { %v5839_v19 = vadd.f32 %v12186_v56, %v5511_v39 }
 0xb67   :  { %v5774_v34 = vpop.f32.mrf.mxu0 }
 0xb68   :  { %v5837_v25 = vadd.f32 %v5774_v34, %v5509_v3 }
 0xb69   :  { %v12187_v20 = vpop.f32.mrf.mxu0 }
 0xb6a   :  { %v5840_v2 = vadd.f32 %v12187_v20, %v5512_v36 }
 0xb6b   :  { %v15393_v40 = vpop.f32.mrf.mxu0 }
 0xb6d   :  { %v12190_v13 = vpop.f32.mrf.mxu0 }
 0xb6e   :  { %v5843_v59 = vadd.f32 %v12190_v13, %v5515_v46 }
 0xb6f   :  { %v5790_v8 = vpop.f32.mrf.mxu0 }
 0xb70   :  { %v5841_v9 = vadd.f32 %v5790_v8, %v5513_v27 }
 0xb71   :  { %v12191_v26 = vpop.f32.mrf.mxu0 }
 0xb72   :  { %v5844_v16 = vadd.f32 %v12191_v26, %v5516_v47 }
 0xb73   :  { %v15395_v15 = vpop.f32.mrf.mxu0 }
 0xb75   :  { %v12194_v29 = vpop.f32.mrf.mxu0 }
 0xb76   :  { %v5847_v22 = vadd.f32 %v12194_v29, %v5519_v12  ;;  %v13066_v29 = vld [vmem:[%s15759_s7] sm:$0xff]  }
 0xb77   :  { %v5806_v11 = vpop.f32.mrf.mxu0  ;;  %12408 = vmatprep.mubr.bf16.mxu1 %v13066_v29 }
 0xb78   :  { %v5845_v14 = vadd.f32 %v5806_v11, %v5517_v58 }
 0xb79   :  { %v12195_v31 = vpop.f32.mrf.mxu0 }
 0xb7a   :  { %v5848_v17 = vadd.f32 %v12195_v31, %v5520_v60 }
 0xb7b   :  { %v5809_v5 = vpop.f32.mrf.mxu0 }
 0xb7d   :  { %v12198_v41 = vpop.f32.mrf.mxu0 }
 0xb7e   :  { %v5851_v42 = vadd.f32 %v12198_v41, %v5523_v50 }
 0xb7f   :  { %v5822_v32 = vpop.f32.mrf.mxu0 }
 0xb80   :  { %v5849_v39 = vadd.f32 %v5822_v32, %v5521_v57 }
 0xb81   :  { %v12199_v0 = vpop.f32.mrf.mxu0 }
 0xb82   :  { %v5852_v3 = vadd.f32 %v12199_v0, %v5524_v6 }
 0xb83   :  { %v15397_v48 = vpop.f32.mrf.mxu0 }
 0xb85   :  { %v12234_v36 = vpop.f32.mrf.mxu0 }
 0xb86   :  { %v6167_v21 = vadd.f32 %v12234_v36, %v5839_v19 }
 0xb87   :  { %v6102_v46 = vpop.f32.mrf.mxu0 }
 0xb88   :  { %v6165_v63 = vadd.f32 %v6102_v46, %v5837_v25 }
 0xb89   :  { %v12235_v27 = vpop.f32.mrf.mxu0 }
 0xb8a   :  { %v6168_v43 = vadd.f32 %v12235_v27, %v5840_v2 }
 0xb8b   :  { %v15399_v47 = vpop.f32.mrf.mxu0 }
 0xb8d   :  { %v12238_v52 = vpop.f32.mrf.mxu0 }
 0xb8e   :  { %v6171_v12 = vadd.f32 %v12238_v52, %v5843_v59 }
 0xb8f   :  { %v6118_v54 = vpop.f32.mrf.mxu0 }
 0xb90   :  { %v6169_v58 = vadd.f32 %v6118_v54, %v5841_v9 }
 0xb91   :  { %v12239_v45 = vpop.f32.mrf.mxu0 }
 0xb92   :  { %v6172_v60 = vadd.f32 %v12239_v45, %v5844_v16 }
 0xb93   :  { %v15401_v35 = vpop.f32.mrf.mxu0 }
 0xb95   :  { %v12242_v50 = vpop.f32.mrf.mxu0 }
 0xb96   :  { %v6175_v4 = vadd.f32 %v12242_v50, %v5847_v22  ;;  %v13067_v22 = vld [vmem:[%s15759_s7 + $0x20] sm:$0xff]  }
 0xb97   :  { %v6134_v57 = vpop.f32.mrf.mxu0  ;;  %12432 = vmatprep.mubr.bf16.mxu0 %v13067_v22 }
 0xb98   :  { %v6173_v44 = vadd.f32 %v6134_v57, %v5845_v14 }
 0xb99   :  { %v12243_v6 = vpop.f32.mrf.mxu0 }
 0xb9a   :  { %v6176_v56 = vadd.f32 %v12243_v6, %v5848_v17  ;;  %v15435_v6 = vpop.permute.xlu0 %7253 }
 0xb9b   :  { %v6137_v19 = vpop.f32.mrf.mxu0  ;;  %15768 = vst [vmem:[#allocation8_spill] sm:$0xff] %v15435_v6 }
 0xb9d   :  { %v12246_v34 = vpop.f32.mrf.mxu0 }
 0xb9e   :  { %v6179_v25 = vadd.f32 %v12246_v34, %v5851_v42 }
 0xb9f   :  { %v6150_v20 = vpop.f32.mrf.mxu0 }
 0xba0   :  { %v6177_v2 = vadd.f32 %v6150_v20, %v5849_v39 }
 0xba1   :  { %v12247_v13 = vpop.f32.mrf.mxu0 }
 0xba2   :  { %v15403_v8 = vadd.f32 %v12247_v13, %v5852_v3  ;;  %v4842_v3 = vadd.f32 %v15127_v51, %v15125_v49 }
 0xba3   :  { %v15405_v59 = vpop.f32.mrf.mxu0 }
 0xba4   :  { %v5190_v46 = vadd.f32 %v15377_v24, %v4842_v3 }
 0xba5   :  { %v12282_v9 = vpop.f32.mrf.mxu0 }
 0xba6   :  { %v6495_v26 = vadd.f32 %v12282_v9, %v6167_v21  ;;  %v5518_v27 = vadd.f32 %v15389_v1, %v5190_v46  ;;  %v4810_v1 = vadd.f32 %v15093_v30, %v15091_v23  ;;  %v15446_v9 = vpop.permute.xlu0 %7243 }
 0xba7   :  { %v6430_v16 = vpop.f32.mrf.mxu0  ;;  %15770 = vst [vmem:[#allocation10_spill] sm:$0xff] %v15446_v9 }
 0xba8   :  { %v6493_v11 = vadd.f32 %v6430_v16, %v6165_v63  ;;  %v5846_v54 = vadd.f32 %v5809_v5, %v5518_v27 }
 0xba9   :  { %v12283_v14 = vpop.f32.mrf.mxu0 }
 0xbaa   :  { %v6496_v31 = vadd.f32 %v12283_v14, %v6168_v43  ;;  %v6174_v45 = vadd.f32 %v6137_v19, %v5846_v54 }
 0xbab   :  { %v6433_v17 = vpop.f32.mrf.mxu0 }
 0xbad   :  { %v12286_v41 = vpop.f32.mrf.mxu0 }
 0xbae   :  { %v6499_v42 = vadd.f32 %v12286_v41, %v6171_v12 }
 0xbaf   :  { %v6446_v32 = vpop.f32.mrf.mxu0 }
 0xbb0   :  { %v6497_v39 = vadd.f32 %v6446_v32, %v6169_v58  ;;  %v15451_v32 = vpop.permute.xlu0 %7233 }
 0xbb1   :  { %v12287_v0 = vpop.f32.mrf.mxu0 }
 0xbb2   :  { %v15415_v36 = vadd.f32 %v12287_v0, %v6172_v60 }
 0xbb3   :  { %v15417_v21 = vpop.f32.mrf.mxu0 }
 0xbb5   :  { %v12290_v63 = vpop.f32.mrf.mxu0 }
 0xbb6   :  { %v15421_v52 = vadd.f32 %v12290_v63, %v6175_v4  ;;  %v15455_v63 = vpop.permute.xlu0 %7223 }
 0xbb7   :  { %v6462_v43 = vpop.f32.mrf.mxu0 }
 0xbb8   :  { %v15423_v12 = vadd.f32 %v6462_v43, %v6173_v44  ;;  %v5182_v44 = vadd.f32 %v15354_v55, %v4810_v1 }
 0xbb9   :  { %v12291_v58 = vpop.f32.mrf.mxu0 }
 0xbba   :  { %v15425_v50 = vadd.f32 %v12291_v58, %v6176_v56  ;;  %v15440_v56 = vpop.permute.xlu1 %7258  ;;  %v5510_v34 = vadd.f32 %v15385_v38, %v5182_v44  ;;  %v4826_v44 = vadd.f32 %v15111_v61, %v15109_v53 }
 0xbbb   :  { %v6465_v49 = vpop.f32.mrf.mxu0  ;;  %15769 = vst [vmem:[#allocation9_spill] sm:$0xff] %v15440_v56 }
 0xbbc   :  { %v15427_v51 = vadd.f32 %v6465_v49, %v6174_v45  ;;  %v5838_v20 = vadd.f32 %v15393_v40, %v5510_v34 }
 0xbbd   :  { %v12294_v60 = vpop.f32.mrf.mxu0 }
 0xbbe   :  { %v15429_v57 = vadd.f32 %v12294_v60, %v6179_v25  ;;  %v6166_v30 = vadd.f32 %v15399_v47, %v5838_v20  ;;  %v15449_v16 = vpop.permute.xlu1 %7248 }
 0xbbf   :  { %v6478_v24 = vpop.f32.mrf.mxu0  ;;  %15771 = vst [vmem:[#allocation11_spill] sm:$0xff] %v15449_v16 }
 0xbc0   :  { %v15433_v4 = vadd.f32 %v6478_v24, %v6177_v2  ;;  %v6494_v55 = vadd.f32 %v6433_v17, %v6166_v30  ;;  %v7214_v17 = vpop.permute.xlu0 %7213 }
 0xbc1   :  { %v15437_v5 = vpop.f32.mrf.mxu0 }
 0xbc2   :  { %v15453_v3 = vpop.permute.xlu1 %7238 }
 0xbc3   :  { %v15442_v19 = vpop.f32.mrf.mxu0 }
 0xbc5   :  { %v12330_v25 = vpop.f32.mrf.mxu0 }
 0xbc6   :  { %v6823_v13 = vadd.f32 %v12330_v25, %v6495_v26 }
 0xbc7   :  { %v6758_v23 = vpop.f32.mrf.mxu0 }
 0xbc8   :  { %v6821_v2 = vadd.f32 %v6758_v23, %v6493_v11  ;;  %v15457_v11 = vpop.permute.xlu1 %7228  ;;  %v5186_v23 = vadd.f32 %v15367_v7, %v4826_v44 }
 0xbc9   :  { %v12331_v29 = vpop.f32.mrf.mxu0 }
 0xbca   :  { %v6824_v22 = vadd.f32 %v12331_v29, %v6496_v31 }
 0xbcb   :  { %v6761_v14 = vpop.f32.mrf.mxu0 }
 0xbcc   :  { %v6822_v41 = vadd.f32 %v6761_v14, %v6494_v55  ;;  %v7219_v54 = vpop.permute.xlu1 %7218  ;;  %v5514_v55 = vadd.f32 %v15387_v62, %v5186_v23 }
 0xbcd   :  { %v12334_v38 = vpop.f32.mrf.mxu0 }
 0xbce   :  { %v6827_v0 = vadd.f32 %v12334_v38, %v6499_v42  ;;  %v7204_v42 = vpop.permute.xlu0 %7203  ;;  %v5842_v16 = vadd.f32 %v15395_v15, %v5514_v55 }
 0xbcf   :  { %v6774_v40 = vpop.f32.mrf.mxu0 }
 0xbd0   :  { %v6825_v26 = vadd.f32 %v6774_v40, %v6497_v39  ;;  %v7209_v60 = vpop.permute.xlu1 %7208  ;;  %v6170_v61 = vadd.f32 %v15401_v35, %v5842_v16 }
 0xbd1   :  { %v12335_v46 = vpop.f32.mrf.mxu0 }
 0xbd2   :  { %v7194_v1 = vpop.permute.xlu0 %7193  ;;  %v6498_v62 = vadd.f32 %v15417_v21, %v6170_v61 }
 0xbd3   :  { %v6777_v47 = vpop.f32.mrf.mxu0 }
 0xbd4   :  { %v7199_v20 = vpop.permute.xlu1 %7198 }
 0xbd5   :  { %v12338_v27 = vpop.f32.mrf.mxu0 }
 0xbd6   :  { %v7184_v10 = vpop.permute.xlu0 %7183 }
 0xbd7   :  { %v6790_v43 = vpop.f32.mrf.mxu0 }
 0xbd8   :  { %v7189_v53 = vpop.permute.xlu1 %7188 }
 0xbd9   :  { %v12339_v31 = vpop.f32.mrf.mxu0 }
 0xbdb   :  { %v15459_v58 = vpop.f32.mrf.mxu0 }
 0xbdd   :  { %v15461_v45 = vpop.f32.mrf.mxu0 }
 0xbdf   :  { %v15463_v49 = vpop.f32.mrf.mxu0 }
 0xbe1   :  { %v15465_v39 = vpop.f32.mrf.mxu0 }
 0xbe3   :  { %v15467_v24 = vpop.f32.mrf.mxu0 }
 0xbe4   :  { %15772 = vst [vmem:[#allocation12_spill] sm:$0xff] %v15467_v24 }
 0xbe5   :  { %v12378_v34 = vpop.f32.mrf.mxu0 }
 0xbe6   :  { %v7151_v25 = vadd.f32 %v12378_v34, %v6823_v13 }
 0xbe7   :  { %v7086_v30 = vpop.f32.mrf.mxu0 }
 0xbe8   :  { %v7149_v29 = vadd.f32 %v7086_v30, %v6821_v2  ;;  %v7263_v38 = vadd.f32 %v7194_v1, %v7151_v25  ;;  %v6828_v1 = vadd.f32 %v12335_v46, %v15415_v36  ;;  %v4858_v36 = vadd.f32 %v15341_v18, %v15138_v33 }
 0xbe9   :  { %v12379_v14 = vpop.f32.mrf.mxu0  ;;  %v6830_v18 = vadd.f32 %v15459_v58, %v15427_v51  ;;  %v6508_v51 = vadd.f32 %v15437_v5, %v15403_v8 }
 0xbea   :  { %v7152_v40 = vadd.f32 %v12379_v14, %v6824_v22  ;;  %v7261_v9 = vadd.f32 %v7184_v10, %v7149_v29  ;;  %v7279_v34 = vmax.f32 %v7263_v38, 0.0  ;;  %v5194_v14 = vadd.f32 %v15383_v28, %v4858_v36  ;;  %v13070_v36 = vld [vmem:[#allocation2 + $0x18] sm:$0xff]  }
 0xbeb   :  { %v7089_v56 = vpop.f32.mrf.mxu0  ;;  %v15773_v5 = vld [vmem:[#allocation12_spill] sm:$0xff] }
 0xbec   :  { %v7264_v6 = vadd.f32 %v7199_v20, %v7152_v40  ;;  %v7150_v24 = vadd.f32 %v7089_v56, %v6822_v41  ;;  %v7277_v25 = vmax.f32 %v7261_v9, 0.0  ;;  %v6826_v56 = vadd.f32 %v6777_v47, %v6498_v62 }
 0xbed   :  { %v12382_v13 = vpop.f32.mrf.mxu0  ;;  %v6829_v9 = vadd.f32 %v6790_v43, %v15423_v12 }
 0xbee   :  { %v7280_v7 = vmax.f32 %v7264_v6, 0.0  ;;  %v7262_v44 = vadd.f32 %v7189_v53, %v7150_v24  ;;  %v7155_v2 = vadd.f32 %v12382_v13, %v6827_v0  ;;  %v6831_v6 = vadd.f32 %v12338_v27, %v15421_v52 }
 0xbef   :  { %v7102_v22 = vpop.f32.mrf.mxu0 }
 0xbf0   :  { %v15477_v23 = vpack.c.bf16 %v7280_v7, %v7279_v34  ;;  %v7278_v15 = vmax.f32 %v7262_v44, 0.0  ;;  %v7153_v10 = vadd.f32 %v7102_v22, %v6825_v26  ;;  %v7267_v35 = vadd.f32 %v7214_v17, %v7155_v2 }
 0xbf1   :  { %v12383_v20 = vpop.f32.mrf.mxu0  ;;  %v6832_v17 = vadd.f32 %v12339_v31, %v15425_v50  ;;  %v6835_v31 = vadd.f32 %v15461_v45, %v15429_v57 }
 0xbf2   :  { %v15479_v41 = vpack.c.bf16 %v7278_v15, %v7277_v25  ;;  %v7156_v16 = vadd.f32 %v12383_v20, %v6828_v1  ;;  %v7265_v0 = vadd.f32 %v7204_v42, %v7153_v10  ;;  %v7283_v29 = vmax.f32 %v7267_v35, 0.0  ;;  %v15775_v15 = vld [vmem:[#allocation10_spill] sm:$0xff] }
 0xbf3   :  { %v7105_v30 = vpop.f32.mrf.mxu0  ;;  %v5522_v42 = vadd.f32 %v15391_v37, %v5194_v14  ;;  %v13075_v14 = vld [vmem:[%s15759_s7 + $0x18] sm:$0xff]  }
 0xbf4   :  { %v7268_v24 = vadd.f32 %v7219_v54, %v7156_v16  ;;  %v7154_v21 = vadd.f32 %v7105_v30, %v6826_v56  ;;  %v7281_v40 = vmax.f32 %v7265_v0, 0.0  ;;  %v15777_v16 = vld [vmem:[#allocation11_spill] sm:$0xff] }
 0xbf5   :  { %v12386_v46 = vpop.f32.mrf.mxu0  ;;  %v5850_v28 = vadd.f32 %v15397_v48, %v5522_v42 }
 0xbf6   :  { %v7284_v26 = vmax.f32 %v7268_v24, 0.0  ;;  %v7266_v55 = vadd.f32 %v7209_v60, %v7154_v21  ;;  %v7159_v47 = vadd.f32 %v12386_v46, %v6831_v6  ;;  %v13069_v46 = vld [vmem:[%s15759_s7 + $0x28] sm:$0xff]  }
 0xbf7   :  { %v7118_v38 = vpop.f32.mrf.mxu0  ;;  %v6178_v13 = vadd.f32 %v15405_v59, %v5850_v28 }
 0xbf8   :  { %v15487_v52 = vpack.c.bf16 %v7284_v26, %v7283_v29  ;;  %v7282_v27 = vmax.f32 %v7266_v55, 0.0  ;;  %v7157_v54 = vadd.f32 %v7118_v38, %v6829_v9  ;;  %v7271_v43 = vadd.f32 %v15451_v32, %v7159_v47  ;;  %v13068_v9 = vld [vmem:[%s15759_s7 + $0x8] sm:$0xff]   ;;  %v13072_v29 = vld [vmem:[%s15759_s7 + $0x30] sm:$0xff]   ;;  %v13073_v47 = vld [vmem:[%s15759_s7 + $0x38] sm:$0xff]  }
 0xbf9   :  { %v12387_v33 = vpop.f32.mrf.mxu0  ;;  %v6833_v32 = vadd.f32 %v15463_v49, %v15433_v4  ;;  %v6506_v57 = vadd.f32 %v15442_v19, %v6178_v13  ;;  %v15774_v49 = vld [vmem:[#allocation8_spill] sm:$0xff]  ;;  %v15776_v19 = vld [vmem:[#allocation9_spill] sm:$0xff]  ;;  %v13071_v26 = vld [vmem:[#allocation2 + $0x10] sm:$0xff]  }
 0xbfa   :  { %v15492_v12 = vpack.c.bf16 %v7282_v27, %v7281_v40  ;;  %v7160_v60 = vadd.f32 %v12387_v33, %v6832_v17  ;;  %v7269_v53 = vadd.f32 %v15455_v63, %v7157_v54  ;;  %v7287_v34 = vmax.f32 %v7271_v43, 0.0  ;;  %v13074_v55 = vld [vmem:[%s15759_s7 + $0x10] sm:$0xff]   ;;  %v13076_v17 = vld [vmem:[#allocation2 + $0x8] sm:$0xff]   ;;  %v13077_v38 = vld [vmem:[#allocation2] sm:$0xff]  }
 0xbfb   :  { %v7121_v50 = vpop.f32.mrf.mxu0  ;;  %v6836_v63 = vadd.f32 %v15465_v39, %v6508_v51  ;;  %v6834_v1 = vadd.f32 %v15773_v5, %v6506_v57  ;;  %v13078_v40 = vld [vmem:[#allocation2 + $0x28] sm:$0xff]   ;;  %v13083_v5 = vld [vmem:[%s15759_s7 + $0x58] sm:$0xff]  }
 0xbfc   :  { %v7272_v61 = vadd.f32 %v15453_v3, %v7160_v60  ;;  %v7158_v37 = vadd.f32 %v7121_v50, %v6830_v18  ;;  %v7285_v45 = vmax.f32 %v7269_v53, 0.0 }
 0xbfd   :  { %v12390_v58 = vpop.f32.mrf.mxu0 }
 0xbfe   :  { %v7288_v48 = vmax.f32 %v7272_v61, 0.0  ;;  %v7270_v7 = vadd.f32 %v15457_v11, %v7158_v37  ;;  %v7163_v44 = vadd.f32 %v12390_v58, %v6835_v31  ;;  %v13079_v37 = vld [vmem:[#allocation2 + $0x20] sm:$0xff]  }
 0xbff   :  { %v7134_v3 = vpop.f32.mrf.mxu0 }
 0xc00   :  { %v15508_v2 = vpack.c.bf16 %v7288_v48, %v7287_v34  ;;  %v7286_v59 = vmax.f32 %v7270_v7, 0.0  ;;  %v7161_v62 = vadd.f32 %v7134_v3, %v6833_v32  ;;  %v7275_v22 = vadd.f32 %v15774_v49, %v7163_v44 }
 0xc01   :  { %v12391_v8 = vpop.f32.mrf.mxu0 }
 0xc02   :  { %v15511_v4 = vpack.c.bf16 %v7286_v59, %v7285_v45  ;;  %v7164_v25 = vadd.f32 %v12391_v8, %v6836_v63  ;;  %v7273_v10 = vadd.f32 %v15775_v15, %v7161_v62  ;;  %v7291_v56 = vmax.f32 %v7275_v22, 0.0  ;;  %v13080_v59 = vld [vmem:[%s15759_s7 + $0x40] sm:$0xff]   ;;  %v13081_v62 = vld [vmem:[%s15759_s7 + $0x48] sm:$0xff]   ;;  %v13082_v8 = vld [vmem:[%s15759_s7 + $0x50] sm:$0xff]  }
 0xc03   :  { %v7137_v11 = vpop.f32.mrf.mxu0 }
 0xc04   :  { %v7276_v20 = vadd.f32 %v15776_v19, %v7164_v25  ;;  %v7162_v39 = vadd.f32 %v7137_v11, %v6834_v1  ;;  %v7289_v6 = vmax.f32 %v7273_v10, 0.0 }
 0xc06   :  { %v7292_v35 = vmax.f32 %v7276_v20, 0.0  ;;  %v7274_v30 = vadd.f32 %v15777_v16, %v7162_v39 }
 0xc08   :  { %v15517_v0 = vpack.c.bf16 %v7292_v35, %v7291_v56  ;;  %v7290_v24 = vmax.f32 %v7274_v30, 0.0 }
 0xc0a   :  { %v15519_v21 = vpack.c.bf16 %v7290_v24, %v7289_v6  ;;  %12392 = vmatprep.subr.bf16.mxu1 %v15517_v0  ;;  %12416 = vmatprep.subr.bf16.mxu0 %v15517_v0 }
 0xc0b   :  { %12393 = vmatpush3.bf16.msra.mxu1 %v15517_v0  ;;  %12417 = vmatpush3.bf16.msra.mxu0 %v15517_v0 }
 0xc0c   :  { %12394 = vmatprep.subr.bf16.mxu1 %v15519_v21  ;;  %12418 = vmatprep.subr.bf16.mxu0 %v15519_v21 }
 0xc0f   :  { %12395 = vmatpush3.bf16.msra.mxu1 %v15519_v21  ;;  %12419 = vmatpush3.bf16.msra.mxu0 %v15519_v21 }
 0xc10   :  { %12396 = vmatprep.subr.bf16.mxu1 %v15508_v2  ;;  %12420 = vmatprep.subr.bf16.mxu0 %v15508_v2 }
 0xc13   :  { %12397 = vmatpush3.bf16.msra.mxu1 %v15508_v2  ;;  %12421 = vmatpush3.bf16.msra.mxu0 %v15508_v2 }
 0xc14   :  { %12398 = vmatprep.subr.bf16.mxu1 %v15511_v4  ;;  %12422 = vmatprep.subr.bf16.mxu0 %v15511_v4 }
 0xc17   :  { %12399 = vmatpush3.bf16.msra.mxu1 %v15511_v4  ;;  %12423 = vmatpush3.bf16.msra.mxu0 %v15511_v4 }
 0xc18   :  { %12400 = vmatprep.subr.bf16.mxu1 %v15487_v52  ;;  %12424 = vmatprep.subr.bf16.mxu0 %v15487_v52 }
 0xc1b   :  { %12401 = vmatpush3.bf16.msra.mxu1 %v15487_v52  ;;  %12425 = vmatpush3.bf16.msra.mxu0 %v15487_v52 }
 0xc1c   :  { %12402 = vmatprep.subr.bf16.mxu1 %v15492_v12  ;;  %12426 = vmatprep.subr.bf16.mxu0 %v15492_v12 }
 0xc1f   :  { %12403 = vmatpush3.bf16.msra.mxu1 %v15492_v12  ;;  %12427 = vmatpush3.bf16.msra.mxu0 %v15492_v12 }
 0xc20   :  { %12404 = vmatprep.subr.bf16.mxu1 %v15477_v23  ;;  %12428 = vmatprep.subr.bf16.mxu0 %v15477_v23 }
 0xc23   :  { %12405 = vmatpush3.bf16.msra.mxu1 %v15477_v23  ;;  %12429 = vmatpush3.bf16.msra.mxu0 %v15477_v23 }
 0xc24   :  { %12406 = vmatprep.subr.bf16.mxu1 %v15479_v41  ;;  %12430 = vmatprep.subr.bf16.mxu0 %v15479_v41 }
 0xc27   :  { %12407 = vmatpush3.bf16.msra.mxu1 %v15479_v41  ;;  %12431 = vmatpush3.bf16.msra.mxu0 %v15479_v41 }
 0xc28   :  { %12440 = vmatprep.subr.bf16.mxu1 %v13070_v36  ;;  %12452 = vmatprep.subr.bf16.mxu0 %v13076_v17 }
 0xc2a   :  { %12409 = vmatmul.mubr.bf16.vlgmr.msra.gmra.mxu1 %v13068_v9  ;;  %12433 = vmatmul.mubr.bf16.vlgmr.msra.gmra.mxu0 %v13069_v46 }
 0xc2b   :  { %12441 = vmatpush3.bf16.msra.mxu1 %v13070_v36  ;;  %12436 = vmatprep.mubr.bf16.mxu0 %v13072_v29 }
 0xc2c   :  { %12442 = vmatprep.subr.bf16.mxu1 %v13071_v26  ;;  %12412 = vmatprep.mubr.bf16.mxu1 %v13074_v55 }
 0xc2d   :  { %12453 = vmatpush3.bf16.msra.mxu0 %v13076_v17 }
 0xc2e   :  { %12454 = vmatprep.subr.bf16.mxu0 %v13077_v38 }
 0xc2f   :  { %12443 = vmatpush3.bf16.msra.mxu1 %v13071_v26 }
 0xc30   :  { %12464 = vmatprep.subr.bf16.mxu1 %v15517_v0 }
 0xc31   :  { %12455 = vmatpush3.bf16.msra.mxu0 %v13077_v38 }
 0xc32   :  { %12437 = vmatmul.mubr.bf16.gmra.mxu0 %v13073_v47  ;;  %12413 = vmatmul.mubr.bf16.gmra.mxu1 %v13075_v14 }
 0xc33   :  { %12488 = vmatprep.subr.bf16.mxu0 %v13078_v40 }
 0xcea   :  { %v12410_v27 = vpop.f32.mrf.mxu1  ;;  %v12434_v54 = vpop.f32.mrf.mxu0 }
 0xcec   :  { %v7367_v42 = vpop.f32.mrf.mxu1  ;;  %v7473_v33 = vpop.f32.mrf.mxu0 }
 0xcee   :  { %v12411_v18 = vpop.f32.mrf.mxu1  ;;  %v12435_v43 = vpop.f32.mrf.mxu0 }
 0xcef   :  { %v7399_v60 = vpack.c.bf16 %v12411_v18, %v12410_v27  ;;  %v7505_v61 = vpack.c.bf16 %v12435_v43, %v12434_v54 }
 0xcf0   :  { %v7370_v28 = vpop.f32.mrf.mxu1  ;;  %v7476_v50 = vpop.f32.mrf.mxu0 }
 0xcf1   :  { %v7398_v31 = vpack.c.bf16 %v7370_v28, %v7367_v42  ;;  %v7504_v53 = vpack.c.bf16 %v7476_v50, %v7473_v33  ;;  %v13084_v28 = vld [vmem:[%s15759_s7 + $0x60] sm:$0xff]  }
 0xcf2   :  { %v12438_v13 = vpop.f32.mrf.mxu0  ;;  %v12414_v51 = vpop.f32.mrf.mxu1 }
 0xcf3   :  { %12444 = vmatprep.mubr.msk.bf16.mxu1 %vm7525_vm4, %v7504_v53  ;;  %12456 = vmatprep.mubr.msk.bf16.mxu0 %vm7525_vm4, %v7398_v31 }
 0xcf4   :  { %12445 = vmatmul.mubr.msk.bf16.vlgmr.msra.gmra.mxu1 %vm7525_vm4, %v7505_v61  ;;  %12457 = vmatmul.mubr.msk.bf16.vlgmr.msra.gmra.mxu0 %vm7525_vm4, %v7399_v60  ;;  %v7489_v32 = vpop.f32.mrf.mxu0  ;;  %v7383_v58 = vpop.f32.mrf.mxu1 }
 0xcf5   :  { %12465 = vmatpush3.bf16.msra.mxu1 %v15517_v0  ;;  %12489 = vmatpush3.bf16.msra.mxu0 %v13078_v40 }
 0xcf6   :  { %12466 = vmatprep.subr.bf16.mxu1 %v15519_v21  ;;  %12490 = vmatprep.subr.bf16.mxu0 %v13079_v37  ;;  %v12439_v34 = vpop.f32.mrf.mxu0  ;;  %v12415_v48 = vpop.f32.mrf.mxu1 }
 0xcf7   :  { %v7507_v7 = vpack.c.bf16 %v12439_v34, %v12438_v13  ;;  %v7401_v57 = vpack.c.bf16 %v12415_v48, %v12414_v51 }
 0xcf8   :  { %v7492_v44 = vpop.f32.mrf.mxu0  ;;  %v7386_v63 = vpop.f32.mrf.mxu1 }
 0xcf9   :  { %12467 = vmatpush3.bf16.msra.mxu1 %v15519_v21  ;;  %12491 = vmatpush3.bf16.msra.mxu0 %v13079_v37  ;;  %v7506_v3 = vpack.c.bf16 %v7492_v44, %v7489_v32  ;;  %v7400_v45 = vpack.c.bf16 %v7386_v63, %v7383_v58 }
 0xcfa   :  { %12468 = vmatprep.subr.bf16.mxu1 %v15508_v2  ;;  %12500 = vmatprep.subr.bf16.mxu0 %v15517_v0 }
 0xcfb   :  { %12448 = vmatprep.mubr.msk.bf16.mxu1 %vm7525_vm4, %v7506_v3  ;;  %12460 = vmatprep.mubr.msk.bf16.mxu0 %vm7525_vm4, %v7400_v45 }
 0xcfc   :  { %12449 = vmatmul.mubr.msk.bf16.gmra.mxu1 %vm7525_vm4, %v7507_v7  ;;  %12461 = vmatmul.mubr.msk.bf16.gmra.mxu0 %vm7525_vm4, %v7401_v57 }
 0xcfd   :  { %12469 = vmatpush3.bf16.msra.mxu1 %v15508_v2  ;;  %12480 = vmatprep.mubr.bf16.mxu1 %v13080_v59 }
 0xcfe   :  { %12470 = vmatprep.subr.bf16.mxu1 %v15511_v4 }
 0xd01   :  { %12471 = vmatpush3.bf16.msra.mxu1 %v15511_v4 }
 0xd02   :  { %12472 = vmatprep.subr.bf16.mxu1 %v15487_v52 }
 0xd05   :  { %12473 = vmatpush3.bf16.msra.mxu1 %v15487_v52 }
 0xd06   :  { %12474 = vmatprep.subr.bf16.mxu1 %v15492_v12 }
 0xd09   :  { %12475 = vmatpush3.bf16.msra.mxu1 %v15492_v12 }
 0xd0a   :  { %12476 = vmatprep.subr.bf16.mxu1 %v15477_v23 }
 0xd0d   :  { %12477 = vmatpush3.bf16.msra.mxu1 %v15477_v23 }
 0xd0e   :  { %12478 = vmatprep.subr.bf16.mxu1 %v15479_v41 }
 0xd11   :  { %12479 = vmatpush3.bf16.msra.mxu1 %v15479_v41 }
 0xd14   :  { %12481 = vmatmul.mubr.bf16.vlgmr.msra.gmra.mxu1 %v13081_v62 }
 0xd15   :  { %12484 = vmatprep.mubr.bf16.mxu1 %v13082_v8 }
 0xd1c   :  { %12485 = vmatmul.mubr.bf16.gmra.mxu1 %v13083_v5 }
 0xdb4   :  { %v12446_v1 = vpop.f32.mrf.mxu1  ;;  %v12458_v49 = vpop.f32.mrf.mxu0 }
 0xdb5   :  { %v15608_v22 = vadd.f32 %v12458_v49, %v12446_v1 }
 0xdb6   :  { %v7572_v25 = vpop.f32.mrf.mxu1  ;;  %v7661_v11 = vpop.f32.mrf.mxu0 }
 0xdb7   :  { %v15610_v15 = vadd.f32 %v7661_v11, %v7572_v25 }
 0xdb8   :  { %v12447_v10 = vpop.f32.mrf.mxu1  ;;  %v12459_v19 = vpop.f32.mrf.mxu0 }
 0xdb9   :  { %v15612_v20 = vadd.f32 %v12459_v19, %v12447_v10  ;;  %v13351_v10 = vmov 0.0   ;;  %v8141_v19 = vpop.permute.xlu0 %8140 }
 0xdba   :  { %v7575_v39 = vpop.f32.mrf.mxu1  ;;  %v7664_v56 = vpop.f32.mrf.mxu0 }
 0xdbb   :  { %v15614_v35 = vadd.f32 %v7664_v56, %v7575_v39 }
 0xdbc   :  { %v12450_v16 = vpop.f32.mrf.mxu1  ;;  %v12462_v30 = vpop.f32.mrf.mxu0 }
 0xdbd   :  { %v15616_v6 = vadd.f32 %v12462_v30, %v12450_v16  ;;  %v8131_v39 = vpop.permute.xlu0 %8130 }
 0xdbe   :  { %v7588_v24 = vpop.f32.mrf.mxu1  ;;  %v7677_v36 = vpop.f32.mrf.mxu0 }
 0xdbf   :  { %v7678_v9 = vadd.f32 %v7677_v36, %v7588_v24 }
 0xdc0   :  { %v12451_v46 = vpop.f32.mrf.mxu1  ;;  %v12463_v29 = vpop.f32.mrf.mxu0 }
 0xdc1   :  { %v7689_v26 = vadd.f32 %v12463_v29, %v12451_v46 }
 0xdc2   :  { %v7591_v55 = vpop.f32.mrf.mxu1 }
 0xdd4   :  { %v12482_v47 = vpop.f32.mrf.mxu1 }
 0xdd6   :  { %v7759_v14 = vpop.f32.mrf.mxu1 }
 0xdd8   :  { %v12483_v17 = vpop.f32.mrf.mxu1 }
 0xdd9   :  { %v7791_v27 = vpack.c.bf16 %v12483_v17, %v12482_v47 }
 0xdda   :  { %v7762_v38 = vpop.f32.mrf.mxu1 }
 0xddb   :  { %v7790_v40 = vpack.c.bf16 %v7762_v38, %v7759_v14 }
 0xddc   :  { %v12486_v54 = vpop.f32.mrf.mxu1 }
 0xddd   :  { %12492 = vmatprep.mubr.msk.bf16.mxu0 %vm7525_vm4, %v7790_v40 }
 0xdde   :  { %v7775_v42 = vpop.f32.mrf.mxu1  ;;  %12493 = vmatmul.mubr.msk.bf16.vlgmr.msra.gmra.mxu0 %vm7525_vm4, %v7791_v27 }
 0xddf   :  { %12501 = vmatpush3.bf16.msra.mxu0 %v15517_v0  ;;  %v7680_v0 = vpop.f32.mrf.mxu0 }
 0xde0   :  { %12502 = vmatprep.subr.bf16.mxu0 %v15519_v21  ;;  %v12487_v33 = vpop.f32.mrf.mxu1  ;;  %v7681_v7 = vadd.f32 %v7680_v0, %v7591_v55 }
 0xde1   :  { %v7793_v18 = vpack.c.bf16 %v12487_v33, %v12486_v54 }
 0xde2   :  { %v7778_v43 = vpop.f32.mrf.mxu1 }
 0xde3   :  { %v7792_v60 = vpack.c.bf16 %v7778_v43, %v7775_v42  ;;  %12503 = vmatpush3.bf16.msra.mxu0 %v15519_v21 }
 0xde4   :  { %12504 = vmatprep.subr.bf16.mxu0 %v15508_v2 }
 0xde5   :  { %12496 = vmatprep.mubr.msk.bf16.mxu0 %vm7525_vm4, %v7792_v60 }
 0xde6   :  { %12497 = vmatmul.mubr.msk.bf16.gmra.mxu0 %vm7525_vm4, %v7793_v18 }
 0xde7   :  { %12505 = vmatpush3.bf16.msra.mxu0 %v15508_v2  ;;  %12516 = vmatprep.mubr.bf16.mxu0 %v13084_v28  ;;  %v13085_v2 = vld [vmem:[%s15759_s7 + $0x68] sm:$0xff]  }
 0xde8   :  { %12506 = vmatprep.subr.bf16.mxu0 %v15511_v4 }
 0xdeb   :  { %12507 = vmatpush3.bf16.msra.mxu0 %v15511_v4  ;;  %v13089_v4 = vld [vmem:[#allocation2 + $0x30] sm:$0xff]  }
 0xdec   :  { %12508 = vmatprep.subr.bf16.mxu0 %v15487_v52 }
 0xdef   :  { %12509 = vmatpush3.bf16.msra.mxu0 %v15487_v52  ;;  %v13086_v52 = vld [vmem:[%s15759_s7 + $0x70] sm:$0xff]  }
 0xdf0   :  { %12510 = vmatprep.subr.bf16.mxu0 %v15492_v12 }
 0xdf3   :  { %12511 = vmatpush3.bf16.msra.mxu0 %v15492_v12  ;;  %v13087_v12 = vld [vmem:[%s15759_s7 + $0x78] sm:$0xff]  }
 0xdf4   :  { %12512 = vmatprep.subr.bf16.mxu0 %v15477_v23 }
 0xdf7   :  { %12513 = vmatpush3.bf16.msra.mxu0 %v15477_v23  ;;  %v13088_v23 = vld [vmem:[#allocation2 + $0x38] sm:$0xff]  }
 0xdf8   :  { %12514 = vmatprep.subr.bf16.mxu0 %v15479_v41  ;;  %12524 = vmatprep.subr.bf16.mxu1 %v13088_v23 }
 0xdf9   :  { %12525 = vmatpush3.bf16.msra.mxu1 %v13088_v23 }
 0xdfa   :  { %12526 = vmatprep.subr.bf16.mxu1 %v13089_v4 }
 0xdfb   :  { %12515 = vmatpush3.bf16.msra.mxu0 %v15479_v41 }
 0xdfc   :  { %12548 = vmatprep.subr.bf16.mxu0 %v13351_v10 }
 0xdfd   :  { %12527 = vmatpush3.bf16.msra.mxu1 %v13089_v4 }
 0xdfe   :  { %12517 = vmatmul.mubr.bf16.vlgmr.msra.gmra.mxu0 %v13085_v2  ;;  %12536 = vmatprep.subr.bf16.mxu1 %v13351_v10 }
 0xdff   :  { %12520 = vmatprep.mubr.bf16.mxu0 %v13086_v52 }
 0xe06   :  { %12521 = vmatmul.mubr.bf16.gmra.mxu0 %v13087_v12 }
 0xe07   :  { %12556 = vmatprep.mubr.msk.bf16.mxu0 %vm13352_vm5, %v13351_v10 }
 0xe9e   :  { %v12494_v21 = vpop.f32.mrf.mxu0 }
 0xe9f   :  { %v7890_v41 = vadd.f32 %v12494_v21, %v15608_v22 }
 0xea0   :  { %v7857_v50 = vpop.f32.mrf.mxu0 }
 0xea1   :  { %v7888_v31 = vadd.f32 %v7857_v50, %v15610_v15 }
 0xea2   :  { %v12495_v53 = vpop.f32.mrf.mxu0 }
 0xea3   :  { %v7891_v61 = vadd.f32 %v12495_v53, %v15612_v20  ;;  %v8146_v20 = vpop.permute.xlu1 %8145 }
 0xea4   :  { %v7860_v37 = vpop.f32.mrf.mxu0 }
 0xea5   :  { %v7889_v13 = vadd.f32 %v7860_v37, %v15614_v35  ;;  %v8121_v35 = vpop.permute.xlu0 %8120 }
 0xea6   :  { %v12498_v51 = vpop.f32.mrf.mxu0 }
 0xea7   :  { %v7894_v32 = vadd.f32 %v12498_v51, %v15616_v6  ;;  %v8136_v56 = vpop.permute.xlu1 %8135 }
 0xea8   :  { %v7873_v58 = vpop.f32.mrf.mxu0 }
 0xea9   :  { %v7892_v34 = vadd.f32 %v7873_v58, %v7678_v9  ;;  %v13092_v58 = vld [vmem:[#allocation4 + $0x1e4] ss:$16 sps:$4 sm:$0xff]  }
 0xeaa   :  { %v12499_v48 = vpop.f32.mrf.mxu0 }
 0xeab   :  { %v7895_v44 = vadd.f32 %v12499_v48, %v7689_v26  ;;  %v8126_v6 = vpop.permute.xlu1 %8125  ;;  %v8111_v26 = vpop.permute.xlu0 %8110  ;;  %v10982_v48 = vld [vmem:[%s15762_s10 + $0x2] sm:$0x3] }
 0xeac   :  { %v7876_v57 = vpop.f32.mrf.mxu0 }
 0xead   :  { %v7893_v63 = vadd.f32 %v7876_v57, %v7681_v7  ;;  %v8168_v7 = vld [vmem:[%s15762_s10] sm:$0x3]  ;;  %v13093_v57 = vld [vmem:[#allocation4 + $0x1e8] ss:$16 sps:$4 sm:$0xff]  }
 0xeaf   :  { %v8116_v38 = vpop.permute.xlu1 %8115 }
 0xebe   :  { %v12518_v3 = vpop.f32.mrf.mxu0 }
 0xec0   :  { %v7963_v45 = vpop.f32.mrf.mxu0 }
 0xec2   :  { %v12519_v59 = vpop.f32.mrf.mxu0 }
 0xec3   :  { %v7995_v5 = vpack.c.bf16 %v12519_v59, %v12518_v3  ;;  %v13101_v3 = vld [vmem:[#allocation4 + $0x1cc] ss:$16 sps:$4 sm:$0xff]   ;;  %v13099_v59 = vld [vmem:[#allocation4 + $0x1c8] ss:$16 sps:$4 sm:$0xff]  }
 0xec4   :  { %v7966_v62 = vpop.f32.mrf.mxu0 }
 0xec5   :  { %v7994_v8 = vpack.c.bf16 %v7966_v62, %v7963_v45  ;;  %v13096_v45 = vld [vmem:[#allocation4 + $0x1c0] ss:$16 sps:$4 sm:$0xff]   ;;  %v13104_v62 = vld [vmem:[#allocation4 + $0x1a4] ss:$16 sps:$4 sm:$0xff]  }
 0xec6   :  { %v12522_v1 = vpop.f32.mrf.mxu0 }
 0xec7   :  { %12528 = vmatprep.mubr.msk.bf16.mxu1 %vm7525_vm4, %v7994_v8  ;;  %v13107_v8 = vld [vmem:[#allocation4 + $0x1ac] ss:$16 sps:$4 sm:$0xff]  }
 0xec8   :  { %v7979_v49 = vpop.f32.mrf.mxu0  ;;  %12529 = vmatmul.mubr.msk.bf16.vlgmr.msra.gmra.mxu1 %vm7525_vm4, %v7995_v5  ;;  %v15778_v5 = vmov 0  }
 0xeca   :  { %v12523_v22 = vpop.f32.mrf.mxu0 }
 0xecb   :  { %v7997_v15 = vpack.c.bf16 %v12523_v22, %v12522_v1  ;;  %v13102_v1 = vld [vmem:[#allocation4 + $0x1a0] ss:$16 sps:$4 sm:$0xff]   ;;  %v13110_v22 = vld [vmem:[#allocation4 + $0x184] ss:$16 sps:$4 sm:$0xff]  }
 0xecc   :  { %v7982_v25 = vpop.f32.mrf.mxu0 }
 0xecd   :  { %v7996_v11 = vpack.c.bf16 %v7982_v25, %v7979_v49  ;;  %v13105_v49 = vld [vmem:[#allocation4 + $0x1a8] ss:$16 sps:$4 sm:$0xff]   ;;  %v13113_v25 = vld [vmem:[#allocation4 + $0x18c] ss:$16 sps:$4 sm:$0xff]  }
 0xecf   :  { %12532 = vmatprep.mubr.msk.bf16.mxu1 %vm7525_vm4, %v7996_v11  ;;  %v13108_v11 = vld [vmem:[#allocation4 + $0x180] ss:$16 sps:$4 sm:$0xff]  }
 0xed0   :  { %12533 = vmatmul.mubr.msk.bf16.gmra.mxu1 %vm7525_vm4, %v7997_v15  ;;  %v13111_v15 = vld [vmem:[#allocation4 + $0x188] ss:$16 sps:$4 sm:$0xff]  }
 0xed1   :  { %12544 = vmatprep.mubr.msk.bf16.mxu1 %vm13352_vm5, %v13351_v10 }
 0xf88   :  { %v12530_v16 = vpop.f32.mrf.mxu1 }
 0xf89   :  { %v8094_v30 = vadd.f32 %v12530_v16, %v7890_v41  ;;  %v13125_v16 = vld [vmem:[#allocation4 + $0x14c] ss:$16 sps:$4 sm:$0xff]  }
 0xf8a   :  { %v8061_v24 = vpop.f32.mrf.mxu1 }
 0xf8b   :  { %v8092_v36 = vadd.f32 %v8061_v24, %v7888_v31  ;;  %v8150_v46 = vadd.f32 %v8121_v35, %v8094_v30  ;;  %v13122_v35 = vld [vmem:[#allocation4 + $0x144] ss:$16 sps:$4 sm:$0xff]   ;;  %v13120_v30 = vld [vmem:[#allocation4 + $0x140] ss:$16 sps:$4 sm:$0xff]  }
 0xf8c   :  { %v12531_v9 = vpop.f32.mrf.mxu1  ;;  %v13128_v24 = vld [vmem:[#allocation4 + $0x124] ss:$16 sps:$4 sm:$0xff]  }
 0xf8d   :  { %v8095_v29 = vadd.f32 %v12531_v9, %v7891_v61  ;;  %v8148_v47 = vadd.f32 %v8111_v26, %v8092_v36  ;;  %v8158_v27 = vmax.f32 %v8150_v46, 0.0  ;;  %v13131_v36 = vld [vmem:[#allocation4 + $0x12c] ss:$16 sps:$4 sm:$0xff]   ;;  %v13126_v9 = vld [vmem:[#allocation4 + $0x120] ss:$16 sps:$4 sm:$0xff]  }
 0xf8e   :  { %v8064_v55 = vpop.f32.mrf.mxu1  ;;  %v13129_v46 = vld [vmem:[#allocation4 + $0x128] ss:$16 sps:$4 sm:$0xff]   ;;  %v13137_v26 = vld [vmem:[#allocation4 + $0x10c] ss:$16 sps:$4 sm:$0xff]  }
 0xf8f   :  { %v8151_v14 = vadd.f32 %v8126_v6, %v8095_v29  ;;  %v8093_v17 = vadd.f32 %v8064_v55, %v7889_v13  ;;  %v8156_v43 = vmax.f32 %v8148_v47, 0.0  ;;  %v13123_v6 = vld [vmem:[#allocation4 + $0x148] ss:$16 sps:$4 sm:$0xff]   ;;  %v13134_v29 = vld [vmem:[#allocation4 + $0x104] ss:$16 sps:$4 sm:$0xff]  }
 0xf90   :  { %v12534_v40 = vpop.f32.mrf.mxu1  ;;  %v13132_v55 = vld [vmem:[#allocation4 + $0x100] ss:$16 sps:$4 sm:$0xff]   ;;  %v13135_v47 = vld [vmem:[#allocation4 + $0x108] ss:$16 sps:$4 sm:$0xff]  }
 0xf91   :  { %v8159_v54 = vmax.f32 %v8151_v14, 0.0  ;;  %v8149_v42 = vadd.f32 %v8116_v38, %v8093_v17  ;;  %v8098_v33 = vadd.f32 %v12534_v40, %v7894_v32  ;;  %v13140_v14 = vld [vmem:[#allocation4 + $0xe4] ss:$16 sps:$4 sm:$0xff]   ;;  %v13143_v17 = vld [vmem:[#allocation4 + $0xec] ss:$16 sps:$4 sm:$0xff]  }
 0xf92   :  { %v8077_v18 = vpop.f32.mrf.mxu1  ;;  %v13138_v40 = vld [vmem:[#allocation4 + $0xe0] ss:$16 sps:$4 sm:$0xff]  }
 0xf93   :  { %v15664_v60 = vpack.c.bf16 %v8159_v54, %v8158_v27  ;;  %v8157_v28 = vmax.f32 %v8149_v42, 0.0  ;;  %v8096_v2 = vadd.f32 %v8077_v18, %v7892_v34  ;;  %v8154_v23 = vadd.f32 %v8141_v19, %v8098_v33  ;;  %v13095_v34 = vld [vmem:[#allocation4 + $0x1ec] ss:$16 sps:$4 sm:$0xff]   ;;  %v13116_v19 = vld [vmem:[#allocation4 + $0x164] ss:$16 sps:$4 sm:$0xff]  }
 0xf94   :  { %v12535_v52 = vpop.f32.mrf.mxu1  ;;  %v13141_v27 = vld [vmem:[#allocation4 + $0xe8] ss:$16 sps:$4 sm:$0xff]   ;;  %v13146_v33 = vld [vmem:[#allocation4 + $0xc4] ss:$16 sps:$4 sm:$0xff]   ;;  %v13149_v18 = vld [vmem:[#allocation4 + $0xcc] ss:$16 sps:$4 sm:$0xff]  }
 0xf95   :  { %v15666_v12 = vpack.c.bf16 %v8157_v28, %v8156_v43  ;;  %v8099_v4 = vadd.f32 %v12535_v52, %v7895_v44  ;;  %v8152_v21 = vadd.f32 %v8131_v39, %v8096_v2  ;;  %v8162_v31 = vmax.f32 %v8154_v23, 0.0  ;;  %v13090_v44 = vld [vmem:[#allocation4 + $0x1e0] ss:$16 sps:$4 sm:$0xff]   ;;  %v13147_v52 = vld [vmem:[#allocation4 + $0xc8] ss:$16 sps:$4 sm:$0xff]  }
 0xf96   :  { %v8080_v0 = vpop.f32.mrf.mxu1  ;;  %v13114_v39 = vld [vmem:[#allocation4 + $0x160] ss:$16 sps:$4 sm:$0xff]  }
 0xf97   :  { %v8155_v41 = vadd.f32 %v8146_v20, %v8099_v4  ;;  %v8097_v50 = vadd.f32 %v8080_v0, %v7893_v63  ;;  %v8160_v37 = vmax.f32 %v8152_v21, 0.0  ;;  %v13098_v63 = vld [vmem:[#allocation4 + $0x1c4] ss:$16 sps:$4 sm:$0xff]   ;;  %v13119_v20 = vld [vmem:[#allocation4 + $0x16c] ss:$16 sps:$4 sm:$0xff]  }
 0xf98   :  { %v13144_v2 = vld [vmem:[#allocation4 + $0xc0] ss:$16 sps:$4 sm:$0xff]   ;;  %v13152_v0 = vld [vmem:[#allocation4 + $0xa4] ss:$16 sps:$4 sm:$0xff]   ;;  %v13155_v21 = vld [vmem:[#allocation4 + $0xac] ss:$16 sps:$4 sm:$0xff]  }
 0xf99   :  { %v8163_v53 = vmax.f32 %v8155_v41, 0.0  ;;  %v8153_v61 = vadd.f32 %v8136_v56, %v8097_v50  ;;  %v13117_v56 = vld [vmem:[#allocation4 + $0x168] ss:$16 sps:$4 sm:$0xff]  }
 0xf9b   :  { %v15668_v13 = vpack.c.bf16 %v8163_v53, %v8162_v31  ;;  %v8161_v51 = vmax.f32 %v8153_v61, 0.0  ;;  %v13150_v31 = vld [vmem:[#allocation4 + $0xa0] ss:$16 sps:$4 sm:$0xff]   ;;  %v13153_v53 = vld [vmem:[#allocation4 + $0xa8] ss:$16 sps:$4 sm:$0xff]  }
 0xf9c   :  { %v13158_v61 = vld [vmem:[#allocation4 + $0x84] ss:$16 sps:$4 sm:$0xff]  }
 0xf9d   :  { %v15670_v32 = vpack.c.bf16 %v8161_v51, %v8160_v37  ;;  %12537 = vmatpush3.bf16.msra.mxu1 %v15668_v13  ;;  %12549 = vmatpush3.bf16.msra.mxu0 %v15668_v13  ;;  %v13161_v37 = vld [vmem:[#allocation4 + $0x8c] ss:$16 sps:$4 sm:$0xff]   ;;  %v13156_v51 = vld [vmem:[#allocation4 + $0x80] ss:$16 sps:$4 sm:$0xff]  }
 0xf9e   :  { %12538 = vmatprep.subr.bf16.mxu1 %v13351_v10  ;;  %12550 = vmatprep.subr.bf16.mxu0 %v13351_v10 }
 0xfa1   :  { %12539 = vmatpush3.bf16.msra.mxu1 %v15670_v32  ;;  %12551 = vmatpush3.bf16.msra.mxu0 %v15670_v32 }
 0xfa2   :  { %12540 = vmatprep.subr.bf16.mxu1 %v13351_v10  ;;  %12552 = vmatprep.subr.bf16.mxu0 %v13351_v10 }
 0xfa5   :  { %12541 = vmatpush3.bf16.msra.mxu1 %v15664_v60  ;;  %12553 = vmatpush3.bf16.msra.mxu0 %v15664_v60 }
 0xfa6   :  { %12542 = vmatprep.subr.bf16.mxu1 %v13351_v10  ;;  %12554 = vmatprep.subr.bf16.mxu0 %v13351_v10 }
 0xfa9   :  { %12543 = vmatpush3.bf16.msra.mxu1 %v15666_v12  ;;  %12555 = vmatpush3.bf16.msra.mxu0 %v15666_v12 }
 0xfaa   :  { %8484 = vmatprep.subr.bf16.mxu1 %v13092_v58  ;;  %8525 = vmatprep.subr.bf16.mxu0 %v13095_v34  ;;  %v13159_v58 = vld [vmem:[#allocation4 + $0x88] ss:$16 sps:$4 sm:$0xff]   ;;  %v13164_v34 = vld [vmem:[#allocation4 + $0x64] ss:$16 sps:$4 sm:$0xff]  }
 0xfac   :  { %12557 = vmatmul.mubr.msk.bf16.vlgmr.msra.gmra.mxu0 %vm4586_vm3, %v10982_v48  ;;  %12545 = vmatmul.mubr.msk.bf16.vlgmr.msra.gmra.mxu1 %vm4586_vm3, %v8168_v7  ;;  %v13167_v48 = vld [vmem:[#allocation4 + $0x6c] ss:$16 sps:$4 sm:$0xff]   ;;  %v13162_v7 = vld [vmem:[#allocation4 + $0x60] ss:$16 sps:$4 sm:$0xff]  }
 0xfad   :  { %8485 = vmatpush1.bf16.msra.mxu1 %v13090_v44  ;;  %8526 = vmatpush1.bf16.msra.mxu0 %v13093_v57  ;;  %v13165_v44 = vld [vmem:[#allocation4 + $0x68] ss:$16 sps:$4 sm:$0xff]   ;;  %v13170_v57 = vld [vmem:[#allocation4 + $0x44] ss:$16 sps:$4 sm:$0xff]  }
 0xfae   :  { %8486 = vmatprep.subr.bf16.mxu1 %v13098_v63  ;;  %8527 = vmatprep.subr.bf16.mxu0 %v13101_v3  ;;  %v13173_v63 = vld [vmem:[#allocation4 + $0x4c] ss:$16 sps:$4 sm:$0xff]   ;;  %v13168_v3 = vld [vmem:[#allocation4 + $0x40] ss:$16 sps:$4 sm:$0xff]  }
 0xfaf   :  { %8516 = vmatprep.mubr.bf16.mxu1 %v15778_v5  ;;  %8557 = vmatprep.mubr.bf16.mxu0 %v15778_v5 }
 0xfb1   :  { %8487 = vmatpush1.bf16.msra.mxu1 %v13096_v45  ;;  %8528 = vmatpush1.bf16.msra.mxu0 %v13099_v59  ;;  %v13171_v45 = vld [vmem:[#allocation4 + $0x48] ss:$16 sps:$4 sm:$0xff]   ;;  %v13176_v59 = vld [vmem:[#allocation4 + $0x24] ss:$16 sps:$4 sm:$0xff]  }
 0xfb2   :  { %8488 = vmatprep.subr.bf16.mxu1 %v13104_v62  ;;  %8529 = vmatprep.subr.bf16.mxu0 %v13107_v8  ;;  %v13179_v62 = vld [vmem:[#allocation4 + $0x2c] ss:$16 sps:$4 sm:$0xff]   ;;  %v13174_v8 = vld [vmem:[#allocation4 + $0x20] ss:$16 sps:$4 sm:$0xff]  }
 0xfb5   :  { %8489 = vmatpush1.bf16.msra.mxu1 %v13102_v1  ;;  %8530 = vmatpush1.bf16.msra.mxu0 %v13105_v49  ;;  %v13177_v1 = vld [vmem:[#allocation4 + $0x28] ss:$16 sps:$4 sm:$0xff]   ;;  %v13182_v49 = vld [vmem:[#allocation4 + $0x4] ss:$16 sps:$4 sm:$0xff]  }
 0xfb6   :  { %8490 = vmatprep.subr.bf16.mxu1 %v13110_v22  ;;  %8531 = vmatprep.subr.bf16.mxu0 %v13113_v25  ;;  %v13185_v22 = vld [vmem:[#allocation4 + $0xc] ss:$16 sps:$4 sm:$0xff]   ;;  %v13180_v25 = vld [vmem:[#allocation4] ss:$16 sps:$4 sm:$0xff]  }
 0xfb9   :  { %8491 = vmatpush1.bf16.msra.mxu1 %v13108_v11  ;;  %8532 = vmatpush1.bf16.msra.mxu0 %v13111_v15  ;;  %v13183_v11 = vld [vmem:[#allocation4 + $0x8] ss:$16 sps:$4 sm:$0xff]  }
 0xfba   :  { %8492 = vmatprep.subr.bf16.mxu1 %v13116_v19  ;;  %8533 = vmatprep.subr.bf16.mxu0 %v13119_v20  ;;  %v11048_v19 = vld [vmem:[%s15762_s10 + $0x4] sm:$0x3]  ;;  %v13186_v20 = vld [vmem:[#allocation4 + $0x2e0] ss:$16 sps:$4 sm:$0xff]  }
 0xfbd   :  { %8493 = vmatpush1.bf16.msra.mxu1 %v13114_v39  ;;  %8534 = vmatpush1.bf16.msra.mxu0 %v13117_v56  ;;  %v13188_v39 = vld [vmem:[#allocation4 + $0x2e4] ss:$16 sps:$4 sm:$0xff]   ;;  %v13189_v56 = vld [vmem:[#allocation4 + $0x2e8] ss:$16 sps:$4 sm:$0xff]  }
 0xfbe   :  { %8494 = vmatprep.subr.bf16.mxu1 %v13122_v35  ;;  %8535 = vmatprep.subr.bf16.mxu0 %v13125_v16  ;;  %v13191_v35 = vld [vmem:[#allocation4 + $0x2ec] ss:$16 sps:$4 sm:$0xff]   ;;  %v13194_v16 = vld [vmem:[#allocation4 + $0x2c4] ss:$16 sps:$4 sm:$0xff]  }
 0xfc1   :  { %8495 = vmatpush1.bf16.msra.mxu1 %v13120_v30  ;;  %8536 = vmatpush1.bf16.msra.mxu0 %v13123_v6  ;;  %v13197_v30 = vld [vmem:[#allocation4 + $0x2cc] ss:$16 sps:$4 sm:$0xff]   ;;  %v13192_v6 = vld [vmem:[#allocation4 + $0x2c0] ss:$16 sps:$4 sm:$0xff]  }
 0xfc2   :  { %8496 = vmatprep.subr.bf16.mxu1 %v13128_v24  ;;  %8537 = vmatprep.subr.bf16.mxu0 %v13131_v36  ;;  %v13195_v24 = vld [vmem:[#allocation4 + $0x2c8] ss:$16 sps:$4 sm:$0xff]   ;;  %v13200_v36 = vld [vmem:[#allocation4 + $0x2a4] ss:$16 sps:$4 sm:$0xff]  }
 0xfc5   :  { %8497 = vmatpush1.bf16.msra.mxu1 %v13126_v9  ;;  %8538 = vmatpush1.bf16.msra.mxu0 %v13129_v46  ;;  %v13203_v9 = vld [vmem:[#allocation4 + $0x2ac] ss:$16 sps:$4 sm:$0xff]   ;;  %v13198_v46 = vld [vmem:[#allocation4 + $0x2a0] ss:$16 sps:$4 sm:$0xff]  }
 0xfc6   :  { %8498 = vmatprep.subr.bf16.mxu1 %v13134_v29  ;;  %8539 = vmatprep.subr.bf16.mxu0 %v13137_v26  ;;  %v13201_v29 = vld [vmem:[#allocation4 + $0x2a8] ss:$16 sps:$4 sm:$0xff]   ;;  %v13206_v26 = vld [vmem:[#allocation4 + $0x284] ss:$16 sps:$4 sm:$0xff]  }
 0xfc9   :  { %8499 = vmatpush1.bf16.msra.mxu1 %v13132_v55  ;;  %8540 = vmatpush1.bf16.msra.mxu0 %v13135_v47  ;;  %v13209_v55 = vld [vmem:[#allocation4 + $0x28c] ss:$16 sps:$4 sm:$0xff]   ;;  %v13204_v47 = vld [vmem:[#allocation4 + $0x280] ss:$16 sps:$4 sm:$0xff]  }
 0xfca   :  { %8726 = vmatprep.subr.bf16.mxu1 %v13140_v14  ;;  %8767 = vmatprep.subr.bf16.mxu0 %v13143_v17  ;;  %v13207_v14 = vld [vmem:[#allocation4 + $0x288] ss:$16 sps:$4 sm:$0xff]   ;;  %v13212_v17 = vld [vmem:[#allocation4 + $0x264] ss:$16 sps:$4 sm:$0xff]  }
0x106c   :  { %v8284_v38 = vpop.f32.mrf.mxu0  ;;  %v15696_v54 = vpop.f32.mrf.mxu1 }
0x106d   :  { %v8290_v42 = vpack.c.bf16 %v8284_v38, %v8284_v38  ;;  %v8212_v15 = vpack.c.bf16 %v15696_v54, %v15696_v54  ;;  %v13210_v38 = vld [vmem:[#allocation4 + $0x260] ss:$16 sps:$4 sm:$0xff]  }
0x106e   :  { %v12558_v43 = vpop.f32.mrf.mxu0  ;;  %v12546_v28 = vpop.f32.mrf.mxu1  ;;  %v13216_v54 = vld [vmem:[#allocation4 + $0x240] ss:$16 sps:$4 sm:$0xff]  }
0x106f   :  { %8517 = vmatmul.mubr.bf16.vlgmr.msra.gmra.mxu1 %v8290_v42  ;;  %8558 = vmatmul.mubr.bf16.vlgmr.msra.gmra.mxu0 %v8290_v42  ;;  %v13218_v42 = vld [vmem:[#allocation4 + $0x244] ss:$16 sps:$4 sm:$0xff]   ;;  %v13227_v28 = vld [vmem:[#allocation4 + $0x22c] ss:$16 sps:$4 sm:$0xff]  }
0x1070   :  { %8727 = vmatpush1.bf16.msra.mxu1 %v13138_v40  ;;  %8768 = vmatpush1.bf16.msra.mxu0 %v13141_v27  ;;  %v8287_v23 = vpop.f32.mrf.mxu0  ;;  %v8209_v4 = vpop.f32.mrf.mxu1  ;;  %v13215_v40 = vld [vmem:[#allocation4 + $0x26c] ss:$16 sps:$4 sm:$0xff]   ;;  %v13213_v27 = vld [vmem:[#allocation4 + $0x268] ss:$16 sps:$4 sm:$0xff]   ;;  %v13224_v43 = vld [vmem:[#allocation4 + $0x224] ss:$16 sps:$4 sm:$0xff]  }
0x1071   :  { %8728 = vmatprep.subr.bf16.mxu1 %v13146_v33  ;;  %8769 = vmatprep.subr.bf16.mxu0 %v13149_v18  ;;  %v13219_v33 = vld [vmem:[#allocation4 + $0x248] ss:$16 sps:$4 sm:$0xff]   ;;  %v13221_v18 = vld [vmem:[#allocation4 + $0x24c] ss:$16 sps:$4 sm:$0xff]   ;;  %v13230_v23 = vld [vmem:[#allocation4 + $0x204] ss:$16 sps:$4 sm:$0xff]  }
0x1072   :  { %v12559_v41 = vpop.f32.mrf.mxu0  ;;  %8758 = vmatprep.mubr.bf16.mxu1 %v15778_v5  ;;  %8799 = vmatprep.mubr.bf16.mxu0 %v15778_v5  ;;  %v12547_v50 = vpop.f32.mrf.mxu1  ;;  %v13233_v4 = vld [vmem:[#allocation4 + $0x20c] ss:$16 sps:$4 sm:$0xff]  }
0x1073   :  { %v13236_v41 = vld [vmem:[#allocation4 + $0x3e4] ss:$16 sps:$4 sm:$0xff]  }
0x1074   :  { %8729 = vmatpush1.bf16.msra.mxu1 %v13144_v2  ;;  %8770 = vmatpush1.bf16.msra.mxu0 %v13147_v52  ;;  %v13222_v2 = vld [vmem:[#allocation4 + $0x220] ss:$16 sps:$4 sm:$0xff]   ;;  %v13225_v52 = vld [vmem:[#allocation4 + $0x228] ss:$16 sps:$4 sm:$0xff]  }
0x1075   :  { %8730 = vmatprep.subr.bf16.mxu1 %v13152_v0  ;;  %8771 = vmatprep.subr.bf16.mxu0 %v13155_v21  ;;  %v13228_v0 = vld [vmem:[#allocation4 + $0x200] ss:$16 sps:$4 sm:$0xff]   ;;  %v13231_v21 = vld [vmem:[#allocation4 + $0x208] ss:$16 sps:$4 sm:$0xff]  }
0x1078   :  { %8731 = vmatpush1.bf16.msra.mxu1 %v13150_v31  ;;  %8772 = vmatpush1.bf16.msra.mxu0 %v13153_v53 }
0x1079   :  { %8732 = vmatprep.subr.bf16.mxu1 %v13158_v61  ;;  %8773 = vmatprep.subr.bf16.mxu0 %v13161_v37 }
0x107c   :  { %8733 = vmatpush1.bf16.msra.mxu1 %v13156_v51  ;;  %8774 = vmatpush1.bf16.msra.mxu0 %v13159_v58 }
0x107d   :  { %8734 = vmatprep.subr.bf16.mxu1 %v13164_v34  ;;  %8775 = vmatprep.subr.bf16.mxu0 %v13167_v48 }
0x1080   :  { %8735 = vmatpush1.bf16.msra.mxu1 %v13162_v7  ;;  %8776 = vmatpush1.bf16.msra.mxu0 %v13165_v44 }
0x1081   :  { %8736 = vmatprep.subr.bf16.mxu1 %v13170_v57  ;;  %8777 = vmatprep.subr.bf16.mxu0 %v13173_v63 }
0x1084   :  { %8737 = vmatpush1.bf16.msra.mxu1 %v13168_v3  ;;  %8778 = vmatpush1.bf16.msra.mxu0 %v13171_v45 }
0x1085   :  { %8738 = vmatprep.subr.bf16.mxu1 %v13176_v59  ;;  %8779 = vmatprep.subr.bf16.mxu0 %v13179_v62 }
0x1088   :  { %8739 = vmatpush1.bf16.msra.mxu1 %v13174_v8  ;;  %8780 = vmatpush1.bf16.msra.mxu0 %v13177_v1 }
0x1089   :  { %8740 = vmatprep.subr.bf16.mxu1 %v13182_v49  ;;  %8781 = vmatprep.subr.bf16.mxu0 %v13185_v22 }
0x108c   :  { %8741 = vmatpush1.bf16.msra.mxu1 %v13180_v25  ;;  %8782 = vmatpush1.bf16.msra.mxu0 %v13183_v11  ;;  %v13234_v11 = vld [vmem:[#allocation4 + $0x3e0] ss:$16 sps:$4 sm:$0xff]  }
0x108d   :  { %12560 = vmatprep.subr.bf16.mxu1 %v13351_v10  ;;  %9047 = vmatprep.subr.bf16.mxu0 %v13188_v39  ;;  %v13240_v39 = vld [vmem:[#allocation4 + $0x3c0] ss:$16 sps:$4 sm:$0xff]  }
0x108f   :  { %8759 = vmatmul.mubr.bf16.vlgmr.msra.gmra.mxu1 %v8212_v15  ;;  %8800 = vmatmul.mubr.bf16.vlgmr.msra.gmra.mxu0 %v8212_v15 }
0x1090   :  { %12561 = vmatpush3.bf16.msra.mxu1 %v15668_v13  ;;  %12568 = vmatprep.mubr.msk.bf16.mxu1 %vm13352_vm5, %v13351_v10 }
0x1091   :  { %12562 = vmatprep.subr.bf16.mxu1 %v13351_v10  ;;  %9079 = vmatprep.mubr.bf16.mxu0 %v15778_v5 }
0x1092   :  { %9048 = vmatpush1.bf16.msra.mxu0 %v13186_v20 }
0x1093   :  { %9049 = vmatprep.subr.bf16.mxu0 %v13194_v16  ;;  %v13246_v16 = vld [vmem:[#allocation4 + $0x3a0] ss:$16 sps:$4 sm:$0xff]  }
0x1094   :  { %12563 = vmatpush3.bf16.msra.mxu1 %v15670_v32 }
0x1095   :  { %12564 = vmatprep.subr.bf16.mxu1 %v13351_v10 }
0x1096   :  { %9050 = vmatpush1.bf16.msra.mxu0 %v13192_v6  ;;  %v13252_v6 = vld [vmem:[#allocation4 + $0x380] ss:$16 sps:$4 sm:$0xff]  }
0x1097   :  { %9051 = vmatprep.subr.bf16.mxu0 %v13200_v36  ;;  %v13245_v36 = vld [vmem:[#allocation4 + $0x3cc] ss:$16 sps:$4 sm:$0xff]  }
0x1098   :  { %12565 = vmatpush3.bf16.msra.mxu1 %v15664_v60 }
0x1099   :  { %12566 = vmatprep.subr.bf16.mxu1 %v13351_v10 }
0x109a   :  { %9052 = vmatpush1.bf16.msra.mxu0 %v13198_v46  ;;  %v13255_v46 = vld [vmem:[#allocation4 + $0x388] ss:$16 sps:$4 sm:$0xff]  }
0x109b   :  { %9053 = vmatprep.subr.bf16.mxu0 %v13206_v26  ;;  %v13263_v26 = vld [vmem:[#allocation4 + $0x36c] ss:$16 sps:$4 sm:$0xff]  }
0x109c   :  { %12567 = vmatpush3.bf16.msra.mxu1 %v15666_v12 }
0x109d   :  { %9088 = vmatprep.subr.bf16.mxu1 %v13191_v35  ;;  %v13248_v35 = vld [vmem:[#allocation4 + $0x3a4] ss:$16 sps:$4 sm:$0xff]  }
0x109e   :  { %9054 = vmatpush1.bf16.msra.mxu0 %v13204_v47  ;;  %v13261_v47 = vld [vmem:[#allocation4 + $0x368] ss:$16 sps:$4 sm:$0xff]  }
0x109f   :  { %12569 = vmatmul.mubr.msk.bf16.vlgmr.msra.gmra.mxu1 %vm4586_vm3, %v11048_v19  ;;  %9055 = vmatprep.subr.bf16.mxu0 %v13212_v17  ;;  %v13242_v19 = vld [vmem:[#allocation4 + $0x3c4] ss:$16 sps:$4 sm:$0xff]   ;;  %v13267_v17 = vld [vmem:[#allocation4 + $0x348] ss:$16 sps:$4 sm:$0xff]  }
0x10a0   :  { %9120 = vmatprep.mubr.bf16.mxu1 %v15778_v5  ;;  %9089 = vmatpush1.bf16.msra.mxu1 %v13189_v56 }
0x10a1   :  { %9090 = vmatprep.subr.bf16.mxu1 %v13197_v30  ;;  %v13239_v30 = vld [vmem:[#allocation4 + $0x3ec] ss:$16 sps:$4 sm:$0xff]  }
0x10a2   :  { %9056 = vmatpush1.bf16.msra.mxu0 %v13210_v38  ;;  %v13269_v38 = vld [vmem:[#allocation4 + $0x34c] ss:$16 sps:$4 sm:$0xff]  }
0x10a3   :  { %9057 = vmatprep.subr.bf16.mxu0 %v13218_v42  ;;  %v13273_v42 = vld [vmem:[#allocation4 + $0x328] ss:$16 sps:$4 sm:$0xff]  }
0x10a4   :  { %9091 = vmatpush1.bf16.msra.mxu1 %v13195_v24  ;;  %v13237_v24 = vld [vmem:[#allocation4 + $0x3e8] ss:$16 sps:$4 sm:$0xff]  }
0x10a5   :  { %9092 = vmatprep.subr.bf16.mxu1 %v13203_v9  ;;  %v13249_v9 = vld [vmem:[#allocation4 + $0x3a8] ss:$16 sps:$4 sm:$0xff]  }
0x10a6   :  { %9058 = vmatpush1.bf16.msra.mxu0 %v13216_v54  ;;  %v13270_v54 = vld [vmem:[#allocation4 + $0x320] ss:$16 sps:$4 sm:$0xff]  }
0x10a7   :  { %9059 = vmatprep.subr.bf16.mxu0 %v13224_v43  ;;  %v13276_v43 = vld [vmem:[#allocation4 + $0x300] ss:$16 sps:$4 sm:$0xff]  }
0x10a8   :  { %9093 = vmatpush1.bf16.msra.mxu1 %v13201_v29  ;;  %v13260_v29 = vld [vmem:[#allocation4 + $0x364] ss:$16 sps:$4 sm:$0xff]  }
0x10a9   :  { %9094 = vmatprep.subr.bf16.mxu1 %v13209_v55  ;;  %v13258_v55 = vld [vmem:[#allocation4 + $0x360] ss:$16 sps:$4 sm:$0xff]  }
0x10aa   :  { %9060 = vmatpush1.bf16.msra.mxu0 %v13222_v2 }
0x10ab   :  { %9061 = vmatprep.subr.bf16.mxu0 %v13230_v23 }
0x10ac   :  { %9095 = vmatpush1.bf16.msra.mxu1 %v13207_v14  ;;  %v13266_v14 = vld [vmem:[#allocation4 + $0x344] ss:$16 sps:$4 sm:$0xff]  }
0x10ad   :  { %9096 = vmatprep.subr.bf16.mxu1 %v13215_v40  ;;  %v13272_v40 = vld [vmem:[#allocation4 + $0x324] ss:$16 sps:$4 sm:$0xff]  }
0x10ae   :  { %9062 = vmatpush1.bf16.msra.mxu0 %v13228_v0 }
0x10af   :  { %12572 = vmatprep.subr.bf16.mxu0 %v13351_v10 }
0x10b0   :  { %9097 = vmatpush1.bf16.msra.mxu1 %v13213_v27  ;;  %v13275_v27 = vld [vmem:[#allocation4 + $0x32c] ss:$16 sps:$4 sm:$0xff]  }
0x10b1   :  { %9098 = vmatprep.subr.bf16.mxu1 %v13221_v18  ;;  %v13281_v18 = vld [vmem:[#allocation4 + $0x30c] ss:$16 sps:$4 sm:$0xff]  }
0x10b4   :  { %9099 = vmatpush1.bf16.msra.mxu1 %v13219_v33  ;;  %v13278_v33 = vld [vmem:[#allocation4 + $0x304] ss:$16 sps:$4 sm:$0xff]  }
0x10b5   :  { %9100 = vmatprep.subr.bf16.mxu1 %v13227_v28  ;;  %v13279_v28 = vld [vmem:[#allocation4 + $0x308] ss:$16 sps:$4 sm:$0xff]  }
0x10b8   :  { %9101 = vmatpush1.bf16.msra.mxu1 %v13225_v52 }
0x10b9   :  { %9102 = vmatprep.subr.bf16.mxu1 %v13233_v4 }
0x10bc   :  { %9103 = vmatpush1.bf16.msra.mxu1 %v13231_v21 }
0x10bd   :  { %9372 = vmatprep.subr.bf16.mxu1 %v13236_v41 }
0x112f   :  { %v8518_v50 = vpop.f32.mrf.mxu1  ;;  %v8559_v31 = vpop.f32.mrf.mxu0 }
0x1131   :  { %v8520_v53 = vpop.f32.mrf.mxu1  ;;  %v8561_v61 = vpop.f32.mrf.mxu0 }
0x1133   :  { %v8522_v37 = vpop.f32.mrf.mxu1  ;;  %v8563_v51 = vpop.f32.mrf.mxu0 }
0x1135   :  { %v8523_v58 = vpop.f32.mrf.mxu1  ;;  %v8564_v34 = vpop.f32.mrf.mxu0 }
0x114f   :  { %v8760_v48 = vpop.f32.mrf.mxu1  ;;  %v8801_v7 = vpop.f32.mrf.mxu0 }
0x1150   :  { %v15719_v44 = vadd.f32 %v8760_v48, %v8518_v50  ;;  %v15721_v57 = vadd.f32 %v8801_v7, %v8559_v31 }
0x1151   :  { %v8762_v63 = vpop.f32.mrf.mxu1  ;;  %v8803_v3 = vpop.f32.mrf.mxu0 }
0x1152   :  { %v15723_v45 = vadd.f32 %v8762_v63, %v8520_v53  ;;  %v15725_v59 = vadd.f32 %v8803_v3, %v8561_v61 }
0x1153   :  { %v8764_v62 = vpop.f32.mrf.mxu1  ;;  %v8805_v8 = vpop.f32.mrf.mxu0 }
0x1155   :  { %v8765_v1 = vpop.f32.mrf.mxu1  ;;  %v8806_v49 = vpop.f32.mrf.mxu0 }
0x115f   :  { %v8847_v22 = vpop.f32.mrf.mxu1 }
0x1160   :  { %v8853_v25 = vpack.c.bf16 %v8847_v22, %v8847_v22 }
0x1161   :  { %v12570_v15 = vpop.f32.mrf.mxu1 }
0x1162   :  { %9080 = vmatmul.mubr.bf16.vlgmr.msra.gmra.mxu0 %v8853_v25  ;;  %9121 = vmatmul.mubr.bf16.vlgmr.msra.gmra.mxu1 %v8853_v25 }
0x1163   :  { %12573 = vmatpush3.bf16.msra.mxu0 %v15668_v13  ;;  %v8850_v20 = vpop.f32.mrf.mxu1  ;;  %12580 = vmatprep.mubr.msk.bf16.mxu0 %vm13352_vm5, %v13351_v10  ;;  %v13254_v13 = vld [vmem:[#allocation4 + $0x384] ss:$16 sps:$4 sm:$0xff]  }
0x1164   :  { %12574 = vmatprep.subr.bf16.mxu0 %v13351_v10  ;;  %9373 = vmatpush1.bf16.msra.mxu1 %v13234_v11 }
0x1165   :  { %v12571_v56 = vpop.f32.mrf.mxu1  ;;  %9374 = vmatprep.subr.bf16.mxu1 %v13242_v19  ;;  %9404 = vmatprep.mubr.bf16.mxu1 %v15778_v5 }
0x1167   :  { %12575 = vmatpush3.bf16.msra.mxu0 %v15670_v32  ;;  %v11082_v32 = vld [vmem:[%s15762_s10 + $0x6] sm:$0x3] }
0x1168   :  { %12576 = vmatprep.subr.bf16.mxu0 %v13351_v10  ;;  %9375 = vmatpush1.bf16.msra.mxu1 %v13240_v39 }
0x1169   :  { %9376 = vmatprep.subr.bf16.mxu1 %v13248_v35 }
0x116b   :  { %12577 = vmatpush3.bf16.msra.mxu0 %v15664_v60  ;;  %v13243_v60 = vld [vmem:[#allocation4 + $0x3c8] ss:$16 sps:$4 sm:$0xff]  }
0x116c   :  { %12578 = vmatprep.subr.bf16.mxu0 %v13351_v10  ;;  %9377 = vmatpush1.bf16.msra.mxu1 %v13246_v16  ;;  %v13251_v10 = vld [vmem:[#allocation4 + $0x3ac] ss:$16 sps:$4 sm:$0xff]  }
0x116d   :  { %9378 = vmatprep.subr.bf16.mxu1 %v13254_v13 }
0x116f   :  { %12579 = vmatpush3.bf16.msra.mxu0 %v15666_v12  ;;  %v13257_v12 = vld [vmem:[#allocation4 + $0x38c] ss:$16 sps:$4 sm:$0xff]  }
0x1170   :  { %9413 = vmatprep.subr.bf16.mxu0 %v13239_v30  ;;  %9379 = vmatpush1.bf16.msra.mxu1 %v13252_v6 }
0x1171   :  { %9380 = vmatprep.subr.bf16.mxu1 %v13260_v29 }
0x1172   :  { %12581 = vmatmul.mubr.msk.bf16.vlgmr.msra.gmra.mxu0 %vm4586_vm3, %v11082_v32 }
0x1173   :  { %9414 = vmatpush1.bf16.msra.mxu0 %v13237_v24  ;;  %9445 = vmatprep.mubr.bf16.mxu0 %v15778_v5  ;;  %v13264_v5 = vld [vmem:[#allocation4 + $0x340] ss:$16 sps:$4 sm:$0xff]  }
0x1174   :  { %9415 = vmatprep.subr.bf16.mxu0 %v13245_v36  ;;  %9381 = vmatpush1.bf16.msra.mxu1 %v13258_v55 }
0x1175   :  { %9382 = vmatprep.subr.bf16.mxu1 %v13266_v14 }
0x1177   :  { %9416 = vmatpush1.bf16.msra.mxu0 %v13243_v60 }
0x1178   :  { %9417 = vmatprep.subr.bf16.mxu0 %v13251_v10  ;;  %9383 = vmatpush1.bf16.msra.mxu1 %v13264_v5 }
0x1179   :  { %9384 = vmatprep.subr.bf16.mxu1 %v13272_v40 }
0x117b   :  { %9418 = vmatpush1.bf16.msra.mxu0 %v13249_v9 }
0x117c   :  { %9419 = vmatprep.subr.bf16.mxu0 %v13257_v12  ;;  %9385 = vmatpush1.bf16.msra.mxu1 %v13270_v54 }
0x117d   :  { %9386 = vmatprep.subr.bf16.mxu1 %v13278_v33 }
0x117f   :  { %9420 = vmatpush1.bf16.msra.mxu0 %v13255_v46 }
0x1180   :  { %9421 = vmatprep.subr.bf16.mxu0 %v13263_v26  ;;  %9387 = vmatpush1.bf16.msra.mxu1 %v13276_v43 }
0x1183   :  { %9422 = vmatpush1.bf16.msra.mxu0 %v13261_v47 }
0x1184   :  { %9423 = vmatprep.subr.bf16.mxu0 %v13269_v38 }
0x1187   :  { %9424 = vmatpush1.bf16.msra.mxu0 %v13267_v17 }
0x1188   :  { %9425 = vmatprep.subr.bf16.mxu0 %v13275_v27 }
0x118b   :  { %9426 = vmatpush1.bf16.msra.mxu0 %v13273_v42 }
0x118c   :  { %9427 = vmatprep.subr.bf16.mxu0 %v13281_v18 }
0x118f   :  { %9428 = vmatpush1.bf16.msra.mxu0 %v13279_v28 }
0x1222   :  { %v9081_v2 = vpop.f32.mrf.mxu0  ;;  %v9122_v52 = vpop.f32.mrf.mxu1 }
0x1223   :  { %v9129_v23 = vadd.f32 %v9081_v2, %v15719_v44  ;;  %v9131_v4 = vadd.f32 %v9122_v52, %v15721_v57  ;;  %v9462_v57 = vpop.permute.xlu0 %9461 }
0x1224   :  { %v9083_v0 = vpop.f32.mrf.mxu0  ;;  %v9124_v21 = vpop.f32.mrf.mxu1 }
0x1225   :  { %v9130_v41 = vadd.f32 %v9083_v0, %v15723_v45  ;;  %v9132_v50 = vadd.f32 %v9124_v21, %v15725_v59 }
0x1226   :  { %v9085_v31 = vpop.f32.mrf.mxu0  ;;  %v9126_v53 = vpop.f32.mrf.mxu1 }
0x1228   :  { %v9086_v61 = vpop.f32.mrf.mxu0  ;;  %v9127_v37 = vpop.f32.mrf.mxu1 }
0x1232   :  { %v9172_v51 = vpop.f32.mrf.mxu0 }
0x1233   :  { %v9178_v58 = vpack.c.bf16 %v9172_v51, %v9172_v51 }
0x1234   :  { %v12582_v34 = vpop.f32.mrf.mxu0 }
0x1235   :  { %9405 = vmatmul.mubr.bf16.vlgmr.msra.gmra.mxu1 %v9178_v58  ;;  %9446 = vmatmul.mubr.bf16.vlgmr.msra.gmra.mxu0 %v9178_v58 }
0x1236   :  { %v9175_v48 = vpop.f32.mrf.mxu0 }
0x1238   :  { %v12583_v7 = vpop.f32.mrf.mxu0 }
0x12f5   :  { %v9406_v44 = vpop.f32.mrf.mxu1  ;;  %v9447_v63 = vpop.f32.mrf.mxu0 }
0x12f6   :  { %v9454_v3 = vadd.f32 %v9406_v44, %v9129_v23  ;;  %v9456_v62 = vadd.f32 %v9447_v63, %v9131_v4 }
0x12f7   :  { %v9408_v8 = vpop.f32.mrf.mxu1  ;;  %v9449_v45 = vpop.f32.mrf.mxu0 }
0x12f8   :  { %v9464_v1 = vadd.f32 %v9462_v57, %v9454_v3  ;;  %v9466_v59 = vadd.f32 %v9462_v57, %v9456_v62  ;;  %v9455_v49 = vadd.f32 %v9408_v8, %v9130_v41  ;;  %v9457_v22 = vadd.f32 %v9449_v45, %v9132_v50 }
0x12f9   :  { %v9410_v25 = vpop.f32.mrf.mxu1  ;;  %v9451_v11 = vpop.f32.mrf.mxu0 }
0x12fa   :  { %v11116_v15 = vmul.f32 -1.442695, %v9464_v1  ;;  %v11118_v19 = vmul.f32 -1.442695, %v9466_v59  ;;  %v9465_v20 = vadd.f32 %v9462_v57, %v9455_v49  ;;  %v9467_v39 = vadd.f32 %v9462_v57, %v9457_v22 }
0x12fb   :  { %v9411_v56 = vpop.f32.mrf.mxu1  ;;  %v9452_v35 = vpop.f32.mrf.mxu0 }
0x12fc   :  { %13282 = vpow2.f32 %v11116_v15  ;;  %v11117_v16 = vmul.f32 -1.442695, %v9465_v20  ;;  %v11119_v13 = vmul.f32 -1.442695, %v9467_v39 }
0x12fd   :  { %13284 = vpow2.f32 %v11118_v19 }
0x12fe   :  { %13286 = vpow2.f32 %v11117_v16 }
0x12ff   :  { %13288 = vpow2.f32 %v11119_v13 }
0x1309   :  { %v13283_v30 = vpop.eup %13282 }
0x130a   :  { %v13285_v6 = vpop.eup %13284  ;;  %v9480_v32 = vadd.f32 1.0, %v13283_v30 }
0x130b   :  { %v13287_v24 = vpop.eup %13286  ;;  %v9482_v36 = vadd.f32 1.0, %v13285_v6 }
0x130c   :  { %v13289_v60 = vpop.eup %13288  ;;  %13290 = vrcp.f32 %v9480_v32  ;;  %v9481_v10 = vadd.f32 1.0, %v13287_v24 }
0x130d   :  { %13292 = vrcp.f32 %v9482_v36  ;;  %v9483_v9 = vadd.f32 1.0, %v13289_v60 }
0x130e   :  { %13294 = vrcp.f32 %v9481_v10 }
0x130f   :  { %13296 = vrcp.f32 %v9483_v9 }
0x1319   :  { %v13291_v12 = vpop.eup %13290 }
0x131a   :  { %v13293_v46 = vpop.eup %13292 }
0x131b   :  { %v13295_v29 = vpop.eup %13294 }
0x131c   :  { %v13297_v26 = vpop.eup %13296  ;;  %v9494_v55 = vcombine.low %v13291_v12, %v13295_v29 }
0x131d   :  { %v9499_v47 = vcombine.low %v13293_v46, %v13297_v26 }
0x131e   :  { %9496 = vst [vmem:[%s15765_s13] sm:$0x77] %v9494_v55 }
0x131f   :  { %11120 = vst [vmem:[%s15765_s13 + $0x8] sm:$0x77] %v9499_v47 }
0x1320   :  { %9507 = vsyncpa [#allocation3], 1 }
0x1321   :  { %9508 = vsyncpa [#allocation5], 1 }

</bundles_post_ra>
